<compile_context>
chip_gen: v6e
topology: v6e:2x2x1
jax: 0.10.0
libtpu: 0.0.40
codegen_flags: <defaults>
</compile_context>

<pallas_src>
import functools
import math

import jax
import jax.numpy as jnp
from jax import lax
from jax.experimental import pallas as pl
from jax.experimental.pallas import tpu as pltpu

_LN_EPS = 1e-5


# --------------------------------------------------------------------------- helpers
def _erf(x):
    # Abramowitz & Stegun 7.1.26 (|err| < 1.5e-7); exp/abs/where only -> VPU/EUP.
    p = 0.3275911
    a1, a2, a3, a4, a5 = (0.254829592, -0.284496736, 1.421413741,
                          -1.453152027, 1.061405429)
    ax = jnp.abs(x)
    t = 1.0 / (1.0 + p * ax)
    poly = ((((a5 * t + a4) * t + a3) * t + a2) * t + a1) * t
    y = 1.0 - poly * jnp.exp(-ax * ax)
    return jnp.where(x < 0, -y, y)


def _gelu(x):
    # exact (erf) GELU, matching torch.nn.GELU() default
    return 0.5 * x * (1.0 + _erf(x * 0.7071067811865476))


def _layernorm(x, g, b):
    # E[x^2] - mu^2 form: one fewer full (rows, C) pass than E[(x-mu)^2].
    mu = jnp.mean(x, axis=-1, keepdims=True)
    var = jnp.mean(x * x, axis=-1, keepdims=True) - mu * mu
    return (x - mu) * lax.rsqrt(var + _LN_EPS) * g + b


def _round_up(x, m):
    return ((x + m - 1) // m) * m


# ------------------------------------------------------------------ fused kernel (primary)
def _fused_kernel(scale,
                  x_ref, g1_ref, be1_ref, w1_ref, b1_ref, w2_ref, b2_ref,
                  g2_ref, be2_ref, wq_ref, wk_ref, wv_ref, wp_ref, bp_ref,
                  o_ref):
    """Whole token_Transformer forward for one batch element, VMEM-resident."""
    x = x_ref[0].astype(jnp.float32)                                       # (L, C)
    xn = _layernorm(x, g1_ref[...], be1_ref[...])                          # token_Transformer.norm
    h = _gelu(jnp.dot(xn, w1_ref[...], preferred_element_type=jnp.float32) + b1_ref[...])
    y = jnp.dot(h, w2_ref[...], preferred_element_type=jnp.float32) + b2_ref[...]
    yn = _layernorm(y, g2_ref[...], be2_ref[...])                          # tamper.norm (== shortcut)

    pool = jnp.mean(yn, axis=0, keepdims=True)                             # adaptive_avg_pool2d(.,1) -> (1, C)
    k = jnp.dot(pool, wk_ref[...], preferred_element_type=jnp.float32)     # (1, C)
    v = jnp.dot(pool, wv_ref[...], preferred_element_type=jnp.float32)     # (1, C)
    # q.k == sum(yn * (k @ Wq^T), -1)   (q = yn @ Wq is never materialised)
    at = lax.dot_general(k, wq_ref[...], (((1,), (1,)), ((), ())),
                         preferred_element_type=jnp.float32)               # (1, C)
    vp = jnp.dot(v, wp_ref[...], preferred_element_type=jnp.float32)       # (1, C) proj WITHOUT bias

    attn = jax.nn.sigmoid(jnp.sum(yn * at, axis=-1, keepdims=True) * scale)  # (L, 1)
    # (attn * v) @ Wp + bp + shortcut  ==  attn * (v @ Wp) + bp + yn
    o_ref[0] = (attn * vp + bp_ref[...] + yn).astype(o_ref.dtype)


# ------------------------------------------------------------ streaming fallback kernels
def _norm_mlp_norm_kernel(L, tl, mask_pad,
                          x_ref, g1_ref, be1_ref, w1_ref, b1_ref,
                          w2_ref, b2_ref, g2_ref, be2_ref,
                          yn_ref, pool_ref):
    """Streaming: LN -> Linear+GELU -> Linear -> LN, plus pooled token-mean accumulation."""
    l = pl.program_id(1)

    x = x_ref[0].astype(jnp.float32)                                       # (tl, C)
    xn = _layernorm(x, g1_ref[...], be1_ref[...])
    h = _gelu(jnp.dot(xn, w1_ref[...], preferred_element_type=jnp.float32) + b1_ref[...])
    y = jnp.dot(h, w2_ref[...], preferred_element_type=jnp.float32) + b2_ref[...]
    yn = _layernorm(y, g2_ref[...], be2_ref[...])
    yn_ref[0] = yn.astype(yn_ref.dtype)

    inv_l = 1.0 / L

    @pl.when(l == 0)
    def _():
        pool_ref[0] = jnp.zeros_like(pool_ref[0])

    if mask_pad:
        last = pl.num_programs(1) - 1

        @pl.when(l != last)              # interior tiles: no mask VALU work
        def _():
            pool_ref[0] = pool_ref[0] + jnp.sum(yn, axis=0, keepdims=True) * inv_l

        @pl.when(l == last)              # only the last tile pays for the pad mask
        def _():
            row = l * tl + lax.broadcasted_iota(jnp.int32, (tl, 1), 0)
            ynm = jnp.where(row < L, yn, 0.0)
            pool_ref[0] = pool_ref[0] + jnp.sum(ynm, axis=0, keepdims=True) * inv_l
    else:
        pool_ref[0] = pool_ref[0] + jnp.sum(yn, axis=0, keepdims=True) * inv_l


def _gate_residual_kernel(scale, yn_ref, at_ref, vp_ref, bp_ref, o_ref):
    """Streaming: sigmoid gate + proj bias + residual (pure element-wise, HBM-bound)."""
    yn = yn_ref[0].astype(jnp.float32)                                     # (tl, C)
    attn = jax.nn.sigmoid(jnp.sum(yn * at_ref[0], axis=-1, keepdims=True) * scale)
    o_ref[0] = (attn * vp_ref[0] + bp_ref[...] + yn).astype(o_ref.dtype)


# --------------------------------------------------------------------------- forward
def _fused_vmem_bytes(L, C, itemsize):
    # double-buffered in/out blocks + ~8 live (L, C) f32 temporaries + resident weights
    return 4 * L * C * itemsize + 8 * L * C * 4 + (6 * C * C + 8 * C) * 4


_FUSED_VMEM_BUDGET = 12 * 1024 * 1024     # stays under v5e's 16 MiB scoped-VMEM default


def token_transformer_forward(params, feat, *, force_streaming=False):
    B, L, C = feat.shape
    g1, be1 = params["norm"]
    (w1, b1), (w2, b2) = params["mlp_s"]
    t = params["tamper"]
    g2, be2 = t["norm"]
    scale = 1.0 / math.sqrt(C)            # num_heads=1, qk_scale=None -> head_dim ** -0.5

    row = lambda v: v.reshape(1, -1)
    const2 = lambda b: (0, 0)

    use_fused = (not force_streaming) and \
        _fused_vmem_bytes(L, C, feat.dtype.itemsize) <= _FUSED_VMEM_BUDGET

    if use_fused:
        # ---- single fused kernel: whole (L, C) slab per batch stays in VMEM ---------
        return pl.pallas_call(
            functools.partial(_fused_kernel, scale),
            out_shape=jax.ShapeDtypeStruct((B, L, C), feat.dtype),
            grid=(B,),
            in_specs=[
                pl.BlockSpec((1, L, C), lambda b: (b, 0, 0)),
                pl.BlockSpec((1, C), const2), pl.BlockSpec((1, C), const2),   # norm g,b
                pl.BlockSpec((C, C), const2), pl.BlockSpec((1, C), const2),   # fc1
                pl.BlockSpec((C, C), const2), pl.BlockSpec((1, C), const2),   # fc2
                pl.BlockSpec((1, C), const2), pl.BlockSpec((1, C), const2),   # tamper.norm g,b
                pl.BlockSpec((C, C), const2), pl.BlockSpec((C, C), const2),   # wq, wk
                pl.BlockSpec((C, C), const2), pl.BlockSpec((C, C), const2),   # wv, wp
                pl.BlockSpec((1, C), const2),                                 # bp
            ],
            out_specs=pl.BlockSpec((1, L, C), lambda b: (b, 0, 0)),
            compiler_params=pltpu.CompilerParams(
                dimension_semantics=("parallel",)),
        )(feat, row(g1), row(be1), w1, row(b1), w2, row(b2), row(g2), row(be2),
          t["wq"], t["wk"], t["wv"], t["wp"], row(t["bp"]))

    # ---- streaming fallback for very long sequences --------------------------------
    tl = 512 if L > 512 else _round_up(L, 8)
    Lp = _round_up(L, tl)
    nlt = Lp // tl
    mask_pad = Lp != L
    feat_p = jnp.pad(feat, ((0, 0), (0, Lp - L), (0, 0))) if mask_pad else feat

    cmap = lambda b, l: (0, 0)
    yn, pool = pl.pallas_call(
        functools.partial(_norm_mlp_norm_kernel, L, tl, mask_pad),
        out_shape=(jax.ShapeDtypeStruct((B, Lp, C), feat.dtype),
                   jax.ShapeDtypeStruct((B, 1, C), jnp.float32)),
        grid=(B, nlt),
        in_specs=[
            pl.BlockSpec((1, tl, C), lambda b, l: (b, l, 0)),
            pl.BlockSpec((1, C), cmap), pl.BlockSpec((1, C), cmap),
            pl.BlockSpec((C, C), cmap), pl.BlockSpec((1, C), cmap),
            pl.BlockSpec((C, C), cmap), pl.BlockSpec((1, C), cmap),
            pl.BlockSpec((1, C), cmap), pl.BlockSpec((1, C), cmap),
        ],
        out_specs=(pl.BlockSpec((1, tl, C), lambda b, l: (b, l, 0)),
                   pl.BlockSpec((1, 1, C), lambda b, l: (b, 0, 0))),
        compiler_params=pltpu.CompilerParams(
            dimension_semantics=("parallel", "arbitrary")),
    )(feat_p, row(g1), row(be1), w1, row(b1), w2, row(b2), row(g2), row(be2))

    # Per-batch invariants hoisted to plain XLA (tiny (B, C) mat-vecs); the second
    # kernel is then a pure element-wise stream at the HBM roofline.
    p2 = pool[:, 0, :]                                   # (B, C), f32
    at = (p2 @ t["wk"]) @ t["wq"].T                      # q.k == sum(yn * at, -1)
    vp = (p2 @ t["wv"]) @ t["wp"]                        # proj WITHOUT bias (added in-kernel)

    out = pl.pallas_call(
        functools.partial(_gate_residual_kernel, scale),
        out_shape=jax.ShapeDtypeStruct((B, Lp, C), feat.dtype),
        grid=(B, nlt),
        in_specs=[
            pl.BlockSpec((1, tl, C), lambda b, l: (b, l, 0)),
            pl.BlockSpec((1, 1, C), lambda b, l: (b, 0, 0)),
            pl.BlockSpec((1, 1, C), lambda b, l: (b, 0, 0)),
            pl.BlockSpec((1, C), cmap),
        ],
        out_specs=pl.BlockSpec((1, tl, C), lambda b, l: (b, l, 0)),
        compiler_params=pltpu.CompilerParams(
            dimension_semantics=("parallel", "parallel")),
    )(yn, at[:, None, :], vp[:, None, :], row(t["bp"]))

    return out[:, :L, :] if mask_pad else out


# --------------------------------------------------------------------------- reference
def token_transformer_reference(params, feat):
    """Pure-JAX reference of token_Transformer.forward (for numerical validation)."""
    g1, be1 = params["norm"]
    (w1, b1), (w2, b2) = params["mlp_s"]
    t = params["tamper"]
    g2, be2 = t["norm"]
    C = feat.shape[-1]

    x = _layernorm(feat, g1, be1)
    x = jax.nn.gelu(x @ w1 + b1, approximate=False) @ w2 + b2
    xn = _layernorm(x, g2, be2)                                    # shortcut (post tamper.norm)
    pool = jnp.mean(xn, axis=1, keepdims=True)                     # adaptive_avg_pool2d(., 1)
    q = xn @ t["wq"]
    k = pool @ t["wk"]
    v = pool @ t["wv"]
    attn = jax.nn.sigmoid(jnp.sum(q * k, axis=-1, keepdims=True) * (C ** -0.5))
    pred = (attn * v) @ t["wp"] + t["bp"]
    return pred + xn


# --------------------------------------------------------------------------- params
def init_params(key, dim):
    ks = iter(jax.random.split(key, 16))
    nk = lambda: next(ks)

    def w(fi, fo):                       # stored transposed: y = x @ W
        return jax.random.normal(nk(), (fi, fo), jnp.float32) * (fi ** -0.5)

    def b(fo):
        return jax.random.normal(nk(), (fo,), jnp.float32) * 0.02

    def ln():
        return (1.0 + 0.1 * jax.random.normal(nk(), (dim,), jnp.float32),
                0.1 * jax.random.normal(nk(), (dim,), jnp.float32))

    return {
        "norm": ln(),                                                    # token_Transformer.norm
        "mlp_s": ((w(dim, dim), b(dim)), (w(dim, dim), b(dim))),         # Linear, GELU, Linear
        "tamper": {
            "norm": ln(),                                                # tamper.norm
            "wq": w(dim, dim),                                           # qkv_bias=False
            "wk": w(dim, dim),
            "wv": w(dim, dim),
            "wp": w(dim, dim),                                           # proj (with bias)
            "bp": b(dim),
        },
    }


# --------------------------------------------------------------------------- main
if __name__ == "__main__":
    B, L, DIM = 2, 196, 128       # 14x14 tokens; embed_dim shrunk from 384 for the demo
    key = jax.random.PRNGKey(0)
    kp, kx = jax.random.split(key)
    params = init_params(kp, DIM)
    feat = jax.random.normal(kx, (B, L, DIM), jnp.float32)

    ref = token_transformer_reference(params, feat)

    # primary fused path
    fwd = jax.jit(token_transformer_forward)
    out = jax.block_until_ready(fwd(params, feat))
    assert out.shape == (B, L, DIM), out.shape
    assert bool(jnp.all(jnp.isfinite(out)))
    max_err = float(jnp.max(jnp.abs(out - ref)))
    assert max_err < 1e-3, f"fused path max abs error vs reference: {max_err}"

    # long-sequence streaming fallback (exercised here on the same small data)
    fwd_s = jax.jit(functools.partial(token_transformer_forward, force_streaming=True))
    out_s = jax.block_until_ready(fwd_s(params, feat))
    max_err_s = float(jnp.max(jnp.abs(out_s - ref)))
    assert max_err_s < 1e-3, f"streaming path max abs error vs reference: {max_err_s}"

    print("KERNEL_OK")
</pallas_src>

<mosaic_0001>
module attributes {stable_mosaic.version = 11 : i64} {
  func.func @_fused_kernel(%arg0: i32, %arg1: memref<1x196x128xf32, #tpu.memory_space<vmem>>, %arg2: memref<1x128xf32, #tpu.memory_space<vmem>>, %arg3: memref<1x128xf32, #tpu.memory_space<vmem>>, %arg4: memref<128x128xf32, #tpu.memory_space<vmem>>, %arg5: memref<1x128xf32, #tpu.memory_space<vmem>>, %arg6: memref<128x128xf32, #tpu.memory_space<vmem>>, %arg7: memref<1x128xf32, #tpu.memory_space<vmem>>, %arg8: memref<1x128xf32, #tpu.memory_space<vmem>>, %arg9: memref<1x128xf32, #tpu.memory_space<vmem>>, %arg10: memref<128x128xf32, #tpu.memory_space<vmem>>, %arg11: memref<128x128xf32, #tpu.memory_space<vmem>>, %arg12: memref<128x128xf32, #tpu.memory_space<vmem>>, %arg13: memref<128x128xf32, #tpu.memory_space<vmem>>, %arg14: memref<1x128xf32, #tpu.memory_space<vmem>>, %arg15: memref<1x196x128xf32, #tpu.memory_space<vmem>>) attributes {dimension_semantics = [#tpu.dimension_semantics<parallel>], iteration_bounds = array<i64: 2>, scalar_prefetch = 0 : i64, scratch_operands = 0 : i64, tpu.core_type = #tpu.core_type<tc>, window_params = [{transform_indices = @transform_0, window_bounds = array<i64: 1, 196, 128>}, {pipeline_mode = #tpu.pipeline_mode<synchronous>, transform_indices = @transform_1, window_bounds = array<i64: 1, 128>}, {pipeline_mode = #tpu.pipeline_mode<synchronous>, transform_indices = @transform_2, window_bounds = array<i64: 1, 128>}, {pipeline_mode = #tpu.pipeline_mode<synchronous>, transform_indices = @transform_3, window_bounds = array<i64: 128, 128>}, {pipeline_mode = #tpu.pipeline_mode<synchronous>, transform_indices = @transform_4, window_bounds = array<i64: 1, 128>}, {pipeline_mode = #tpu.pipeline_mode<synchronous>, transform_indices = @transform_5, window_bounds = array<i64: 128, 128>}, {pipeline_mode = #tpu.pipeline_mode<synchronous>, transform_indices = @transform_6, window_bounds = array<i64: 1, 128>}, {pipeline_mode = #tpu.pipeline_mode<synchronous>, transform_indices = @transform_7, window_bounds = array<i64: 1, 128>}, {pipeline_mode = #tpu.pipeline_mode<synchronous>, transform_indices = @transform_8, window_bounds = array<i64: 1, 128>}, {pipeline_mode = #tpu.pipeline_mode<synchronous>, transform_indices = @transform_9, window_bounds = array<i64: 128, 128>}, {pipeline_mode = #tpu.pipeline_mode<synchronous>, transform_indices = @transform_10, window_bounds = array<i64: 128, 128>}, {pipeline_mode = #tpu.pipeline_mode<synchronous>, transform_indices = @transform_11, window_bounds = array<i64: 128, 128>}, {pipeline_mode = #tpu.pipeline_mode<synchronous>, transform_indices = @transform_12, window_bounds = array<i64: 128, 128>}, {pipeline_mode = #tpu.pipeline_mode<synchronous>, transform_indices = @transform_13, window_bounds = array<i64: 1, 128>}, {transform_indices = @transform_14, window_bounds = array<i64: 1, 196, 128>}]} {
    %c0 = arith.constant 0 : index
    %c0_0 = arith.constant 0 : index
    %c0_1 = arith.constant 0 : index
    %0 = vector.load %arg1[%c0, %c0_0, %c0_1] : memref<1x196x128xf32, #tpu.memory_space<vmem>>, vector<1x196x128xf32>
    %1 = vector.shape_cast %0 : vector<1x196x128xf32> to vector<196x128xf32>
    %c0_2 = arith.constant 0 : index
    %c0_3 = arith.constant 0 : index
    %2 = vector.load %arg2[%c0_2, %c0_3] : memref<1x128xf32, #tpu.memory_space<vmem>>, vector<1x128xf32>
    %c0_4 = arith.constant 0 : index
    %c0_5 = arith.constant 0 : index
    %3 = vector.load %arg3[%c0_4, %c0_5] : memref<1x128xf32, #tpu.memory_space<vmem>>, vector<1x128xf32>
    %cst = arith.constant dense<0.000000e+00> : vector<196xf32>
    %4 = vector.multi_reduction <add>, %1, %cst [1] : vector<196x128xf32> to vector<196xf32>
    %5 = vector.shape_cast %4 : vector<196xf32> to vector<196x1xf32>
    %cst_6 = arith.constant 1.280000e+02 : f32
    %6 = vector.broadcast %cst_6 : f32 to vector<196x1xf32>
    %7 = arith.divf %5, %6 : vector<196x1xf32>
    %8 = arith.mulf %1, %1 : vector<196x128xf32>
    %cst_7 = arith.constant dense<0.000000e+00> : vector<196xf32>
    %9 = vector.multi_reduction <add>, %8, %cst_7 [1] : vector<196x128xf32> to vector<196xf32>
    %10 = vector.shape_cast %9 : vector<196xf32> to vector<196x1xf32>
    %cst_8 = arith.constant 1.280000e+02 : f32
    %11 = vector.broadcast %cst_8 : f32 to vector<196x1xf32>
    %12 = arith.divf %10, %11 : vector<196x1xf32>
    %13 = arith.mulf %7, %7 : vector<196x1xf32>
    %14 = arith.subf %12, %13 : vector<196x1xf32>
    %15 = vector.broadcast %7 : vector<196x1xf32> to vector<196x128xf32>
    %16 = arith.subf %1, %15 : vector<196x128xf32>
    %cst_9 = arith.constant 9.99999974E-6 : f32
    %17 = vector.broadcast %cst_9 : f32 to vector<196x1xf32>
    %18 = arith.addf %14, %17 : vector<196x1xf32>
    %19 = math.rsqrt %18 : vector<196x1xf32>
    %20 = vector.broadcast %19 : vector<196x1xf32> to vector<196x128xf32>
    %21 = arith.mulf %16, %20 : vector<196x128xf32>
    %22 = vector.broadcast %2 : vector<1x128xf32> to vector<196x128xf32>
    %23 = arith.mulf %21, %22 : vector<196x128xf32>
    %24 = vector.broadcast %3 : vector<1x128xf32> to vector<196x128xf32>
    %25 = arith.addf %23, %24 : vector<196x128xf32>
    %c0_10 = arith.constant 0 : index
    %c0_11 = arith.constant 0 : index
    %26 = vector.load %arg4[%c0_10, %c0_11] : memref<128x128xf32, #tpu.memory_space<vmem>>, vector<128x128xf32>
    %cst_12 = arith.constant dense<0.000000e+00> : vector<196x128xf32>
    %27 = tpu.matmul %25, %26, %cst_12 {dimension_numbers = #tpu.dot_dimension_numbers<[1], [0], [0], [1], [0, 0, 1, 1], [], []>} : vector<196x128xf32>, vector<128x128xf32>, vector<196x128xf32> -> vector<196x128xf32>
    %c0_13 = arith.constant 0 : index
    %c0_14 = arith.constant 0 : index
    %28 = vector.load %arg5[%c0_13, %c0_14] : memref<1x128xf32, #tpu.memory_space<vmem>>, vector<1x128xf32>
    %29 = vector.broadcast %28 : vector<1x128xf32> to vector<196x128xf32>
    %30 = arith.addf %27, %29 : vector<196x128xf32>
    %cst_15 = arith.constant 5.000000e-01 : f32
    %31 = vector.broadcast %cst_15 : f32 to vector<196x128xf32>
    %32 = arith.mulf %31, %30 : vector<196x128xf32>
    %cst_16 = arith.constant 0.707106769 : f32
    %33 = vector.broadcast %cst_16 : f32 to vector<196x128xf32>
    %34 = arith.mulf %30, %33 : vector<196x128xf32>
    %35 = math.absf %34 : vector<196x128xf32>
    %cst_17 = arith.constant 0.327591091 : f32
    %36 = vector.broadcast %cst_17 : f32 to vector<196x128xf32>
    %37 = arith.mulf %36, %35 : vector<196x128xf32>
    %cst_18 = arith.constant 1.000000e+00 : f32
    %38 = vector.broadcast %cst_18 : f32 to vector<196x128xf32>
    %39 = arith.addf %38, %37 : vector<196x128xf32>
    %cst_19 = arith.constant 1.000000e+00 : f32
    %40 = vector.broadcast %cst_19 : f32 to vector<196x128xf32>
    %41 = arith.divf %40, %39 : vector<196x128xf32>
    %cst_20 = arith.constant 1.06140542 : f32
    %42 = vector.broadcast %cst_20 : f32 to vector<196x128xf32>
    %43 = arith.mulf %42, %41 : vector<196x128xf32>
    %cst_21 = arith.constant -1.45315206 : f32
    %44 = vector.broadcast %cst_21 : f32 to vector<196x128xf32>
    %45 = arith.addf %43, %44 : vector<196x128xf32>
    %46 = arith.mulf %45, %41 : vector<196x128xf32>
    %cst_22 = arith.constant 1.42141378 : f32
    %47 = vector.broadcast %cst_22 : f32 to vector<196x128xf32>
    %48 = arith.addf %46, %47 : vector<196x128xf32>
    %49 = arith.mulf %48, %41 : vector<196x128xf32>
    %cst_23 = arith.constant -0.284496725 : f32
    %50 = vector.broadcast %cst_23 : f32 to vector<196x128xf32>
    %51 = arith.addf %49, %50 : vector<196x128xf32>
    %52 = arith.mulf %51, %41 : vector<196x128xf32>
    %cst_24 = arith.constant 0.254829586 : f32
    %53 = vector.broadcast %cst_24 : f32 to vector<196x128xf32>
    %54 = arith.addf %52, %53 : vector<196x128xf32>
    %55 = arith.mulf %54, %41 : vector<196x128xf32>
    %cst_25 = arith.constant 0.000000e+00 : f32
    %56 = vector.broadcast %cst_25 : f32 to vector<196x128xf32>
    %57 = arith.subf %56, %35 : vector<196x128xf32>
    %58 = arith.mulf %57, %35 : vector<196x128xf32>
    %59 = math.exp %58 : vector<196x128xf32>
    %60 = arith.mulf %55, %59 : vector<196x128xf32>
    %cst_26 = arith.constant 1.000000e+00 : f32
    %61 = vector.broadcast %cst_26 : f32 to vector<196x128xf32>
    %62 = arith.subf %61, %60 : vector<196x128xf32>
    %cst_27 = arith.constant 0.000000e+00 : f32
    %63 = vector.broadcast %cst_27 : f32 to vector<196x128xf32>
    %64 = arith.cmpf olt, %34, %63 : vector<196x128xf32>
    %cst_28 = arith.constant 0.000000e+00 : f32
    %65 = vector.broadcast %cst_28 : f32 to vector<196x128xf32>
    %66 = arith.subf %65, %62 : vector<196x128xf32>
    %67 = arith.select %64, %66, %62 : vector<196x128xi1>, vector<196x128xf32>
    %cst_29 = arith.constant 1.000000e+00 : f32
    %68 = vector.broadcast %cst_29 : f32 to vector<196x128xf32>
    %69 = arith.addf %68, %67 : vector<196x128xf32>
    %70 = arith.mulf %32, %69 : vector<196x128xf32>
    %c0_30 = arith.constant 0 : index
    %c0_31 = arith.constant 0 : index
    %71 = vector.load %arg6[%c0_30, %c0_31] : memref<128x128xf32, #tpu.memory_space<vmem>>, vector<128x128xf32>
    %cst_32 = arith.constant dense<0.000000e+00> : vector<196x128xf32>
    %72 = tpu.matmul %70, %71, %cst_32 {dimension_numbers = #tpu.dot_dimension_numbers<[1], [0], [0], [1], [0, 0, 1, 1], [], []>} : vector<196x128xf32>, vector<128x128xf32>, vector<196x128xf32> -> vector<196x128xf32>
    %c0_33 = arith.constant 0 : index
    %c0_34 = arith.constant 0 : index
    %73 = vector.load %arg7[%c0_33, %c0_34] : memref<1x128xf32, #tpu.memory_space<vmem>>, vector<1x128xf32>
    %74 = vector.broadcast %73 : vector<1x128xf32> to vector<196x128xf32>
    %75 = arith.addf %72, %74 : vector<196x128xf32>
    %c0_35 = arith.constant 0 : index
    %c0_36 = arith.constant 0 : index
    %76 = vector.load %arg8[%c0_35, %c0_36] : memref<1x128xf32, #tpu.memory_space<vmem>>, vector<1x128xf32>
    %c0_37 = arith.constant 0 : index
    %c0_38 = arith.constant 0 : index
    %77 = vector.load %arg9[%c0_37, %c0_38] : memref<1x128xf32, #tpu.memory_space<vmem>>, vector<1x128xf32>
    %cst_39 = arith.constant dense<0.000000e+00> : vector<196xf32>
    %78 = vector.multi_reduction <add>, %75, %cst_39 [1] : vector<196x128xf32> to vector<196xf32>
    %79 = vector.shape_cast %78 : vector<196xf32> to vector<196x1xf32>
    %cst_40 = arith.constant 1.280000e+02 : f32
    %80 = vector.broadcast %cst_40 : f32 to vector<196x1xf32>
    %81 = arith.divf %79, %80 : vector<196x1xf32>
    %82 = arith.mulf %75, %75 : vector<196x128xf32>
    %cst_41 = arith.constant dense<0.000000e+00> : vector<196xf32>
    %83 = vector.multi_reduction <add>, %82, %cst_41 [1] : vector<196x128xf32> to vector<196xf32>
    %84 = vector.shape_cast %83 : vector<196xf32> to vector<196x1xf32>
    %cst_42 = arith.constant 1.280000e+02 : f32
    %85 = vector.broadcast %cst_42 : f32 to vector<196x1xf32>
    %86 = arith.divf %84, %85 : vector<196x1xf32>
    %87 = arith.mulf %81, %81 : vector<196x1xf32>
    %88 = arith.subf %86, %87 : vector<196x1xf32>
    %89 = vector.broadcast %81 : vector<196x1xf32> to vector<196x128xf32>
    %90 = arith.subf %75, %89 : vector<196x128xf32>
    %cst_43 = arith.constant 9.99999974E-6 : f32
    %91 = vector.broadcast %cst_43 : f32 to vector<196x1xf32>
    %92 = arith.addf %88, %91 : vector<196x1xf32>
    %93 = math.rsqrt %92 : vector<196x1xf32>
    %94 = vector.broadcast %93 : vector<196x1xf32> to vector<196x128xf32>
    %95 = arith.mulf %90, %94 : vector<196x128xf32>
    %96 = vector.broadcast %76 : vector<1x128xf32> to vector<196x128xf32>
    %97 = arith.mulf %95, %96 : vector<196x128xf32>
    %98 = vector.broadcast %77 : vector<1x128xf32> to vector<196x128xf32>
    %99 = arith.addf %97, %98 : vector<196x128xf32>
    %cst_44 = arith.constant dense<0.000000e+00> : vector<128xf32>
    %100 = vector.multi_reduction <add>, %99, %cst_44 [0] : vector<196x128xf32> to vector<128xf32>
    %101 = vector.shape_cast %100 : vector<128xf32> to vector<1x128xf32>
    %cst_45 = arith.constant 1.960000e+02 : f32
    %102 = vector.broadcast %cst_45 : f32 to vector<1x128xf32>
    %103 = arith.divf %101, %102 : vector<1x128xf32>
    %c0_46 = arith.constant 0 : index
    %c0_47 = arith.constant 0 : index
    %104 = vector.load %arg11[%c0_46, %c0_47] : memref<128x128xf32, #tpu.memory_space<vmem>>, vector<128x128xf32>
    %cst_48 = arith.constant dense<0.000000e+00> : vector<1x128xf32>
    %105 = tpu.matmul %103, %104, %cst_48 {dimension_numbers = #tpu.dot_dimension_numbers<[1], [0], [0], [1], [0, 0, 1, 1], [], []>} : vector<1x128xf32>, vector<128x128xf32>, vector<1x128xf32> -> vector<1x128xf32>
    %c0_49 = arith.constant 0 : index
    %c0_50 = arith.constant 0 : index
    %106 = vector.load %arg12[%c0_49, %c0_50] : memref<128x128xf32, #tpu.memory_space<vmem>>, vector<128x128xf32>
    %cst_51 = arith.constant dense<0.000000e+00> : vector<1x128xf32>
    %107 = tpu.matmul %103, %106, %cst_51 {dimension_numbers = #tpu.dot_dimension_numbers<[1], [0], [0], [1], [0, 0, 1, 1], [], []>} : vector<1x128xf32>, vector<128x128xf32>, vector<1x128xf32> -> vector<1x128xf32>
    %c0_52 = arith.constant 0 : index
    %c0_53 = arith.constant 0 : index
    %108 = vector.load %arg10[%c0_52, %c0_53] : memref<128x128xf32, #tpu.memory_space<vmem>>, vector<128x128xf32>
    %cst_54 = arith.constant dense<0.000000e+00> : vector<1x128xf32>
    %109 = tpu.matmul %105, %108, %cst_54 {dimension_numbers = #tpu.dot_dimension_numbers<[1], [1], [0], [0], [0, 0, 1, 0], [], []>} : vector<1x128xf32>, vector<128x128xf32>, vector<1x128xf32> -> vector<1x128xf32>
    %c0_55 = arith.constant 0 : index
    %c0_56 = arith.constant 0 : index
    %110 = vector.load %arg13[%c0_55, %c0_56] : memref<128x128xf32, #tpu.memory_space<vmem>>, vector<128x128xf32>
    %cst_57 = arith.constant dense<0.000000e+00> : vector<1x128xf32>
    %111 = tpu.matmul %107, %110, %cst_57 {dimension_numbers = #tpu.dot_dimension_numbers<[1], [0], [0], [1], [0, 0, 1, 1], [], []>} : vector<1x128xf32>, vector<128x128xf32>, vector<1x128xf32> -> vector<1x128xf32>
    %112 = vector.broadcast %109 : vector<1x128xf32> to vector<196x128xf32>
    %113 = arith.mulf %99, %112 : vector<196x128xf32>
    %cst_58 = arith.constant dense<0.000000e+00> : vector<196xf32>
    %114 = vector.multi_reduction <add>, %113, %cst_58 [1] : vector<196x128xf32> to vector<196xf32>
    %115 = vector.shape_cast %114 : vector<196xf32> to vector<196x1xf32>
    %cst_59 = arith.constant 0.0883883461 : f32
    %116 = vector.broadcast %cst_59 : f32 to vector<196x1xf32>
    %117 = arith.mulf %115, %116 : vector<196x1xf32>
    %118 = arith.negf %117 : vector<196x1xf32>
    %119 = math.exp %118 : vector<196x1xf32>
    %cst_60 = arith.constant 1.000000e+00 : f32
    %120 = vector.broadcast %cst_60 : f32 to vector<196x1xf32>
    %121 = arith.addf %120, %119 : vector<196x1xf32>
    %122 = arith.divf %120, %121 : vector<196x1xf32>
    %123 = vector.broadcast %122 : vector<196x1xf32> to vector<196x128xf32>
    %124 = vector.broadcast %111 : vector<1x128xf32> to vector<196x128xf32>
    %125 = arith.mulf %123, %124 : vector<196x128xf32>
    %c0_61 = arith.constant 0 : index
    %c0_62 = arith.constant 0 : index
    %126 = vector.load %arg14[%c0_61, %c0_62] : memref<1x128xf32, #tpu.memory_space<vmem>>, vector<1x128xf32>
    %127 = vector.broadcast %126 : vector<1x128xf32> to vector<196x128xf32>
    %128 = arith.addf %125, %127 : vector<196x128xf32>
    %129 = arith.addf %128, %99 : vector<196x128xf32>
    %c0_63 = arith.constant 0 : index
    %c0_64 = arith.constant 0 : index
    %c0_65 = arith.constant 0 : index
    %130 = vector.load %arg15[%c0_63, %c0_64, %c0_65] : memref<1x196x128xf32, #tpu.memory_space<vmem>>, vector<1x196x128xf32>
    %131 = vector.shape_cast %130 : vector<1x196x128xf32> to vector<196x128xf32>
    %132 = vector.shape_cast %129 : vector<196x128xf32> to vector<1x196x128xf32>
    tpu.vector_store %arg15[%c0_63, %c0_64, %c0_65], %132 {strides = array<i32>} : memref<1x196x128xf32, #tpu.memory_space<vmem>>, vector<1x196x128xf32>,
    return
  }
  func.func @transform_0(%arg0: i32) -> (i32, i32, i32) {
    %c0_i32 = arith.constant 0 : i32
    %c0_i32_0 = arith.constant 0 : i32
    %c0_i32_1 = arith.constant 0 : i32
    return %arg0, %c0_i32, %c0_i32_0 : i32, i32, i32
  }
  func.func @transform_1(%arg0: i32) -> (i32, i32) {
    %c0_i32 = arith.constant 0 : i32
    %c0_i32_0 = arith.constant 0 : i32
    %c0_i32_1 = arith.constant 0 : i32
    return %c0_i32, %c0_i32_0 : i32, i32
  }
  func.func @transform_2(%arg0: i32) -> (i32, i32) {
    %c0_i32 = arith.constant 0 : i32
    %c0_i32_0 = arith.constant 0 : i32
    %c0_i32_1 = arith.constant 0 : i32
    return %c0_i32, %c0_i32_0 : i32, i32
  }
  func.func @transform_3(%arg0: i32) -> (i32, i32) {
    %c0_i32 = arith.constant 0 : i32
    %c0_i32_0 = arith.constant 0 : i32
    %c0_i32_1 = arith.constant 0 : i32
    return %c0_i32, %c0_i32_0 : i32, i32
  }
  func.func @transform_4(%arg0: i32) -> (i32, i32) {
    %c0_i32 = arith.constant 0 : i32
    %c0_i32_0 = arith.constant 0 : i32
    %c0_i32_1 = arith.constant 0 : i32
    return %c0_i32, %c0_i32_0 : i32, i32
  }
  func.func @transform_5(%arg0: i32) -> (i32, i32) {
    %c0_i32 = arith.constant 0 : i32
    %c0_i32_0 = arith.constant 0 : i32
    %c0_i32_1 = arith.constant 0 : i32
    return %c0_i32, %c0_i32_0 : i32, i32
  }
  func.func @transform_6(%arg0: i32) -> (i32, i32) {
    %c0_i32 = arith.constant 0 : i32
    %c0_i32_0 = arith.constant 0 : i32
    %c0_i32_1 = arith.constant 0 : i32
    return %c0_i32, %c0_i32_0 : i32, i32
  }
  func.func @transform_7(%arg0: i32) -> (i32, i32) {
    %c0_i32 = arith.constant 0 : i32
    %c0_i32_0 = arith.constant 0 : i32
    %c0_i32_1 = arith.constant 0 : i32
    return %c0_i32, %c0_i32_0 : i32, i32
  }
  func.func @transform_8(%arg0: i32) -> (i32, i32) {
    %c0_i32 = arith.constant 0 : i32
    %c0_i32_0 = arith.constant 0 : i32
    %c0_i32_1 = arith.constant 0 : i32
    return %c0_i32, %c0_i32_0 : i32, i32
  }
  func.func @transform_9(%arg0: i32) -> (i32, i32) {
    %c0_i32 = arith.constant 0 : i32
    %c0_i32_0 = arith.constant 0 : i32
    %c0_i32_1 = arith.constant 0 : i32
    return %c0_i32, %c0_i32_0 : i32, i32
  }
  func.func @transform_10(%arg0: i32) -> (i32, i32) {
    %c0_i32 = arith.constant 0 : i32
    %c0_i32_0 = arith.constant 0 : i32
    %c0_i32_1 = arith.constant 0 : i32
    return %c0_i32, %c0_i32_0 : i32, i32
  }
  func.func @transform_11(%arg0: i32) -> (i32, i32) {
    %c0_i32 = arith.constant 0 : i32
    %c0_i32_0 = arith.constant 0 : i32
    %c0_i32_1 = arith.constant 0 : i32
    return %c0_i32, %c0_i32_0 : i32, i32
  }
  func.func @transform_12(%arg0: i32) -> (i32, i32) {
    %c0_i32 = arith.constant 0 : i32
    %c0_i32_0 = arith.constant 0 : i32
    %c0_i32_1 = arith.constant 0 : i32
    return %c0_i32, %c0_i32_0 : i32, i32
  }
  func.func @transform_13(%arg0: i32) -> (i32, i32) {
    %c0_i32 = arith.constant 0 : i32
    %c0_i32_0 = arith.constant 0 : i32
    %c0_i32_1 = arith.constant 0 : i32
    return %c0_i32, %c0_i32_0 : i32, i32
  }
  func.func @transform_14(%arg0: i32) -> (i32, i32, i32) {
    %c0_i32 = arith.constant 0 : i32
    %c0_i32_0 = arith.constant 0 : i32
    %c0_i32_1 = arith.constant 0 : i32
    return %arg0, %c0_i32, %c0_i32_0 : i32, i32, i32
  }
}

</mosaic_0001>

<bundles_post_ra>
// kernel: token_transformer_forward.1
= control target key start
LH: loop header
LB: loop body
LE: loop exit
PB: predicated region body
PF: predicated region fallthrough
CT: control target
= control target key end

     0   :  { %s4117_s29 = smov 0   ;;  %s6139_s0 = inlined_call_operand.vmem [shape: f32[2,196,128], index: 0, kind: input, shape index: {}]   ;;  %s6140_s1 = inlined_call_operand.vmem [shape: f32[1,128], index: 1, kind: input, shape index: {}]   ;;  %s6141_s2 = inlined_call_operand.vmem [shape: f32[1,128], index: 2, kind: input, shape index: {}]   ;;  %s6142_s3 = inlined_call_operand.vmem [shape: f32[128,128], index: 3, kind: input, shape index: {}]   ;;  %s6143_s4 = inlined_call_operand.vmem [shape: f32[1,128], index: 4, kind: input, shape index: {}]   ;;  %s6144_s5 = inlined_call_operand.vmem [shape: f32[128,128], index: 5, kind: input, shape index: {}]   ;;  %s6145_s6 = inlined_call_operand.vmem [shape: f32[1,128], index: 6, kind: input, shape index: {}]   ;;  %s6146_s7 = inlined_call_operand.vmem [shape: f32[1,128], index: 7, kind: input, shape index: {}]   ;;  %s6147_s8 = inlined_call_operand.vmem [shape: f32[1,128], index: 8, kind: input, shape index: {}]   ;;  %s6148_s9 = inlined_call_operand.vmem [shape: f32[128,128], index: 9, kind: input, shape index: {}]   ;;  %s6149_s10 = inlined_call_operand.vmem [shape: f32[128,128], index: 10, kind: input, shape index: {}]   ;;  %s6150_s11 = inlined_call_operand.vmem [shape: f32[128,128], index: 11, kind: input, shape index: {}]   ;;  %s6151_s12 = inlined_call_operand.vmem [shape: f32[128,128], index: 12, kind: input, shape index: {}]   ;;  %s6152_s13 = inlined_call_operand.vmem [shape: f32[1,128], index: 13, kind: input, shape index: {}]   ;;  %s6153_s14 = inlined_call_operand.vmem [shape: f32[2,196,128], index: 14, kind: output, shape index: {}]  }
   0x1 LB: > { %s3176_s30 = sadd.s32 4294967295, %s4038_s29   ;;  %p3180_p0 = scmp.ge.s32.totalorder %s4038_s29, 1  ;;  %s4038_s29 = sphi %s4117_s29, %s24_s29  }
   0x2   : > { %p412_p1 = scmp.lt.s32.totalorder %s4038_s29, 3 }
   0x4   : > { %p413_p2 = pnand %p3180_p0, %p412_p1 }
   0x6   : > { %416 = sbr.rel (%p413_p2) target bundleno = 1578 (0x62a), region = 76 }
   0xb   : > { %p458_p3 = scmp.lt.s32.totalorder %s3176_s30, 1  ;;  %v901_v0 = vld [vmem:[%s6142_s3 + $0x78] sm:$0xff]  ;;  %v6154_v1 = vmov 0.0   ;;  %v900_v11 = vld [vmem:[%s6142_s3 + $0x70] sm:$0xff]  ;;  %v899_v13 = vld [vmem:[%s6142_s3 + $0x68] sm:$0xff]  ;;  %vm4041_vm0 = vmmov 0  }
   0xc   : > { %3367 = vmatprep.subr.mxu0 %v6154_v1  ;;  %3474 = vmatprep.subr.mxu1 %v6154_v1  ;;  %v898_v15 = vld [vmem:[%s6142_s3 + $0x60] sm:$0xff]  ;;  %v897_v18 = vld [vmem:[%s6142_s3 + $0x58] sm:$0xff]  ;;  %v896_v19 = vld [vmem:[%s6142_s3 + $0x50] sm:$0xff]  ;;  %vm543_vm1 = vcmask 1043456  }
   0xd   : > { %s6219_s30 = smov (!%p458_p3, %s3176_s30), 1  ;;  %3368 = vmatpush3.msra.mxu0 %v901_v0  ;;  %v895_v22 = vld [vmem:[%s6142_s3 + $0x48] sm:$0xff]  ;;  %v894_v24 = vld [vmem:[%s6142_s3 + $0x40] sm:$0xff]  ;;  %v893_v26 = vld [vmem:[%s6142_s3 + $0x38] sm:$0xff]  ;;  %3399 = vmatprep.mubr.msk.f32.mxu0 %vm4041_vm0, %v6154_v1 }
   0xe   : > { %3369 = vmatprep.subr.mxu0 %v6154_v1  ;;  %s3721_s17 = smul.u32 200, %s6219_s30  ;;  %v892_v29 = vld [vmem:[%s6142_s3 + $0x30] sm:$0xff]  ;;  %v891_v31 = vld [vmem:[%s6142_s3 + $0x28] sm:$0xff]  ;;  %v890_v33 = vld [vmem:[%s6142_s3 + $0x20] sm:$0xff]  ;;  %3506 = vmatprep.mubr.msk.f32.mxu1 %vm4041_vm0, %v6154_v1 }
   0xf   : > { %3370 = vmatpush3.msra.mxu0 %v900_v11  ;;  %v889_v36 = vld [vmem:[%s6142_s3 + $0x18] sm:$0xff]  ;;  %v888_v38 = vld [vmem:[%s6142_s3 + $0x10] sm:$0xff]  ;;  %v887_v40 = vld [vmem:[%s6142_s3 + $0x8] sm:$0xff] }
  0x10   : > { %s4139_s20 = scalar_lea.vmem %s6139_s0, %s3721_s17  ;;  %3371 = vmatprep.subr.mxu0 %v6154_v1  ;;  %v886_v43 = vld [vmem:[%s6142_s3] sm:$0xff]  ;;  %s6037_s21 = scalar_lea.vmem %s6153_s14, %s3721_s17 }
  0x11   : > { %v4142_v2 = vld [vmem:[%s4139_s20 + $0x8] sm:$0xff]  ;;  %v4145_v3 = vld [vmem:[%s4139_s20] sm:$0xff]  ;;  %v4154_v6 = vld [vmem:[%s4139_s20 + $0x10] sm:$0xff]  ;;  %3372 = vmatpush3.msra.mxu0 %v899_v13 }
  0x12   : > { %497 = vadd.xlane.f32.xlu1 %v4142_v2  ;;  %495 = vadd.xlane.f32.xlu0 %v4145_v3  ;;  %v574_v4 = vmul.f32 %v4142_v2, %v4142_v2  ;;  %v573_v5 = vmul.f32 %v4145_v3, %v4145_v3  ;;  %v575_v7 = vmul.f32 %v4154_v6, %v4154_v6  ;;  %v4159_v8 = vld [vmem:[%s4139_s20 + $0x18] sm:$0xff]  ;;  %v4165_v10 = vld [vmem:[%s4139_s20 + $0x20] sm:$0xff]  ;;  %v4177_v14 = vld [vmem:[%s4139_s20 + $0x28] sm:$0xff] }
  0x13   : > { %v576_v9 = vmul.f32 %v4159_v8, %v4159_v8  ;;  %v577_v12 = vmul.f32 %v4165_v10, %v4165_v10  ;;  %3373 = vmatprep.subr.mxu0 %v6154_v1  ;;  %v578_v16 = vmul.f32 %v4177_v14, %v4177_v14  ;;  %v4188_v17 = vld [vmem:[%s4139_s20 + $0x30] sm:$0xff]  ;;  %v4201_v21 = vld [vmem:[%s4139_s20 + $0x38] sm:$0xff]  ;;  %v4215_v25 = vld [vmem:[%s4139_s20 + $0x40] sm:$0xff] }
  0x14   : > { %3374 = vmatpush3.msra.mxu0 %v898_v15  ;;  %v579_v20 = vmul.f32 %v4188_v17, %v4188_v17  ;;  %v580_v23 = vmul.f32 %v4201_v21, %v4201_v21  ;;  %v581_v27 = vmul.f32 %v4215_v25, %v4215_v25  ;;  %v4225_v28 = vld [vmem:[%s4139_s20 + $0x48] sm:$0xff]  ;;  %v4239_v32 = vld [vmem:[%s4139_s20 + $0x50] sm:$0xff]  ;;  %v4249_v35 = vld [vmem:[%s4139_s20 + $0x58] sm:$0xff] }
  0x15   : > { %3375 = vmatprep.subr.mxu0 %v6154_v1  ;;  %v582_v30 = vmul.f32 %v4225_v28, %v4225_v28  ;;  %v583_v34 = vmul.f32 %v4239_v32, %v4239_v32  ;;  %v584_v37 = vmul.f32 %v4249_v35, %v4249_v35  ;;  %v4263_v39 = vld [vmem:[%s4139_s20 + $0x60] sm:$0xff]  ;;  %v4277_v42 = vld [vmem:[%s4139_s20 + $0x68] sm:$0xff]  ;;  %v4288_v45 = vld [vmem:[%s4139_s20 + $0x70] sm:$0xff] }
  0x16   : > { %600 = vadd.xlane.f32.xlu1 %v574_v4  ;;  %598 = vadd.xlane.f32.xlu0 %v573_v5  ;;  %v585_v41 = vmul.f32 %v4263_v39, %v4263_v39  ;;  %v586_v44 = vmul.f32 %v4277_v42, %v4277_v42  ;;  %v587_v46 = vmul.f32 %v4288_v45, %v4288_v45  ;;  %v4295_v47 = vld [vmem:[%s4139_s20 + $0x78] sm:$0xff]  ;;  %v4301_v49 = vld [vmem:[%s4139_s20 + $0x80] sm:$0xff]  ;;  %v4307_v51 = vld [vmem:[%s4139_s20 + $0x88] sm:$0xff] }
  0x17   : > { %3376 = vmatpush3.msra.mxu0 %v897_v18  ;;  %v588_v48 = vmul.f32 %v4295_v47, %v4295_v47  ;;  %v589_v50 = vmul.f32 %v4301_v49, %v4301_v49  ;;  %v590_v52 = vmul.f32 %v4307_v51, %v4307_v51  ;;  %v4313_v53 = vld [vmem:[%s4139_s20 + $0x90] sm:$0xff]  ;;  %v4319_v55 = vld [vmem:[%s4139_s20 + $0x98] sm:$0xff]  ;;  %v4325_v57 = vld [vmem:[%s4139_s20 + $0xa0] sm:$0xff] }
  0x18   : > { %3377 = vmatprep.subr.mxu0 %v6154_v1  ;;  %v591_v54 = vmul.f32 %v4313_v53, %v4313_v53  ;;  %v592_v56 = vmul.f32 %v4319_v55, %v4319_v55  ;;  %v593_v58 = vmul.f32 %v4325_v57, %v4325_v57  ;;  %v4331_v59 = vld [vmem:[%s4139_s20 + $0xa8] sm:$0xff]  ;;  %v4337_v61 = vld [vmem:[%s4139_s20 + $0xb0] sm:$0xff]  ;;  %v4343_v63 = vld [vmem:[%s4139_s20 + $0xb8] sm:$0xff] }
  0x19   : > { %3378 = vmatpush3.msra.mxu0 %v896_v19  ;;  %v594_v60 = vmul.f32 %v4331_v59, %v4331_v59  ;;  %v595_v62 = vmul.f32 %v4337_v61, %v4337_v61  ;;  %v4346_v0 = vld [vmem:[%s4139_s20 + $0xc0] sm:$0xf]  ;;  %v596_v4 = vmul.f32 %v4343_v63, %v4343_v63 }
  0x1a   : > { %499 = vadd.xlane.f32.xlu0 %v4154_v6  ;;  %602 = vadd.xlane.f32.xlu1 %v575_v7  ;;  %v597_v5 = vmul.f32 %v4346_v0, %v4346_v0  ;;  %v544_v7 = vsel %vm543_vm1, %v4346_v0, 0.0 }
  0x1b   : > { %3379 = vmatprep.subr.mxu0 %v6154_v1 }
  0x1c   : > { %3380 = vmatpush3.msra.mxu0 %v895_v22 }
  0x1d   : > { %3381 = vmatprep.subr.mxu0 %v6154_v1 }
  0x1e   : > { %501 = vadd.xlane.f32.xlu0 %v4159_v8  ;;  %604 = vadd.xlane.f32.xlu1 %v576_v9  ;;  %v646_v9 = vsel %vm543_vm1, %v597_v5, 0.0 }
  0x1f   : > { %3382 = vmatpush3.msra.mxu0 %v894_v24 }
  0x20   : > { %3383 = vmatprep.subr.mxu0 %v6154_v1 }
  0x21   : > { %3384 = vmatpush3.msra.mxu0 %v893_v26 }
  0x22   : > { %503 = vadd.xlane.f32.xlu0 %v4165_v10  ;;  %606 = vadd.xlane.f32.xlu1 %v577_v12 }
  0x23   : > { %3385 = vmatprep.subr.mxu0 %v6154_v1 }
  0x24   : > { %3386 = vmatpush3.msra.mxu0 %v892_v29 }
  0x25   : > { %3387 = vmatprep.subr.mxu0 %v6154_v1 }
  0x26   : > { %505 = vadd.xlane.f32.xlu0 %v4177_v14  ;;  %608 = vadd.xlane.f32.xlu1 %v578_v16 }
  0x27   : > { %3388 = vmatpush3.msra.mxu0 %v891_v31 }
  0x28   : > { %3389 = vmatprep.subr.mxu0 %v6154_v1 }
  0x29   : > { %3390 = vmatpush3.msra.mxu0 %v890_v33 }
  0x2a   : > { %507 = vadd.xlane.f32.xlu0 %v4188_v17  ;;  %610 = vadd.xlane.f32.xlu1 %v579_v20 }
  0x2b   : > { %3391 = vmatprep.subr.mxu0 %v6154_v1 }
  0x2c   : > { %3392 = vmatpush3.msra.mxu0 %v889_v36 }
  0x2d   : > { %3393 = vmatprep.subr.mxu0 %v6154_v1 }
  0x2e   : > { %509 = vadd.xlane.f32.xlu0 %v4201_v21  ;;  %612 = vadd.xlane.f32.xlu1 %v580_v23 }
  0x2f   : > { %3394 = vmatpush3.msra.mxu0 %v888_v38 }
  0x30   : > { %3395 = vmatprep.subr.mxu0 %v6154_v1 }
  0x31   : > { %3396 = vmatpush3.msra.mxu0 %v887_v40 }
  0x32   : > { %511 = vadd.xlane.f32.xlu0 %v4215_v25  ;;  %614 = vadd.xlane.f32.xlu1 %v581_v27 }
  0x33   : > { %3397 = vmatprep.subr.mxu0 %v6154_v1 }
  0x34   : > { %3398 = vmatpush3.msra.mxu0 %v886_v43 }
  0x35   : > { %3581 = vmatprep.subr.mxu0 %v6154_v1 }
  0x36   : > { %513 = vadd.xlane.f32.xlu0 %v4225_v28  ;;  %616 = vadd.xlane.f32.xlu1 %v582_v30 }
  0x3a   : > { %515 = vadd.xlane.f32.xlu0 %v4239_v32  ;;  %618 = vadd.xlane.f32.xlu1 %v583_v34 }
  0x3e   : > { %517 = vadd.xlane.f32.xlu0 %v4249_v35  ;;  %620 = vadd.xlane.f32.xlu1 %v584_v37 }
  0x42   : > { %519 = vadd.xlane.f32.xlu0 %v4263_v39  ;;  %622 = vadd.xlane.f32.xlu1 %v585_v41 }
  0x46   : > { %521 = vadd.xlane.f32.xlu0 %v4277_v42  ;;  %624 = vadd.xlane.f32.xlu1 %v586_v44 }
  0x4a   : > { %523 = vadd.xlane.f32.xlu0 %v4288_v45  ;;  %626 = vadd.xlane.f32.xlu1 %v587_v46 }
  0x4e   : > { %525 = vadd.xlane.f32.xlu0 %v4295_v47  ;;  %628 = vadd.xlane.f32.xlu1 %v588_v48 }
  0x52   : > { %527 = vadd.xlane.f32.xlu0 %v4301_v49  ;;  %630 = vadd.xlane.f32.xlu1 %v589_v50 }
  0x56   : > { %529 = vadd.xlane.f32.xlu0 %v4307_v51  ;;  %632 = vadd.xlane.f32.xlu1 %v590_v52 }
  0x5a   : > { %531 = vadd.xlane.f32.xlu0 %v4313_v53  ;;  %634 = vadd.xlane.f32.xlu1 %v591_v54 }
  0x5e   : > { %533 = vadd.xlane.f32.xlu0 %v4319_v55  ;;  %636 = vadd.xlane.f32.xlu1 %v592_v56 }
  0x62   : > { %535 = vadd.xlane.f32.xlu0 %v4325_v57  ;;  %638 = vadd.xlane.f32.xlu1 %v593_v58 }
  0x66   : > { %537 = vadd.xlane.f32.xlu0 %v4331_v59  ;;  %640 = vadd.xlane.f32.xlu1 %v594_v60 }
  0x6a   : > { %539 = vadd.xlane.f32.xlu0 %v4337_v61  ;;  %642 = vadd.xlane.f32.xlu1 %v595_v62 }
  0x6e   : > { %541 = vadd.xlane.f32.xlu0 %v4343_v63  ;;  %644 = vadd.xlane.f32.xlu1 %v596_v4 }
  0x72   : > { %545 = vadd.xlane.f32.xlu0 %v544_v7  ;;  %647 = vadd.xlane.f32.xlu1 %v646_v9 }
  0x9b   : > { %v498_v11 = vpop.xlane.xlu1 %497  ;;  %v496_v12 = vpop.xlane.xlu0 %495 }
  0x9c   : > { %v549_v13 = vmul.f32 0.0078125, %v498_v11  ;;  %v548_v15 = vmul.f32 0.0078125, %v496_v12 }
  0x9e   : > { %v675_v16 = vmul.f32 %v549_v13, %v549_v13  ;;  %v674_v20 = vmul.f32 %v548_v15, %v548_v15 }
  0x9f   : > { %v601_v18 = vpop.xlane.xlu1 %600  ;;  %v599_v19 = vpop.xlane.xlu0 %598 }
  0xa0   : > { %v650_v22 = vmul.f32 0.0078125, %v601_v18  ;;  %v649_v23 = vmul.f32 0.0078125, %v599_v19  ;;  %v725_v18 = vsub.f32 %v4142_v2, %v549_v13  ;;  %v724_v19 = vsub.f32 %v4145_v3, %v548_v15  ;;  %v4383_v3 = vld [vmem:[%s6141_s2] ss:$0 sm:$0xff] }
  0xa2   : > { %v700_v24 = vsub.f32 %v650_v22, %v675_v16  ;;  %v699_v26 = vsub.f32 %v649_v23, %v674_v20 }
  0xa3   : > { %v500_v27 = vpop.xlane.xlu0 %499  ;;  %v603_v29 = vpop.xlane.xlu1 %602 }
  0xa4   : > { %v750_v30 = vadd.f32 1e-05, %v700_v24  ;;  %v749_v31 = vadd.f32 1e-05, %v699_v26  ;;  %v550_v33 = vmul.f32 0.0078125, %v500_v27  ;;  %v651_v34 = vmul.f32 0.0078125, %v603_v29 }
  0xa5   : > { %v4376_v29 = vld [vmem:[%s6140_s1] ss:$0 sm:$0xff] }
  0xa6   : > { %3732 = vrsqrt.f32 %v750_v30  ;;  %v676_v36 = vmul.f32 %v550_v33, %v550_v33  ;;  %v726_v13 = vsub.f32 %v4154_v6, %v550_v33 }
  0xa7   : > { %3734 = vrsqrt.f32 %v749_v31  ;;  %v502_v37 = vpop.xlane.xlu0 %501  ;;  %v605_v38 = vpop.xlane.xlu1 %604 }
  0xa8   : > { %v701_v40 = vsub.f32 %v651_v34, %v676_v36  ;;  %v4357_v41 = vmul.f32 0.0078125, %v502_v37  ;;  %v652_v43 = vmul.f32 0.0078125, %v605_v38 }
  0xaa   : > { %v751_v44 = vadd.f32 1e-05, %v701_v40  ;;  %v677_v46 = vmul.f32 %v4357_v41, %v4357_v41  ;;  %v727_v6 = vsub.f32 %v4159_v8, %v4357_v41 }
  0xab   : > { %v504_v48 = vpop.xlane.xlu0 %503  ;;  %v607_v50 = vpop.xlane.xlu1 %606 }
  0xac   : > { %3736 = vrsqrt.f32 %v751_v44  ;;  %v702_v52 = vsub.f32 %v652_v43, %v677_v46  ;;  %v4361_v54 = vmul.f32 0.0078125, %v504_v48  ;;  %v653_v56 = vmul.f32 0.0078125, %v607_v50 }
  0xae   : > { %v752_v58 = vadd.f32 1e-05, %v702_v52  ;;  %v678_v60 = vmul.f32 %v4361_v54, %v4361_v54 }
  0xaf   : > { %v506_v62 = vpop.xlane.xlu0 %505  ;;  %v609_v4 = vpop.xlane.xlu1 %608 }
  0xb0   : > { %3738 = vrsqrt.f32 %v752_v58  ;;  %v703_v5 = vsub.f32 %v653_v56, %v678_v60  ;;  %v4365_v7 = vmul.f32 0.0078125, %v506_v62  ;;  %v654_v9 = vmul.f32 0.0078125, %v609_v4 }
  0xb2   : > { %v753_v11 = vadd.f32 1e-05, %v703_v5  ;;  %v679_v12 = vmul.f32 %v4365_v7, %v4365_v7 }
  0xb3   : > { %v3733_v16 = vpop.eup %3732  ;;  %v508_v20 = vpop.xlane.xlu0 %507 }
  0xb4   : > { %v611_v22 = vpop.xlane.xlu1 %610  ;;  %v3735_v23 = vpop.eup %3734  ;;  %3740 = vrsqrt.f32 %v753_v11  ;;  %v704_v24 = vsub.f32 %v654_v9, %v679_v12  ;;  %v4371_v26 = vmul.f32 0.0078125, %v508_v20  ;;  %v800_v31 = vmul.f32 %v3733_v16, %v725_v18 }
  0xb5   : > { %v655_v27 = vmul.f32 0.0078125, %v611_v22  ;;  %v799_v30 = vmul.f32 %v3735_v23, %v724_v19  ;;  %v728_v16 = vsub.f32 %v4165_v10, %v4361_v54 }
  0xb6   : > { %v754_v34 = vadd.f32 1e-05, %v704_v24  ;;  %v680_v2 = vmul.f32 %v4371_v26, %v4371_v26  ;;  %v831_v48 = vmul.f32 %v4376_v29, %v800_v31 }
  0xb7   : > { %v510_v15 = vpop.xlane.xlu0 %509  ;;  %v830_v37 = vmul.f32 %v4376_v29, %v799_v30 }
  0xb8   : > { %v613_v36 = vpop.xlane.xlu1 %612  ;;  %3742 = vrsqrt.f32 %v754_v34  ;;  %v705_v38 = vsub.f32 %v655_v27, %v680_v2  ;;  %v4387_v40 = vmul.f32 0.0078125, %v510_v15  ;;  %v862_v9 = vadd.f32 %v4383_v3, %v831_v48 }
  0xb9   : > { %v656_v43 = vmul.f32 0.0078125, %v613_v36  ;;  %v3737_v44 = vpop.eup %3736  ;;  %v861_v46 = vadd.f32 %v4383_v3, %v830_v37  ;;  %v729_v34 = vsub.f32 %v4177_v14, %v4365_v7  ;;  %v730_v48 = vsub.f32 %v4188_v17, %v4371_v26 }
  0xba   : > { %v755_v50 = vadd.f32 1e-05, %v705_v38  ;;  %v681_v52 = vmul.f32 %v4387_v40, %v4387_v40  ;;  %v801_v56 = vmul.f32 %v3737_v44, %v726_v13 }
  0xbb   : > { %3400 = vmatmul.mubr.f32.vlgmr.msra.gmra.mxu0 %v861_v46  ;;  %v512_v33 = vpop.xlane.xlu0 %511 }
  0xbc   : > { %v615_v58 = vpop.xlane.xlu1 %614  ;;  %3744 = vrsqrt.f32 %v755_v50  ;;  %v706_v60 = vsub.f32 %v656_v43, %v681_v52  ;;  %v4395_v62 = vmul.f32 0.0078125, %v512_v33  ;;  %3402 = vmatprep.mubr.msk.f32.mxu0 %vm4041_vm0, %v6154_v1  ;;  %v832_v11 = vmul.f32 %v4376_v29, %v801_v56 }
  0xbd   : > { %v657_v4 = vmul.f32 0.0078125, %v615_v58  ;;  %v3739_v5 = vpop.eup %3738 }
  0xbe   : > { %v756_v12 = vadd.f32 1e-05, %v706_v60  ;;  %v682_v8 = vmul.f32 %v4395_v62, %v4395_v62  ;;  %v802_v41 = vmul.f32 %v3739_v5, %v727_v6  ;;  %v863_v27 = vadd.f32 %v4383_v3, %v832_v11 }
  0xbf   : > { %3403 = vmatmul.mubr.f32.gmra.mxu0 %v862_v9  ;;  %v514_v18 = vpop.xlane.xlu0 %513  ;;  %v731_v9 = vsub.f32 %v4201_v21, %v4387_v40 }
  0xc0   : > { %v617_v19 = vpop.xlane.xlu1 %616  ;;  %3746 = vrsqrt.f32 %v756_v12  ;;  %v707_v20 = vsub.f32 %v657_v4, %v682_v8  ;;  %v4405_v22 = vmul.f32 0.0078125, %v514_v18  ;;  %3405 = vmatprep.mubr.msk.f32.mxu0 %vm4041_vm0, %v6154_v1  ;;  %v833_v30 = vmul.f32 %v4376_v29, %v802_v41 }
  0xc1   : > { %v658_v23 = vmul.f32 0.0078125, %v617_v19  ;;  %v3741_v24 = vpop.eup %3740 }
  0xc2   : > { %v757_v31 = vadd.f32 1e-05, %v707_v20  ;;  %v683_v10 = vmul.f32 %v4405_v22, %v4405_v22  ;;  %v803_v54 = vmul.f32 %v3741_v24, %v728_v16  ;;  %v864_v43 = vadd.f32 %v4383_v3, %v833_v30 }
  0xc3   : > { %3406 = vmatmul.mubr.f32.gmra.mxu0 %v863_v27  ;;  %v516_v2 = vpop.xlane.xlu0 %515  ;;  %v732_v24 = vsub.f32 %v4215_v25, %v4395_v62 }
  0xc4   : > { %v619_v13 = vpop.xlane.xlu1 %618  ;;  %3748 = vrsqrt.f32 %v757_v31  ;;  %v708_v15 = vsub.f32 %v658_v23, %v683_v10  ;;  %v4415_v36 = vmul.f32 0.0078125, %v516_v2  ;;  %3408 = vmatprep.mubr.msk.f32.mxu0 %vm4041_vm0, %v6154_v1  ;;  %v834_v44 = vmul.f32 %v4376_v29, %v803_v54 }
  0xc5   : > { %v659_v37 = vmul.f32 0.0078125, %v619_v13  ;;  %v3743_v38 = vpop.eup %3742 }
  0xc6   : > { %v758_v46 = vadd.f32 1e-05, %v708_v15  ;;  %v684_v14 = vmul.f32 %v4415_v36, %v4415_v36  ;;  %v804_v7 = vmul.f32 %v3743_v38, %v729_v34  ;;  %v865_v60 = vadd.f32 %v4383_v3, %v834_v44 }
  0xc7   : > { %3409 = vmatmul.mubr.f32.gmra.mxu0 %v864_v43  ;;  %v518_v50 = vpop.xlane.xlu0 %517 }
  0xc8   : > { %v621_v52 = vpop.xlane.xlu1 %620  ;;  %3750 = vrsqrt.f32 %v758_v46  ;;  %v709_v56 = vsub.f32 %v659_v37, %v684_v14  ;;  %v4425_v6 = vmul.f32 0.0078125, %v518_v50  ;;  %3411 = vmatprep.mubr.msk.f32.mxu0 %vm4041_vm0, %v6154_v1  ;;  %v835_v4 = vmul.f32 %v4376_v29, %v804_v7 }
  0xc9   : > { %v660_v33 = vmul.f32 0.0078125, %v621_v52  ;;  %v3745_v58 = vpop.eup %3744  ;;  %v733_v37 = vsub.f32 %v4225_v28, %v4405_v22 }
  0xca   : > { %v759_v5 = vadd.f32 1e-05, %v709_v56  ;;  %v685_v17 = vmul.f32 %v4425_v6, %v4425_v6  ;;  %v805_v26 = vmul.f32 %v3745_v58, %v730_v48  ;;  %v866_v19 = vadd.f32 %v4383_v3, %v835_v4 }
  0xcb   : > { %3412 = vmatmul.mubr.f32.gmra.mxu0 %v865_v60  ;;  %v520_v11 = vpop.xlane.xlu0 %519  ;;  %v734_v56 = vsub.f32 %v4239_v32, %v4415_v36 }
  0xcc   : > { %v623_v12 = vpop.xlane.xlu1 %622  ;;  %3752 = vrsqrt.f32 %v759_v5  ;;  %v710_v8 = vsub.f32 %v660_v33, %v685_v17  ;;  %v4435_v41 = vmul.f32 0.0078125, %v520_v11  ;;  %3414 = vmatprep.mubr.msk.f32.mxu0 %vm4041_vm0, %v6154_v1  ;;  %v836_v20 = vmul.f32 %v4376_v29, %v805_v26 }
  0xcd   : > { %v661_v16 = vmul.f32 0.0078125, %v623_v12  ;;  %v3747_v18 = vpop.eup %3746  ;;  %v735_v12 = vsub.f32 %v4249_v35, %v4425_v6 }
  0xce   : > { %v760_v23 = vadd.f32 1e-05, %v710_v8  ;;  %v686_v21 = vmul.f32 %v4435_v41, %v4435_v41  ;;  %v806_v40 = vmul.f32 %v3747_v18, %v731_v9  ;;  %v867_v2 = vadd.f32 %v4383_v3, %v836_v20 }
  0xcf   : > { %3415 = vmatmul.mubr.f32.gmra.mxu0 %v866_v19  ;;  %v522_v27 = vpop.xlane.xlu0 %521 }
  0xd0   : > { %v625_v30 = vpop.xlane.xlu1 %624  ;;  %3754 = vrsqrt.f32 %v760_v23  ;;  %v711_v31 = vsub.f32 %v661_v16, %v686_v21  ;;  %v4445_v10 = vmul.f32 0.0078125, %v522_v27  ;;  %3417 = vmatprep.mubr.msk.f32.mxu0 %vm4041_vm0, %v6154_v1  ;;  %v837_v13 = vmul.f32 %v4376_v29, %v806_v40 }
  0xd1   : > { %v662_v54 = vmul.f32 0.0078125, %v625_v30  ;;  %v3749_v34 = vpop.eup %3748  ;;  %v736_v27 = vsub.f32 %v4263_v39, %v4435_v41 }
  0xd2   : > { %v761_v15 = vadd.f32 1e-05, %v711_v31  ;;  %v687_v25 = vmul.f32 %v4445_v10, %v4445_v10  ;;  %v807_v62 = vmul.f32 %v3749_v34, %v732_v24  ;;  %v868_v48 = vadd.f32 %v4383_v3, %v837_v13 }
  0xd3   : > { %3418 = vmatmul.mubr.f32.gmra.mxu0 %v867_v2  ;;  %v524_v38 = vpop.xlane.xlu0 %523 }
  0xd4   : > { %v627_v43 = vpop.xlane.xlu1 %626  ;;  %3756 = vrsqrt.f32 %v761_v15  ;;  %v712_v44 = vsub.f32 %v662_v54, %v687_v25  ;;  %v4455_v46 = vmul.f32 0.0078125, %v524_v38  ;;  %3420 = vmatprep.mubr.msk.f32.mxu0 %vm4041_vm0, %v6154_v1  ;;  %v838_v50 = vmul.f32 %v4376_v29, %v807_v62 }
  0xd5   : > { %v663_v14 = vmul.f32 0.0078125, %v627_v43  ;;  %v3751_v7 = vpop.eup %3750 }
  0xd6   : > { %v762_v52 = vadd.f32 1e-05, %v712_v44  ;;  %v688_v28 = vmul.f32 %v4455_v46, %v4455_v46  ;;  %v808_v22 = vmul.f32 %v3751_v7, %v733_v37  ;;  %v869_v26 = vadd.f32 %v4383_v3, %v838_v50 }
  0xd7   : > { %3421 = vmatmul.mubr.f32.gmra.mxu0 %v868_v48  ;;  %v526_v33 = vpop.xlane.xlu0 %525  ;;  %v737_v37 = vsub.f32 %v4277_v42, %v4445_v10 }
  0xd8   : > { %v629_v58 = vpop.xlane.xlu1 %628  ;;  %3758 = vrsqrt.f32 %v762_v52  ;;  %v713_v60 = vsub.f32 %v663_v14, %v688_v28  ;;  %v4465_v4 = vmul.f32 0.0078125, %v526_v33  ;;  %3423 = vmatprep.mubr.msk.f32.mxu0 %vm4041_vm0, %v6154_v1  ;;  %v839_v9 = vmul.f32 %v4376_v29, %v808_v22 }
  0xd9   : > { %v664_v5 = vmul.f32 0.0078125, %v629_v58  ;;  %v3753_v17 = vpop.eup %3752  ;;  %v738_v22 = vsub.f32 %v4288_v45, %v4455_v46 }
  0xda   : > { %v763_v11 = vadd.f32 1e-05, %v713_v60  ;;  %v689_v32 = vmul.f32 %v4465_v4, %v4465_v4  ;;  %v809_v36 = vmul.f32 %v3753_v17, %v734_v56  ;;  %v870_v21 = vadd.f32 %v4383_v3, %v839_v9 }
  0xdb   : > { %3424 = vmatmul.mubr.f32.gmra.mxu0 %v869_v26  ;;  %v528_v8 = vpop.xlane.xlu0 %527 }
  0xdc   : > { %v631_v16 = vpop.xlane.xlu1 %630  ;;  %3760 = vrsqrt.f32 %v763_v11  ;;  %v714_v18 = vsub.f32 %v664_v5, %v689_v32  ;;  %v4475_v19 = vmul.f32 0.0078125, %v528_v8  ;;  %3426 = vmatprep.mubr.msk.f32.mxu0 %vm4041_vm0, %v6154_v1  ;;  %v840_v40 = vmul.f32 %v4376_v29, %v809_v36 }
  0xdd   : > { %v665_v20 = vmul.f32 0.0078125, %v631_v16  ;;  %v3755_v23 = vpop.eup %3754  ;;  %v739_v32 = vsub.f32 %v4295_v47, %v4465_v4 }
  0xde   : > { %v764_v24 = vadd.f32 1e-05, %v714_v18  ;;  %v690_v35 = vmul.f32 %v4475_v19, %v4475_v19  ;;  %v810_v6 = vmul.f32 %v3755_v23, %v735_v12  ;;  %v871_v15 = vadd.f32 %v4383_v3, %v840_v40 }
  0xdf   : > { %3427 = vmatmul.mubr.f32.gmra.mxu0 %v870_v21  ;;  %v530_v30 = vpop.xlane.xlu0 %529 }
  0xe0   : > { %v633_v31 = vpop.xlane.xlu1 %632  ;;  %3762 = vrsqrt.f32 %v764_v24  ;;  %v715_v54 = vsub.f32 %v665_v20, %v690_v35  ;;  %v4485_v34 = vmul.f32 0.0078125, %v530_v30  ;;  %3429 = vmatprep.mubr.msk.f32.mxu0 %vm4041_vm0, %v6154_v1  ;;  %v841_v25 = vmul.f32 %v4376_v29, %v810_v6 }
  0xe1   : > { %v666_v2 = vmul.f32 0.0078125, %v633_v31  ;;  %v3757_v13 = vpop.eup %3756  ;;  %v740_v24 = vsub.f32 %v4301_v49, %v4475_v19 }
  0xe2   : > { %v765_v62 = vadd.f32 1e-05, %v715_v54  ;;  %v691_v39 = vmul.f32 %v4485_v34, %v4485_v34  ;;  %v811_v41 = vmul.f32 %v3757_v13, %v736_v27  ;;  %v872_v50 = vadd.f32 %v4383_v3, %v841_v25 }
  0xe3   : > { %3430 = vmatmul.mubr.f32.gmra.mxu0 %v871_v15  ;;  %v532_v38 = vpop.xlane.xlu0 %531  ;;  %v741_v25 = vsub.f32 %v4307_v51, %v4485_v34 }
  0xe4   : > { %v635_v43 = vpop.xlane.xlu1 %634  ;;  %3764 = vrsqrt.f32 %v765_v62  ;;  %v716_v44 = vsub.f32 %v666_v2, %v691_v39  ;;  %v4495_v14 = vmul.f32 0.0078125, %v532_v38  ;;  %3432 = vmatprep.mubr.msk.f32.mxu0 %vm4041_vm0, %v6154_v1  ;;  %v842_v52 = vmul.f32 %v4376_v29, %v811_v41 }
  0xe5   : > { %v667_v7 = vmul.f32 0.0078125, %v635_v43  ;;  %v3759_v48 = vpop.eup %3758 }
  0xe6   : > { %v766_v28 = vadd.f32 1e-05, %v716_v44  ;;  %v692_v42 = vmul.f32 %v4495_v14, %v4495_v14  ;;  %v812_v10 = vmul.f32 %v3759_v48, %v737_v37  ;;  %v873_v26 = vadd.f32 %v4383_v3, %v842_v52 }
  0xe7   : > { %3433 = vmatmul.mubr.f32.gmra.mxu0 %v872_v50  ;;  %v534_v56 = vpop.xlane.xlu0 %533  ;;  %v742_v50 = vsub.f32 %v4313_v53, %v4495_v14 }
  0xe8   : > { %v637_v33 = vpop.xlane.xlu1 %636  ;;  %3766 = vrsqrt.f32 %v766_v28  ;;  %v717_v58 = vsub.f32 %v667_v7, %v692_v42  ;;  %v4505_v60 = vmul.f32 0.0078125, %v534_v56  ;;  %3435 = vmatprep.mubr.msk.f32.mxu0 %vm4041_vm0, %v6154_v1  ;;  %v843_v9 = vmul.f32 %v4376_v29, %v812_v10 }
  0xe9   : > { %v668_v5 = vmul.f32 0.0078125, %v637_v33  ;;  %v3761_v17 = vpop.eup %3760 }
  0xea   : > { %v767_v11 = vadd.f32 1e-05, %v717_v58  ;;  %v693_v45 = vmul.f32 %v4505_v60, %v4505_v60  ;;  %v813_v46 = vmul.f32 %v3761_v17, %v738_v22  ;;  %v874_v23 = vadd.f32 %v4383_v3, %v843_v9 }
  0xeb   : > { %3436 = vmatmul.mubr.f32.gmra.mxu0 %v873_v26  ;;  %v536_v36 = vpop.xlane.xlu0 %535  ;;  %v743_v53 = vsub.f32 %v4319_v55, %v4505_v60 }
  0xec   : > { %v639_v12 = vpop.xlane.xlu1 %638  ;;  %3768 = vrsqrt.f32 %v767_v11  ;;  %v718_v8 = vsub.f32 %v668_v5, %v693_v45  ;;  %v4515_v16 = vmul.f32 0.0078125, %v536_v36  ;;  %3438 = vmatprep.mubr.msk.f32.mxu0 %vm4041_vm0, %v6154_v1  ;;  %v844_v21 = vmul.f32 %v4376_v29, %v813_v46 }
  0xed   : > { %v669_v18 = vmul.f32 0.0078125, %v639_v12  ;;  %v3763_v20 = vpop.eup %3762 }
  0xee   : > { %v768_v40 = vadd.f32 1e-05, %v718_v8  ;;  %v694_v47 = vmul.f32 %v4515_v16, %v4515_v16  ;;  %v814_v4 = vmul.f32 %v3763_v20, %v739_v32  ;;  %v875_v2 = vadd.f32 %v4383_v3, %v844_v21 }
  0xef   : > { %3439 = vmatmul.mubr.f32.gmra.mxu0 %v874_v23  ;;  %v538_v35 = vpop.xlane.xlu0 %537  ;;  %v744_v55 = vsub.f32 %v4325_v57, %v4515_v16 }
  0xf0   : > { %v641_v6 = vpop.xlane.xlu1 %640  ;;  %3770 = vrsqrt.f32 %v768_v40  ;;  %v719_v27 = vsub.f32 %v669_v18, %v694_v47  ;;  %v4525_v30 = vmul.f32 0.0078125, %v538_v35  ;;  %3441 = vmatprep.mubr.msk.f32.mxu0 %vm4041_vm0, %v6154_v1  ;;  %v845_v13 = vmul.f32 %v4376_v29, %v814_v4 }
  0xf1   : > { %v670_v31 = vmul.f32 0.0078125, %v641_v6  ;;  %v3765_v54 = vpop.eup %3764 }
  0xf2   : > { %v769_v15 = vadd.f32 1e-05, %v719_v27  ;;  %v695_v49 = vmul.f32 %v4525_v30, %v4525_v30  ;;  %v815_v19 = vmul.f32 %v3765_v54, %v740_v24  ;;  %v876_v44 = vadd.f32 %v4383_v3, %v845_v13 }
  0xf3   : > { %3442 = vmatmul.mubr.f32.gmra.mxu0 %v875_v2  ;;  %v540_v62 = vpop.xlane.xlu0 %539  ;;  %v745_v24 = vsub.f32 %v4331_v59, %v4525_v30 }
  0xf4   : > { %v643_v39 = vpop.xlane.xlu1 %642  ;;  %3772 = vrsqrt.f32 %v769_v15  ;;  %v720_v41 = vsub.f32 %v670_v31, %v695_v49  ;;  %v4535_v37 = vmul.f32 0.0078125, %v540_v62  ;;  %3444 = vmatprep.mubr.msk.f32.mxu0 %vm4041_vm0, %v6154_v1  ;;  %v846_v7 = vmul.f32 %v4376_v29, %v815_v19 }
  0xf5   : > { %v671_v38 = vmul.f32 0.0078125, %v643_v39  ;;  %v3767_v43 = vpop.eup %3766 }
  0xf6   : > { %v770_v48 = vadd.f32 1e-05, %v720_v41  ;;  %v696_v51 = vmul.f32 %v4535_v37, %v4535_v37  ;;  %v816_v34 = vmul.f32 %v3767_v43, %v741_v25  ;;  %v877_v33 = vadd.f32 %v4383_v3, %v846_v7  ;;  %v1789_v41 = vld [vmem:[%s6144_s5 + $0x78] sm:$0xff]  ;;  %v1787_v43 = vld [vmem:[%s6144_s5 + $0x68] sm:$0xff] }
  0xf7   : > { %3445 = vmatmul.mubr.f32.gmra.mxu0 %v876_v44  ;;  %v542_v52 = vpop.xlane.xlu0 %541  ;;  %v746_v27 = vsub.f32 %v4337_v61, %v4535_v37  ;;  %3475 = vmatpush3.msra.mxu1 %v1789_v41  ;;  %v1786_v44 = vld [vmem:[%s6144_s5 + $0x60] sm:$0xff]  ;;  %v1785_v7 = vld [vmem:[%s6144_s5 + $0x58] sm:$0xff] }
  0xf8   : > { %v645_v28 = vpop.xlane.xlu1 %644  ;;  %3774 = vrsqrt.f32 %v770_v48  ;;  %v721_v42 = vsub.f32 %v671_v38, %v696_v51  ;;  %v571_v10 = vmul.f32 0.0078125, %v542_v52  ;;  %3447 = vmatprep.mubr.msk.f32.mxu0 %vm4041_vm0, %v6154_v1  ;;  %v847_v58 = vmul.f32 %v4376_v29, %v816_v34  ;;  %3476 = vmatprep.subr.mxu1 %v6154_v1  ;;  %v1784_v48 = vld [vmem:[%s6144_s5 + $0x50] sm:$0xff]  ;;  %v1782_v51 = vld [vmem:[%s6144_s5 + $0x40] sm:$0xff]  ;;  %v1781_v34 = vld [vmem:[%s6144_s5 + $0x38] sm:$0xff] }
  0xf9   : > { %v672_v22 = vmul.f32 0.0078125, %v645_v28  ;;  %v3769_v56 = vpop.eup %3768  ;;  %v1779_v52 = vld [vmem:[%s6144_s5 + $0x28] sm:$0xff]  ;;  %v1778_v28 = vld [vmem:[%s6144_s5 + $0x20] sm:$0xff] }
  0xfa   : > { %v771_v5 = vadd.f32 1e-05, %v721_v42  ;;  %v697_v17 = vmul.f32 %v571_v10, %v571_v10  ;;  %v817_v26 = vmul.f32 %v3769_v56, %v742_v50  ;;  %v878_v36 = vadd.f32 %v4383_v3, %v847_v58  ;;  %v1780_v50 = vld [vmem:[%s6144_s5 + $0x30] sm:$0xff]  ;;  %v1777_v42 = vld [vmem:[%s6144_s5 + $0x18] sm:$0xff]  ;;  %v1774_v56 = vld [vmem:[%s6144_s5] sm:$0xff] }
  0xfb   : > { %3448 = vmatmul.mubr.f32.gmra.mxu0 %v877_v33  ;;  %v546_v14 = vpop.xlane.xlu0 %545  ;;  %v747_v2 = vsub.f32 %v4343_v63, %v571_v10  ;;  %v1776_v10 = vld [vmem:[%s6144_s5 + $0x10] sm:$0xff]  ;;  %v4659_v33 = vld [vmem:[%s6143_s4] ss:$0 sm:$0xff] }
  0xfc   : > { %v648_v9 = vpop.xlane.xlu1 %647  ;;  %3776 = vrsqrt.f32 %v771_v5  ;;  %v722_v11 = vsub.f32 %v672_v22, %v697_v17  ;;  %v572_v45 = vmul.f32 0.0078125, %v546_v14  ;;  %3450 = vmatprep.mubr.msk.f32.mxu0 %vm4041_vm0, %v6154_v1  ;;  %v848_v12 = vmul.f32 %v4376_v29, %v817_v26  ;;  %v1775_v22 = vld [vmem:[%s6144_s5 + $0x8] sm:$0xff] }
  0xfd   : > { %v673_v46 = vmul.f32 0.0078125, %v648_v9  ;;  %v3771_v32 = vpop.eup %3770 }
  0xfe   : > { %v772_v8 = vadd.f32 1e-05, %v722_v11  ;;  %v698_v18 = vmul.f32 %v572_v45, %v572_v45  ;;  %v818_v20 = vmul.f32 %v3771_v32, %v743_v53  ;;  %v879_v21 = vadd.f32 %v4383_v3, %v848_v12 }
  0xff   : > { %3451 = vmatmul.mubr.f32.gmra.mxu0 %v878_v36  ;;  %v748_v19 = vsub.f32 %v4346_v0, %v572_v45  ;;  %v1788_v0 = vld [vmem:[%s6144_s5 + $0x70] sm:$0xff] }
 0x100   : > { %3778 = vrsqrt.f32 %v772_v8  ;;  %v723_v60 = vsub.f32 %v673_v46, %v698_v18  ;;  %3453 = vmatprep.mubr.msk.f32.mxu0 %vm4041_vm0, %v6154_v1  ;;  %v849_v40 = vmul.f32 %v4376_v29, %v818_v20  ;;  %3477 = vmatpush3.msra.mxu1 %v1788_v0 }
 0x101   : > { %v3773_v23 = vpop.eup %3772  ;;  %3478 = vmatprep.subr.mxu1 %v6154_v1 }
 0x102   : > { %v773_v47 = vadd.f32 1e-05, %v723_v60  ;;  %v819_v4 = vmul.f32 %v3773_v23, %v744_v55  ;;  %v880_v16 = vadd.f32 %v4383_v3, %v849_v40  ;;  %3479 = vmatpush3.msra.mxu1 %v1787_v43 }
 0x103   : > { %3454 = vmatmul.mubr.f32.gmra.mxu0 %v879_v21  ;;  %3480 = vmatprep.subr.mxu1 %v6154_v1 }
 0x104   : > { %3780 = vrsqrt.f32 %v773_v47  ;;  %3456 = vmatprep.mubr.msk.f32.mxu0 %vm4041_vm0, %v6154_v1  ;;  %v850_v35 = vmul.f32 %v4376_v29, %v819_v4  ;;  %3481 = vmatpush3.msra.mxu1 %v1786_v44 }
 0x105   : > { %v3775_v57 = vpop.eup %3774  ;;  %3482 = vmatprep.subr.mxu1 %v6154_v1 }
 0x106   : > { %v820_v6 = vmul.f32 %v3775_v57, %v745_v24  ;;  %v881_v59 = vadd.f32 %v4383_v3, %v850_v35  ;;  %3483 = vmatpush3.msra.mxu1 %v1785_v7 }
 0x107   : > { %3457 = vmatmul.mubr.f32.gmra.mxu0 %v880_v16  ;;  %3484 = vmatprep.subr.mxu1 %v6154_v1 }
 0x108   : > { %3459 = vmatprep.mubr.msk.f32.mxu0 %vm4041_vm0, %v6154_v1  ;;  %v851_v30 = vmul.f32 %v4376_v29, %v820_v6  ;;  %3485 = vmatpush3.msra.mxu1 %v1784_v48 }
 0x109   : > { %v3777_v31 = vpop.eup %3776  ;;  %3486 = vmatprep.subr.mxu1 %v6154_v1 }
 0x10a   : > { %v821_v54 = vmul.f32 %v3777_v31, %v746_v27  ;;  %v882_v15 = vadd.f32 %v4383_v3, %v851_v30 }
 0x10b   : > { %3460 = vmatmul.mubr.f32.gmra.mxu0 %v881_v59 }
 0x10c   : > { %3462 = vmatprep.mubr.msk.f32.mxu0 %vm4041_vm0, %v6154_v1  ;;  %v852_v61 = vmul.f32 %v4376_v29, %v821_v54 }
 0x10d   : > { %v3779_v13 = vpop.eup %3778 }
 0x10e   : > { %v822_v49 = vmul.f32 %v3779_v13, %v747_v2  ;;  %v883_v62 = vadd.f32 %v4383_v3, %v852_v61 }
 0x10f   : > { %3463 = vmatmul.mubr.f32.gmra.mxu0 %v882_v15 }
 0x110   : > { %3465 = vmatprep.mubr.msk.f32.mxu0 %vm4041_vm0, %v6154_v1  ;;  %v853_v63 = vmul.f32 %v4376_v29, %v822_v49 }
 0x111   : > { %v3781_v25 = vpop.eup %3780 }
 0x112   : > { %v823_v39 = vmul.f32 %v3781_v25, %v748_v19  ;;  %v884_v37 = vadd.f32 %v4383_v3, %v853_v63 }
 0x113   : > { %3466 = vmatmul.mubr.f32.gmra.mxu0 %v883_v62 }
 0x114   : > { %3468 = vmatprep.mubr.msk.f32.mxu0 %vm4041_vm0, %v6154_v1  ;;  %v854_v38 = vmul.f32 %v4376_v29, %v823_v39 }
 0x116   : > { %v885_v29 = vadd.f32 %v4383_v3, %v854_v38  ;;  %v1783_v3 = vld [vmem:[%s6144_s5 + $0x48] sm:$0xff] }
 0x117   : > { %3469 = vmatmul.mubr.f32.gmra.mxu0 %v884_v37  ;;  %3487 = vmatpush3.msra.mxu1 %v1783_v3 }
 0x118   : > { %3471 = vmatprep.mubr.msk.f32.mxu0 %vm4041_vm0, %v6154_v1  ;;  %3488 = vmatprep.subr.mxu1 %v6154_v1 }
 0x119   : > { %3489 = vmatpush3.msra.mxu1 %v1782_v51 }
 0x11a   : > { %3490 = vmatprep.subr.mxu1 %v6154_v1 }
 0x11b   : > { %3472 = vmatmul.mubr.f32.gmra.mxu0 %v885_v29  ;;  %3491 = vmatpush3.msra.mxu1 %v1781_v34 }
 0x11c   : > { %3613 = vmatprep.mubr.msk.f32.mxu0 %vm4041_vm0, %v6154_v1  ;;  %3492 = vmatprep.subr.mxu1 %v6154_v1 }
 0x11d   : > { %3493 = vmatpush3.msra.mxu1 %v1780_v50 }
 0x11e   : > { %3494 = vmatprep.subr.mxu1 %v6154_v1 }
 0x11f   : > { %3495 = vmatpush3.msra.mxu1 %v1779_v52 }
 0x120   : > { %3496 = vmatprep.subr.mxu1 %v6154_v1 }
 0x121   : > { %3497 = vmatpush3.msra.mxu1 %v1778_v28 }
 0x122   : > { %3498 = vmatprep.subr.mxu1 %v6154_v1 }
 0x123   : > { %3499 = vmatpush3.msra.mxu1 %v1777_v42 }
 0x124   : > { %3500 = vmatprep.subr.mxu1 %v6154_v1 }
 0x125   : > { %3501 = vmatpush3.msra.mxu1 %v1776_v10 }
 0x126   : > { %3502 = vmatprep.subr.mxu1 %v6154_v1 }
 0x127   : > { %3503 = vmatpush3.msra.mxu1 %v1775_v22 }
 0x128   : > { %3504 = vmatprep.subr.mxu1 %v6154_v1 }
 0x129   : > { %3505 = vmatpush3.msra.mxu1 %v1774_v56 }
 0x12a   : > { %3616 = vmatprep.subr.mxu1 %v6154_v1 }
 0x17b   : > { %v975_v58 = vpop.f32.mrf.mxu0 }
 0x17c   : > { %v976_v5 = vadd.f32 %v4659_v33, %v975_v58 }
 0x17d   : > { %v3401_v17 = vpop.f32.mrf.mxu0 }
 0x17e   : > { %v4662_v26 = vmul.f32 0.70710677, %v976_v5  ;;  %v4691_v0 = vmul.f32 0.5, %v976_v5 }
 0x17f   : > { %v980_v53 = vpop.f32.mrf.mxu0 }
 0x180   : > { %v1149_v14 = vand.u32 2147483647, %v4662_v26  ;;  %v981_v9 = vadd.f32 %v4659_v33, %v980_v53  ;;  %vm1649_vm2 = vcmp.lt.f32.partialorder %v4662_v26, 0.0 }
 0x181   : > { %v3404_v11 = vpop.f32.mrf.mxu0 }
 0x182   : > { %v1174_v45 = vmul.f32 0.3275911, %v1149_v14  ;;  %v4666_v46 = vmul.f32 0.70710677, %v981_v9  ;;  %v1499_v40 = vsub.f32 0.0, %v1149_v14  ;;  %v4702_v52 = vmul.f32 0.5, %v981_v9 }
 0x183   : > { %v985_v32 = vpop.f32.mrf.mxu0 }
 0x184   : > { %v1199_v36 = vadd.f32 1.0, %v1174_v45  ;;  %v1150_v12 = vand.u32 2147483647, %v4666_v46  ;;  %v986_v60 = vadd.f32 %v4659_v33, %v985_v32  ;;  %v1524_v16 = vmul.f32 %v1499_v40, %v1149_v14 }
 0x185   : > { %v3407_v8 = vpop.f32.mrf.mxu0  ;;  %vm1650_vm3 = vcmp.lt.f32.partialorder %v4666_v46, 0.0 }
 0x186   : > { %3782 = vrcp.f32 %v1199_v36  ;;  %v1175_v18 = vmul.f32 0.3275911, %v1150_v12  ;;  %v4670_v47 = vmul.f32 0.70710677, %v986_v60  ;;  %v1500_v59 = vsub.f32 0.0, %v1150_v12 }
 0x187   : > { %v990_v20 = vpop.f32.mrf.mxu0  ;;  %v1549_v13 = vmul.f32 1.442695, %v1524_v16  ;;  %v4708_v17 = vmul.f32 0.5, %v986_v60 }
 0x188   : > { %v1200_v55 = vadd.f32 1.0, %v1175_v18  ;;  %v991_v4 = vadd.f32 %v4659_v33, %v990_v20  ;;  %v1151_v35 = vand.u32 2147483647, %v4670_v47  ;;  %v1525_v63 = vmul.f32 %v1500_v59, %v1150_v12 }
 0x189   : > { %v3410_v23 = vpop.f32.mrf.mxu0  ;;  %vm1651_vm4 = vcmp.lt.f32.partialorder %v4670_v47, 0.0 }
 0x18a   : > { %3784 = vrcp.f32 %v1200_v55  ;;  %v4675_v27 = vmul.f32 0.70710677, %v991_v4  ;;  %v1501_v15 = vsub.f32 0.0, %v1151_v35  ;;  %v1176_v39 = vmul.f32 0.3275911, %v1151_v35 }
 0x18b   : > { %v995_v21 = vpop.f32.mrf.mxu0  ;;  %3786 = vpow2.f32 %v1549_v13  ;;  %v1551_v28 = vmul.f32 1.442695, %v1525_v63  ;;  %v4713_v8 = vmul.f32 0.5, %v991_v4 }
 0x18c   : > { %v996_v6 = vadd.f32 %v4659_v33, %v995_v21  ;;  %v1152_v19 = vand.u32 2147483647, %v4675_v27  ;;  %v1526_v44 = vmul.f32 %v1501_v15, %v1151_v35  ;;  %v1201_v42 = vadd.f32 1.0, %v1176_v39 }
 0x18d   : > { %v3413_v24 = vpop.f32.mrf.mxu0  ;;  %3788 = vpow2.f32 %v1551_v28  ;;  %vm1652_vm5 = vcmp.lt.f32.partialorder %v4675_v27, 0.0 }
 0x18e   : > { %v4682_v61 = vmul.f32 0.70710677, %v996_v6  ;;  %v1177_v48 = vmul.f32 0.3275911, %v1152_v19  ;;  %v1502_v3 = vsub.f32 0.0, %v1152_v19  ;;  %3790 = vrcp.f32 %v1201_v42 }
 0x18f   : > { %v1000_v57 = vpop.f32.mrf.mxu0  ;;  %v1553_v53 = vmul.f32 1.442695, %v1526_v44  ;;  %v4718_v55 = vmul.f32 0.5, %v996_v6 }
 0x190   : > { %v4680_v54 = vadd.f32 %v4659_v33, %v1000_v57  ;;  %v1153_v29 = vand.u32 2147483647, %v4682_v61  ;;  %v1202_v45 = vadd.f32 1.0, %v1177_v48  ;;  %v1527_v32 = vmul.f32 %v1502_v3, %v1152_v19 }
 0x191   : > { %v3416_v31 = vpop.f32.mrf.mxu0  ;;  %3792 = vpow2.f32 %v1553_v53  ;;  %vm1653_vm6 = vcmp.lt.f32.partialorder %v4682_v61, 0.0 }
 0x192   : > { %v4694_v37 = vmul.f32 0.70710677, %v4680_v54  ;;  %v1503_v14 = vsub.f32 0.0, %v1153_v29  ;;  %v1178_v18 = vmul.f32 0.3275911, %v1153_v29  ;;  %3794 = vrcp.f32 %v1202_v45 }
 0x193   : > { %v4677_v30 = vpop.eup %3782  ;;  %v1005_v2 = vpop.f32.mrf.mxu0  ;;  %v1555_v16 = vmul.f32 1.442695, %v1527_v32  ;;  %v4729_v15 = vmul.f32 0.5, %v4680_v54 }
 0x194   : > { %v4685_v49 = vadd.f32 %v4659_v33, %v1005_v2  ;;  %v1274_v62 = vmul.f32 1.0614054, %v4677_v30  ;;  %v1154_v22 = vand.u32 2147483647, %v4694_v37  ;;  %v1528_v40 = vmul.f32 %v1503_v14, %v1153_v29 }
 0x195   : > { %v3419_v25 = vpop.f32.mrf.mxu0  ;;  %v1203_v59 = vadd.f32 1.0, %v1178_v18  ;;  %3796 = vpow2.f32 %v1555_v16  ;;  %vm1654_vm7 = vcmp.lt.f32.partialorder %v4694_v37, 0.0 }
 0x196   : > { %v1299_v43 = vadd.f32 -1.4531521, %v1274_v62  ;;  %v4698_v7 = vmul.f32 0.70710677, %v4685_v49  ;;  %v1504_v60 = vsub.f32 0.0, %v1154_v22 }
 0x197   : > { %v4689_v41 = vpop.eup %3784  ;;  %v1010_v38 = vpop.f32.mrf.mxu0  ;;  %v1179_v2 = vmul.f32 0.3275911, %v1154_v22  ;;  %v1557_v39 = vmul.f32 1.442695, %v1528_v40  ;;  %3798 = vrcp.f32 %v1203_v59 }
 0x198   : > { %v1324_v34 = vmul.f32 %v4677_v30, %v1299_v43  ;;  %v1275_v50 = vmul.f32 1.0614054, %v4689_v41  ;;  %v4705_v10 = vadd.f32 %v4659_v33, %v1010_v38  ;;  %v1155_v11 = vand.u32 2147483647, %v4698_v7  ;;  %v3787_v29 = vpop.eup %3786 }
 0x199   : > { %v3422_v51 = vpop.f32.mrf.mxu0  ;;  %v1529_v19 = vmul.f32 %v1504_v60, %v1154_v22  ;;  %3800 = vpow2.f32 %v1557_v39  ;;  %vm1655_vm8 = vcmp.lt.f32.partialorder %v4698_v7, 0.0 }
 0x19a   : > { %v1349_v58 = vadd.f32 1.4214138, %v1324_v34  ;;  %v1300_v5 = vadd.f32 -1.4531521, %v1275_v50  ;;  %v4716_v20 = vmul.f32 0.70710677, %v4705_v10 }
 0x19b   : > { %v1015_v56 = vpop.f32.mrf.mxu0  ;;  %v1505_v24 = vsub.f32 0.0, %v1155_v11  ;;  %v1180_v38 = vmul.f32 0.3275911, %v1155_v11  ;;  %v1204_v34 = vadd.f32 1.0, %v1179_v2  ;;  %v1559_v42 = vmul.f32 1.442695, %v1529_v19 }
 0x19c   : > { %v1374_v36 = vmul.f32 %v4677_v30, %v1349_v58  ;;  %v1325_v12 = vmul.f32 %v4689_v41, %v1300_v5  ;;  %v4721_v57 = vadd.f32 %v4659_v33, %v1015_v56  ;;  %v1156_v6 = vand.u32 2147483647, %v4716_v20 }
 0x19d   : > { %v3425_v9 = vpop.f32.mrf.mxu0  ;;  %v1530_v43 = vmul.f32 %v1505_v24, %v1155_v11  ;;  %v1205_v53 = vadd.f32 1.0, %v1180_v38  ;;  %3802 = vrcp.f32 %v1204_v34  ;;  %vm1656_vm9 = vcmp.lt.f32.partialorder %v4716_v20, 0.0 }
 0x19e   : > { %v1399_v21 = vadd.f32 -0.28449672, %v1374_v36  ;;  %v1350_v31 = vadd.f32 1.4214138, %v1325_v12  ;;  %v4734_v44 = vmul.f32 0.70710677, %v4721_v57  ;;  %3804 = vpow2.f32 %v1559_v42 }
 0x19f   : > { %v1020_v23 = vpop.f32.mrf.mxu0  ;;  %v1506_v50 = vsub.f32 0.0, %v1156_v6  ;;  %v1181_v22 = vmul.f32 0.3275911, %v1156_v6  ;;  %v1561_v14 = vmul.f32 1.442695, %v1530_v43  ;;  %v4753_v12 = vmul.f32 0.5, %v4685_v49 }
 0x1a0   : > { %v1424_v35 = vmul.f32 %v4677_v30, %v1399_v21  ;;  %v4726_v13 = vadd.f32 %v4659_v33, %v1020_v23  ;;  %v1375_v63 = vmul.f32 %v4689_v41, %v1350_v31  ;;  %v1157_v11 = vand.u32 2147483647, %v4734_v44  ;;  %v3789_v23 = vpop.eup %3788 }
 0x1a1   : > { %v3428_v4 = vpop.f32.mrf.mxu0  ;;  %v1531_v18 = vmul.f32 %v1506_v50, %v1156_v6  ;;  %v1206_v21 = vadd.f32 1.0, %v1181_v22  ;;  %3806 = vrcp.f32 %v1205_v53  ;;  %v4776_v38 = vmul.f32 0.5, %v4721_v57 }
 0x1a2   : > { %v1449_v62 = vadd.f32 0.2548296, %v1424_v35  ;;  %v1400_v51 = vadd.f32 -0.28449672, %v1375_v63  ;;  %v4741_v28 = vmul.f32 0.70710677, %v4726_v13  ;;  %v4757_v4 = vpop.eup %3790  ;;  %3808 = vpow2.f32 %v1561_v14 }
 0x1a3   : > { %v1025_v25 = vpop.f32.mrf.mxu0  ;;  %v4760_v35 = vmul.f32 0.5, %v4705_v10  ;;  %v1507_v31 = vsub.f32 0.0, %v1157_v11  ;;  %v4765_v59 = vpop.eup %3792  ;;  %v1182_v63 = vmul.f32 0.3275911, %v1157_v11  ;;  %3810 = vrcp.f32 %v1206_v21 }
 0x1a4   : > { %v4737_v48 = vadd.f32 %v4659_v33, %v1025_v25  ;;  %v1474_v3 = vmul.f32 %v4677_v30, %v1449_v62  ;;  %v1425_v5 = vmul.f32 %v4689_v41, %v1400_v51  ;;  %v1158_v60 = vand.u32 2147483647, %v4741_v28  ;;  %v4770_v25 = vpop.eup %3794 }
 0x1a5   : > { %v3431_v54 = vpop.f32.mrf.mxu0  ;;  %v1563_v62 = vmul.f32 1.442695, %v1531_v18  ;;  %v4783_v50 = vmul.f32 0.5, %v4726_v13  ;;  %v4786_v57 = vpop.eup %3796  ;;  %vm1657_vm10 = vcmp.lt.f32.partialorder %v4734_v44, 0.0  ;;  %vm1658_vm11 = vcmp.lt.f32.partialorder %v4741_v28, 0.0 }
 0x1a6   : > { %v1599_v58 = vmul.f32 %v3787_v29, %v1474_v3  ;;  %v4746_v30 = vmul.f32 0.70710677, %v4737_v48  ;;  %v1450_v36 = vadd.f32 0.2548296, %v1425_v5  ;;  %v1508_v10 = vsub.f32 0.0, %v1158_v60 }
 0x1a7   : > { %v1030_v56 = vpop.f32.mrf.mxu0  ;;  %v1532_v3 = vmul.f32 %v1507_v31, %v1157_v11  ;;  %v1183_v51 = vmul.f32 0.3275911, %v1158_v60  ;;  %3812 = vpow2.f32 %v1563_v62  ;;  %v1207_v5 = vadd.f32 1.0, %v1182_v63  ;;  %v4791_v11 = vpop.eup %3798 }
 0x1a8   : > { %v4749_v45 = vadd.f32 %v4659_v33, %v1030_v56  ;;  %v1624_v9 = vsub.f32 1.0, %v1599_v58  ;;  %v1475_v16 = vmul.f32 %v4689_v41, %v1450_v36  ;;  %v1159_v2 = vand.u32 2147483647, %v4746_v30 }
 0x1a9   : > { %v3434_v32 = vpop.f32.mrf.mxu0  ;;  %v1533_v53 = vmul.f32 %v1508_v10, %v1158_v60  ;;  %v1276_v36 = vmul.f32 1.0614054, %v4757_v4  ;;  %v1565_v18 = vmul.f32 1.442695, %v1532_v3  ;;  %v1208_v60 = vadd.f32 1.0, %v1183_v51 }
 0x1aa   : > { %v1674_v24 = vsub.f32 0.0, %v1624_v9  ;;  %v4763_v49 = vmul.f32 0.70710677, %v4749_v45  ;;  %v1600_v41 = vmul.f32 %v3789_v23, %v1475_v16  ;;  %v1509_v42 = vsub.f32 0.0, %v1159_v2 }
 0x1ab   : > { %v1035_v40 = vpop.f32.mrf.mxu0  ;;  %v4794_v32 = vmul.f32 0.5, %v4737_v48  ;;  %v1184_v23 = vmul.f32 0.3275911, %v1159_v2  ;;  %3814 = vrcp.f32 %v1207_v5  ;;  %v1567_v46 = vmul.f32 1.442695, %v1533_v53 }
 0x1ac   : > { %v1699_v19 = vsel %vm1649_vm2, %v1674_v24, %v1624_v9  ;;  %v4773_v39 = vadd.f32 %v4659_v33, %v1035_v40  ;;  %v1625_v54 = vsub.f32 1.0, %v1600_v41  ;;  %v1160_v26 = vand.u32 2147483647, %v4763_v49  ;;  %v4804_v40 = vpop.eup %3800 }
 0x1ad   : > { %v3437_v6 = vpop.f32.mrf.mxu0  ;;  %v1724_v29 = vadd.f32 1.0, %v1699_v19  ;;  %6176 = vst [vmem:[#allocation3_spill] sm:$0xff] %v4794_v32  ;;  %v1534_v48 = vmul.f32 %v1509_v42, %v1159_v2  ;;  %v4810_v62 = vpop.eup %3802  ;;  %3816 = vpow2.f32 %v1565_v18  ;;  %v1209_v3 = vadd.f32 1.0, %v1184_v23 }
 0x1ae   : > { %v1675_v58 = vsub.f32 0.0, %v1625_v54  ;;  %v4789_v14 = vmul.f32 0.70710677, %v4773_v39  ;;  %v1510_v21 = vsub.f32 0.0, %v1160_v26  ;;  %v1301_v6 = vadd.f32 -1.4531521, %v1276_v36 }
 0x1af   : > { %v1040_v43 = vpop.f32.mrf.mxu0  ;;  %v1749_v56 = vmul.f32 %v1724_v29, %v4691_v0  ;;  %v1185_v19 = vmul.f32 0.3275911, %v1160_v26  ;;  %3818 = vrcp.f32 %v1208_v60  ;;  %v1277_v23 = vmul.f32 1.0614054, %v4770_v25 }
 0x1b0   : > { %v4780_v34 = vadd.f32 %v4659_v33, %v1040_v43  ;;  %6175 = vst [vmem:[#allocation2_spill] sm:$0xff] %v4789_v14  ;;  %v1700_v0 = vsel %vm1650_vm3, %v1675_v58, %v1625_v54  ;;  %v1161_v41 = vand.u32 2147483647, %v4789_v14  ;;  %v1326_v29 = vmul.f32 %v4757_v4, %v1301_v6  ;;  %v4818_v54 = vpop.eup %3804 }
 0x1b1   : > { %v3440_v22 = vpop.f32.mrf.mxu0  ;;  %3507 = vmatmul.mubr.f32.vlgmr.msra.gmra.mxu1 %v1749_v56  ;;  %v1725_v31 = vadd.f32 1.0, %v1700_v0  ;;  %v1535_v51 = vmul.f32 %v1510_v21, %v1160_v26  ;;  %v1569_v56 = vmul.f32 1.442695, %v1534_v48  ;;  %v4826_v58 = vmul.f32 0.5, %v4749_v45 }
 0x1b2   : > { %v4797_v13 = vmul.f32 0.70710677, %v4780_v34  ;;  %3509 = vmatprep.mubr.msk.f32.mxu1 %vm4041_vm0, %v6154_v1  ;;  %v4823_v22 = vpop.eup %3806  ;;  %v1351_v5 = vadd.f32 1.4214138, %v1326_v29  ;;  %3820 = vpow2.f32 %v1567_v46  ;;  %v1511_v0 = vsub.f32 0.0, %v1161_v41 }
 0x1b3   : > { %v1045_v9 = vpop.f32.mrf.mxu0  ;;  %v1750_v2 = vmul.f32 %v1725_v31, %v4702_v52  ;;  %6179 = vst [vmem:[#allocation6_spill] sm:$0xff] %v4826_v58  ;;  %v4828_v53 = vpop.eup %3808  ;;  %3822 = vrcp.f32 %v1209_v3  ;;  %v1571_v48 = vmul.f32 1.442695, %v1535_v51  ;;  %v4844_v6 = vmul.f32 0.5, %v4773_v39 }
 0x1b4   : > { %6177 = vst [vmem:[#allocation4_spill] sm:$0xff] %v4797_v13  ;;  %v4807_v24 = vadd.f32 %v4659_v33, %v1045_v9  ;;  %v1162_v63 = vand.u32 2147483647, %v4797_v13  ;;  %v1210_v9 = vadd.f32 1.0, %v1185_v19  ;;  %v1376_v45 = vmul.f32 %v4757_v4, %v1351_v5  ;;  %v4838_v21 = vpop.eup %3810 }
 0x1b5   : > { %v3443_v16 = vpop.f32.mrf.mxu0  ;;  %3510 = vmatmul.mubr.f32.gmra.mxu1 %v1750_v2  ;;  %3824 = vpow2.f32 %v1569_v56  ;;  %6181 = vst [vmem:[#allocation8_spill] sm:$0xff] %v4844_v6  ;;  %v1302_v2 = vadd.f32 -1.4531521, %v1277_v23  ;;  %v4846_v5 = vpop.eup %3812  ;;  %vm1659_vm12 = vcmp.lt.f32.partialorder %v4746_v30, 0.0  ;;  %vm1660_vm13 = vcmp.lt.f32.partialorder %v4763_v49, 0.0 }
 0x1b6   : > { %v4814_v10 = vmul.f32 0.70710677, %v4807_v24  ;;  %3512 = vmatprep.mubr.msk.f32.mxu1 %vm4041_vm0, %v6154_v1  ;;  %v1512_v36 = vsub.f32 0.0, %v1162_v63  ;;  %v1186_v16 = vmul.f32 0.3275911, %v1161_v41  ;;  %3826 = vrcp.f32 %v1210_v9 }
 0x1b7   : > { %v1050_v43 = vpop.f32.mrf.mxu0  ;;  %v1401_v46 = vadd.f32 -0.28449672, %v1376_v45  ;;  %v1187_v29 = vmul.f32 0.3275911, %v1162_v63  ;;  %3828 = vpow2.f32 %v1571_v48  ;;  %v4852_v45 = vmul.f32 0.5, %v4780_v34 }
 0x1b8   : > { %6178 = vst [vmem:[#allocation5_spill] sm:$0xff] %v4814_v10  ;;  %v4821_v42 = vadd.f32 %v4659_v33, %v1050_v43  ;;  %v1163_v26 = vand.u32 2147483647, %v4814_v10  ;;  %v1536_v43 = vmul.f32 %v1511_v0, %v1161_v41  ;;  %v1537_v1 = vmul.f32 %v1512_v36, %v1162_v63  ;;  %v4864_v34 = vpop.eup %3814 }
 0x1b9   : > { %v3446_v52 = vpop.f32.mrf.mxu0  ;;  %v1426_v51 = vmul.f32 %v4757_v4, %v1401_v46  ;;  %v1211_v39 = vadd.f32 1.0, %v1186_v16  ;;  %6182 = vst [vmem:[#allocation9_spill] sm:$0xff] %v4852_v45  ;;  %v4862_v48 = vmul.f32 0.5, %v4807_v24 }
 0x1ba   : > { %v4834_v18 = vmul.f32 0.70710677, %v4821_v42  ;;  %v1513_v52 = vsub.f32 0.0, %v1163_v26  ;;  %v1188_v41 = vmul.f32 0.3275911, %v1163_v26 }
 0x1bb   : > { %v1055_v60 = vpop.f32.mrf.mxu0  ;;  %v1451_v0 = vadd.f32 0.2548296, %v1426_v51  ;;  %v1573_v46 = vmul.f32 1.442695, %v1536_v43  ;;  %6184 = vst [vmem:[#allocation11_spill] sm:$0xff] %v4862_v48  ;;  %3830 = vrcp.f32 %v1211_v39 }
 0x1bc   : > { %6180 = vst [vmem:[#allocation7_spill] sm:$0xff] %v4834_v18  ;;  %v4841_v31 = vadd.f32 %v4659_v33, %v1055_v60  ;;  %v1164_v3 = vand.u32 2147483647, %v4834_v18  ;;  %v1327_v60 = vmul.f32 %v4770_v25, %v1302_v2  ;;  %v1538_v16 = vmul.f32 %v1513_v52, %v1163_v26 }
 0x1bd   : > { %v3449_v19 = vpop.f32.mrf.mxu0  ;;  %v1575_v2 = vmul.f32 1.442695, %v1537_v1  ;;  %v1476_v6 = vmul.f32 %v4757_v4, %v1451_v0  ;;  %v1278_v43 = vmul.f32 1.0614054, %v4791_v11  ;;  %v1213_v24 = vadd.f32 1.0, %v1188_v41 }
 0x1be   : > { %v4855_v9 = vmul.f32 0.70710677, %v4841_v31  ;;  %v1352_v23 = vadd.f32 1.4214138, %v1327_v60  ;;  %v1212_v19 = vadd.f32 1.0, %v1187_v29  ;;  %v1514_v45 = vsub.f32 0.0, %v1164_v3  ;;  %v4870_v29 = vpop.eup %3816 }
 0x1bf   : > { %v1060_v56 = vpop.f32.mrf.mxu0  ;;  %v1601_v26 = vmul.f32 %v4765_v59, %v1476_v6  ;;  %v4876_v4 = vpop.eup %3818  ;;  %3832 = vpow2.f32 %v1573_v46  ;;  %v1577_v0 = vmul.f32 1.442695, %v1538_v16  ;;  %v1303_v39 = vadd.f32 -1.4531521, %v1278_v43 }
 0x1c0   : > { %6183 = vst [vmem:[#allocation10_spill] sm:$0xff] %v4855_v9  ;;  %v4858_v63 = vadd.f32 %v4659_v33, %v1060_v56  ;;  %v1377_v51 = vmul.f32 %v4770_v25, %v1352_v23  ;;  %v1189_v56 = vmul.f32 0.3275911, %v1164_v3  ;;  %3834 = vrcp.f32 %v1212_v19 }
 0x1c1   : > { %v3452_v36 = vpop.f32.mrf.mxu0  ;;  %v1539_v58 = vmul.f32 %v1514_v45, %v1164_v3  ;;  %v1626_v41 = vsub.f32 1.0, %v1601_v26  ;;  %3836 = vpow2.f32 %v1575_v2 }
 0x1c2   : > { %v1165_v36 = vand.u32 2147483647, %v4855_v9  ;;  %v1402_v52 = vadd.f32 -0.28449672, %v1377_v51  ;;  %v4874_v1 = vmul.f32 0.70710677, %v4858_v63  ;;  %v4881_v9 = vpop.eup %3820  ;;  %3838 = vrcp.f32 %v1213_v24 }
 0x1c3   : > { %v1065_v60 = vpop.f32.mrf.mxu0  ;;  %v1214_v51 = vadd.f32 1.0, %v1189_v56  ;;  %v4885_v10 = vpop.eup %3822  ;;  %v1676_v46 = vsub.f32 0.0, %v1626_v41  ;;  %3840 = vpow2.f32 %v1577_v0  ;;  %v1579_v56 = vmul.f32 1.442695, %v1539_v58 }
 0x1c4   : > { %6185 = vst [vmem:[#allocation12_spill] sm:$0xff] %v4874_v1  ;;  %v4879_v23 = vadd.f32 %v4659_v33, %v1065_v60  ;;  %v1427_v59 = vmul.f32 %v4770_v25, %v1402_v52  ;;  %v1190_v18 = vmul.f32 0.3275911, %v1165_v36  ;;  %v1166_v60 = vand.u32 2147483647, %v4874_v1  ;;  %v4888_v13 = vpop.eup %3824 }
 0x1c5   : > { %v3455_v48 = vpop.f32.mrf.mxu0  ;;  %v1515_v3 = vsub.f32 0.0, %v1165_v36  ;;  %v4894_v2 = vpop.eup %3826  ;;  %v1701_v24 = vsel %vm1651_vm4, %v1676_v46, %v1626_v41  ;;  %3842 = vrcp.f32 %v1214_v51  ;;  %v1279_v41 = vmul.f32 1.0614054, %v4810_v62 }
 0x1c6   : > { %6186 = vst [vmem:[#allocation13_spill] sm:$0xff] %v4879_v23  ;;  %v1328_v48 = vmul.f32 %v4791_v11, %v1303_v39  ;;  %v1452_v16 = vadd.f32 0.2548296, %v1427_v59  ;;  %v4892_v19 = vmul.f32 0.70710677, %v4879_v23  ;;  %v4903_v59 = vmul.f32 0.5, %v4821_v42 }
 0x1c7   : > { %v1070_v6 = vpop.f32.mrf.mxu0  ;;  %v1726_v0 = vadd.f32 1.0, %v1701_v24  ;;  %v1215_v23 = vadd.f32 1.0, %v1190_v18  ;;  %v1516_v47 = vsub.f32 0.0, %v1166_v60  ;;  %v1540_v46 = vmul.f32 %v1515_v3, %v1165_v36 }
 0x1c8   : > { %v1353_v45 = vadd.f32 1.4214138, %v1328_v48  ;;  %6187 = vst [vmem:[#allocation14_spill] sm:$0xff] %v4892_v19  ;;  %v1477_v26 = vmul.f32 %v4770_v25, %v1452_v16  ;;  %v4900_v52 = vadd.f32 %v4659_v33, %v1070_v6  ;;  %6189 = vst [vmem:[#allocation16_spill] sm:$0xff] %v4903_v59  ;;  %v1167_v42 = vand.u32 2147483647, %v4892_v19 }
 0x1c9   : > { %v3458_v43 = vpop.f32.mrf.mxu0  ;;  %v1751_v6 = vmul.f32 %v1726_v0, %v4708_v17  ;;  %3844 = vpow2.f32 %v1579_v56  ;;  %v1304_v24 = vadd.f32 -1.4531521, %v1279_v41  ;;  %v1191_v18 = vmul.f32 0.3275911, %v1166_v60 }
 0x1ca   : > { %6188 = vst [vmem:[#allocation15_spill] sm:$0xff] %v4900_v52  ;;  %v1378_v48 = vmul.f32 %v4791_v11, %v1353_v45  ;;  %v4906_v43 = vpop.eup %3828  ;;  %v1602_v58 = vmul.f32 %v4786_v57, %v1477_v26  ;;  %v4913_v45 = vmul.f32 0.70710677, %v4900_v52  ;;  %v1280_v26 = vmul.f32 1.0614054, %v4823_v22 }
 0x1cb   : > { %v1075_v39 = vpop.f32.mrf.mxu0  ;;  %6190 = vst [vmem:[#allocation17_spill] sm:$0xff] %v4906_v43  ;;  %3513 = vmatmul.mubr.f32.gmra.mxu1 %v1751_v6  ;;  %v4920_v17 = vpop.eup %3830  ;;  %v6193_v36 = vmov 0.0   ;;  %v1541_v56 = vmul.f32 %v1516_v47, %v1166_v60  ;;  %v1329_v0 = vmul.f32 %v4810_v62, %v1304_v24  ;;  %3846 = vrcp.f32 %v1215_v23 }
 0x1cc   : > { %v1403_v16 = vadd.f32 -0.28449672, %v1378_v48  ;;  %v1627_v51 = vsub.f32 1.0, %v1602_v58  ;;  %6191 = vst [vmem:[#allocation18_spill] sm:$0xff] %v4913_v45  ;;  %3515 = vmatprep.mubr.msk.f32.mxu1 %vm4041_vm0, %v6193_v36  ;;  %v1168_v48 = vand.u32 2147483647, %v4913_v45  ;;  %v4926_v52 = vpop.eup %3832 }
 0x1cd   : > { %v3461_v25 = vpop.f32.mrf.mxu0  ;;  %v1581_v41 = vmul.f32 1.442695, %v1540_v46  ;;  %6194 = vst [vmem:[#allocation20_spill] sm:$0xff] %v4926_v52  ;;  %v1517_v19 = vsub.f32 0.0, %v1167_v42  ;;  %v1354_v1 = vadd.f32 1.4214138, %v1329_v0  ;;  %v4933_v47 = vpop.eup %3834 }
 0x1ce   : > { %v1428_v57 = vmul.f32 %v4791_v11, %v1403_v16  ;;  %v4918_v25 = vadd.f32 %v4659_v33, %v1075_v39  ;;  %v1677_v3 = vsub.f32 0.0, %v1627_v51  ;;  %v1305_v16 = vadd.f32 -1.4531521, %v1280_v26  ;;  %v4940_v26 = vpop.eup %3836 }
 0x1cf   : > { %v1080_v59 = vpop.f32.mrf.mxu0  ;;  %v1518_v43 = vsub.f32 0.0, %v1168_v48  ;;  %6196 = vst [vmem:[#allocation22_spill] sm:$0xff] %v4940_v26  ;;  %v1583_v27 = vmul.f32 1.442695, %v1541_v56  ;;  %v4944_v45 = vpop.eup %3838  ;;  %3848 = vpow2.f32 %v1581_v41 }
 0x1d0   : > { %6192 = vst [vmem:[#allocation19_spill] sm:$0xff] %v4918_v25  ;;  %v1453_v6 = vadd.f32 0.2548296, %v1428_v57  ;;  %v1702_v39 = vsel %vm1652_vm5, %v1677_v3, %v1627_v51  ;;  %v1330_v46 = vmul.f32 %v4823_v22, %v1305_v16  ;;  %v4938_v57 = vmul.f32 0.70710677, %v4918_v25  ;;  %v4948_v52 = vpop.eup %3840 }
 0x1d1   : > { %v3464_v58 = vpop.f32.mrf.mxu0  ;;  %v1727_v24 = vadd.f32 1.0, %v1702_v39  ;;  %v1379_v51 = vmul.f32 %v4810_v62, %v1354_v1  ;;  %v1281_v3 = vmul.f32 1.0614054, %v4838_v21  ;;  %v1542_v25 = vmul.f32 %v1517_v19, %v1167_v42 }
 0x1d2   : > { %v1478_v23 = vmul.f32 %v4791_v11, %v1453_v6  ;;  %6195 = vst [vmem:[#allocation21_spill] sm:$0xff] %v4938_v57  ;;  %v1216_v58 = vadd.f32 1.0, %v1191_v18  ;;  %v1192_v6 = vmul.f32 0.3275911, %v1167_v42  ;;  %v1355_v16 = vadd.f32 1.4214138, %v1330_v46 }
 0x1d3   : > { %v4931_v60 = vpop.f32.mrf.mxu0  ;;  %v1752_v39 = vmul.f32 %v1727_v24, %v4713_v8  ;;  %v1404_v26 = vadd.f32 -0.28449672, %v1379_v51  ;;  %v1193_v18 = vmul.f32 0.3275911, %v1168_v48  ;;  %v1543_v32 = vmul.f32 %v1518_v43, %v1168_v48  ;;  %v4954_v8 = vpop.eup %3842 }
 0x1d4   : > { %v1603_v11 = vmul.f32 %v4804_v40, %v1478_v23  ;;  %v1169_v14 = vand.u32 2147483647, %v4938_v57  ;;  %3850 = vrcp.f32 %v1216_v58  ;;  %v1306_v19 = vadd.f32 -1.4531521, %v1281_v3 }
 0x1d5   : > { %v3467_v0 = vpop.f32.mrf.mxu0  ;;  %3516 = vmatmul.mubr.f32.gmra.mxu1 %v1752_v39  ;;  %v1429_v40 = vmul.f32 %v4810_v62, %v1404_v26  ;;  %v4960_v42 = vadd.f32 %v4659_v33, %v1080_v59  ;;  %3852 = vpow2.f32 %v1583_v27  ;;  %v1217_v43 = vadd.f32 1.0, %v1192_v6 }
 0x1d6   : > { %v1628_v1 = vsub.f32 1.0, %v1603_v11  ;;  %v1380_v0 = vmul.f32 %v4823_v22, %v1355_v16  ;;  %3518 = vmatprep.mubr.msk.f32.mxu1 %vm4041_vm0, %v6193_v36  ;;  %v1585_v23 = vmul.f32 1.442695, %v1542_v25  ;;  %v1218_v51 = vadd.f32 1.0, %v1193_v18  ;;  %v4965_v11 = vpop.eup %3844 }
 0x1d7   : > { %v4950_v56 = vpop.f32.mrf.mxu0  ;;  %v1454_v46 = vadd.f32 0.2548296, %v1429_v40  ;;  %v1331_v39 = vmul.f32 %v4838_v21, %v1306_v19  ;;  %v1587_v26 = vmul.f32 1.442695, %v1543_v32  ;;  %v1194_v3 = vmul.f32 0.3275911, %v1169_v14 }
 0x1d8   : > { %v1678_v24 = vsub.f32 0.0, %v1628_v1  ;;  %v1405_v48 = vadd.f32 -0.28449672, %v1380_v0  ;;  %v4973_v18 = vmul.f32 0.70710677, %v4960_v42  ;;  %3854 = vrcp.f32 %v1217_v43  ;;  %v4976_v57 = vpop.eup %3846 }
 0x1d9   : > { %v3470_v41 = vpop.f32.mrf.mxu0  ;;  %v1479_v25 = vmul.f32 %v4810_v62, %v1454_v46  ;;  %v1356_v16 = vadd.f32 1.4214138, %v1331_v39  ;;  %v1519_v19 = vsub.f32 0.0, %v1169_v14  ;;  %3856 = vpow2.f32 %v1585_v23 }
 0x1da   : > { %v1703_v59 = vsel %vm1653_vm6, %v1678_v24, %v1628_v1  ;;  %v1430_v27 = vmul.f32 %v4823_v22, %v1405_v48  ;;  %v1282_v41 = vmul.f32 1.0614054, %v4864_v34  ;;  %v1219_v24 = vadd.f32 1.0, %v1194_v3 }
 0x1db   : > { %v4963_v58 = vpop.f32.mrf.mxu0  ;;  %v1728_v6 = vadd.f32 1.0, %v1703_v59  ;;  %v1604_v32 = vmul.f32 %v4818_v54, %v1479_v25  ;;  %v1381_v62 = vmul.f32 %v4838_v21, %v1356_v16  ;;  %v4985_v43 = vadd.f32 %v4659_v33, %v4931_v60 }
 0x1dc   : > { %v1455_v40 = vadd.f32 0.2548296, %v1430_v27  ;;  %v1307_v48 = vadd.f32 -1.4531521, %v1282_v41  ;;  %3858 = vrcp.f32 %v1218_v51  ;;  %v1170_v59 = vand.u32 2147483647, %v4973_v18  ;;  %v4997_v3 = vpop.eup %3848 }
 0x1dd   : > { %v3473_v0 = vpop.f32.mrf.mxu0  ;;  %v1753_v61 = vmul.f32 %v1728_v6, %v4718_v55  ;;  %v1629_v46 = vsub.f32 1.0, %v1604_v32  ;;  %v1406_v39 = vadd.f32 -0.28449672, %v1381_v62  ;;  %3860 = vpow2.f32 %v1587_v26 }
 0x1de   : > { %v1480_v1 = vmul.f32 %v4823_v22, %v1455_v40  ;;  %v1544_v54 = vmul.f32 %v1519_v19, %v1169_v14  ;;  %v1332_v22 = vmul.f32 %v4864_v34, %v1307_v48  ;;  %v4994_v60 = vmul.f32 0.70710677, %v4985_v43 }
 0x1df   : > { %3519 = vmatmul.mubr.f32.gmra.mxu1 %v1753_v61  ;;  %v1679_v23 = vsub.f32 0.0, %v1629_v46  ;;  %v1431_v27 = vmul.f32 %v4838_v21, %v1406_v39  ;;  %v1283_v51 = vmul.f32 1.0614054, %v4876_v4  ;;  %v5000_v6 = vmul.f32 0.5, %v4841_v31 }
 0x1e0   : > { %3521 = vmatprep.mubr.msk.f32.mxu1 %vm4041_vm0, %v6193_v36  ;;  %v1605_v55 = vmul.f32 %v4828_v53, %v1480_v1  ;;  %3862 = vrcp.f32 %v1219_v24  ;;  %v1357_v26 = vadd.f32 1.4214138, %v1332_v22  ;;  %v1520_v16 = vsub.f32 0.0, %v1170_v59 }
 0x1e1   : > { %v1704_v14 = vsel %vm1654_vm7, %v1679_v23, %v1629_v46  ;;  %v1456_v53 = vadd.f32 0.2548296, %v1431_v27  ;;  %v1171_v0 = vand.u32 2147483647, %v4994_v60  ;;  %v5005_v40 = vpop.eup %3850  ;;  %v5011_v31 = vadd.f32 %v4659_v33, %v4950_v56 }
 0x1e2   : > { %v1630_v25 = vsub.f32 1.0, %v1605_v55  ;;  %v1729_v19 = vadd.f32 1.0, %v1704_v14  ;;  %v1382_v61 = vmul.f32 %v4864_v34, %v1357_v26  ;;  %v5013_v32 = vpop.eup %3852  ;;  %v1589_v37 = vmul.f32 1.442695, %v1544_v54 }
 0x1e3   : > { %v1481_v62 = vmul.f32 %v4838_v21, %v1456_v53  ;;  %v1521_v1 = vsub.f32 0.0, %v1171_v0  ;;  %v1308_v24 = vadd.f32 -1.4531521, %v1283_v51  ;;  %v1195_v39 = vmul.f32 0.3275911, %v1170_v59 }
 0x1e4   : > { %v1680_v41 = vsub.f32 0.0, %v1630_v25  ;;  %v1754_v48 = vmul.f32 %v1729_v19, %v4729_v15  ;;  %v1407_v55 = vadd.f32 -0.28449672, %v1382_v61  ;;  %v1545_v27 = vmul.f32 %v1520_v16, %v1170_v59 }
 0x1e5   : > { %v1606_v23 = vmul.f32 %v4846_v5, %v1481_v62  ;;  %v1196_v56 = vmul.f32 0.3275911, %v1171_v0  ;;  %v1333_v54 = vmul.f32 %v4876_v4, %v1308_v24  ;;  %v5023_v21 = vmul.f32 0.70710677, %v5011_v31  ;;  %v5026_v51 = vpop.eup %3854 }
 0x1e6   : > { %v1705_v46 = vsel %vm1655_vm8, %v1680_v41, %v1630_v25  ;;  %3522 = vmatmul.mubr.f32.gmra.mxu1 %v1754_v48  ;;  %v1432_v26 = vmul.f32 %v4864_v34, %v1407_v55  ;;  %v1284_v15 = vmul.f32 1.0614054, %v4885_v10  ;;  %3864 = vpow2.f32 %v1589_v37  ;;  %v5031_v25 = vpop.eup %3856 }
 0x1e7   : > { %v1730_v22 = vadd.f32 1.0, %v1705_v46  ;;  %3524 = vmatprep.mubr.msk.f32.mxu1 %vm4041_vm0, %v6193_v36  ;;  %v1631_v5 = vsub.f32 1.0, %v1606_v23  ;;  %v1546_v59 = vmul.f32 %v1521_v1, %v1171_v0  ;;  %v1358_v53 = vadd.f32 1.4214138, %v1333_v54 }
 0x1e8   : > { %v1457_v14 = vadd.f32 0.2548296, %v1432_v26  ;;  %v1172_v16 = vand.u32 2147483647, %v5023_v21  ;;  %v5036_v19 = vadd.f32 %v4659_v33, %v4963_v58  ;;  %v1220_v61 = vadd.f32 1.0, %v1195_v39 }
 0x1e9   : > { %v1755_v7 = vmul.f32 %v1730_v22, %v4753_v12  ;;  %v1681_v41 = vsub.f32 0.0, %v1631_v5  ;;  %v1591_v62 = vmul.f32 1.442695, %v1545_v27  ;;  %v1309_v24 = vadd.f32 -1.4531521, %v1284_v15  ;;  %v5039_v12 = vpop.eup %3858 }
 0x1ea   : > { %v1482_v0 = vmul.f32 %v4864_v34, %v1457_v14  ;;  %v1221_v37 = vadd.f32 1.0, %v1196_v56  ;;  %v1383_v1 = vmul.f32 %v4876_v4, %v1358_v53  ;;  %v1197_v48 = vmul.f32 0.3275911, %v1172_v16  ;;  %v5043_v46 = vpop.eup %3860 }
 0x1eb   : > { %3525 = vmatmul.mubr.f32.gmra.mxu1 %v1755_v7  ;;  %v1706_v33 = vsel %vm1656_vm9, %v1681_v41, %v1631_v5  ;;  %v1522_v58 = vsub.f32 0.0, %v1172_v16  ;;  %v1334_v39 = vmul.f32 %v4885_v10, %v1309_v24  ;;  %v5051_v55 = vmul.f32 0.70710677, %v5036_v19 }
 0x1ec   : > { %3527 = vmatprep.mubr.msk.f32.mxu1 %vm4041_vm0, %v6193_v36  ;;  %v1731_v22 = vadd.f32 1.0, %v1706_v33  ;;  %v1607_v34 = vmul.f32 %v4870_v29, %v1482_v0  ;;  %v1593_v23 = vmul.f32 1.442695, %v1546_v59  ;;  %v1408_v27 = vadd.f32 -0.28449672, %v1383_v1 }
 0x1ed   : > { %v5054_v56 = vpop.eup %3862  ;;  %3866 = vrcp.f32 %v1220_v61  ;;  %v1222_v26 = vadd.f32 1.0, %v1197_v48  ;;  %v1359_v54 = vadd.f32 1.4214138, %v1334_v39  ;;  %v5057_v15 = vand.u32 2147483647, %v5051_v55 }
 0x1ee   : > { %v1756_v20 = vmul.f32 %v1731_v22, %v4760_v35  ;;  %3868 = vpow2.f32 %v1591_v62  ;;  %v1632_v7 = vsub.f32 1.0, %v1607_v34  ;;  %v1433_v5 = vmul.f32 %v4876_v4, %v1408_v27 }
 0x1ef   : > { %3870 = vrcp.f32 %v1221_v37  ;;  %v1547_v14 = vmul.f32 %v1522_v58, %v1172_v16  ;;  %v1384_v29 = vmul.f32 %v4885_v10, %v1359_v54  ;;  %v1198_v59 = vmul.f32 0.3275911, %v5057_v15 }
 0x1f0   : > { %3528 = vmatmul.mubr.f32.gmra.mxu1 %v1756_v20  ;;  %v1682_v53 = vsub.f32 0.0, %v1632_v7  ;;  %3872 = vpow2.f32 %v1593_v23  ;;  %v1458_v41 = vadd.f32 0.2548296, %v1433_v5  ;;  %v1285_v61 = vmul.f32 1.0614054, %v4894_v2 }
 0x1f1   : > { %v5066_v35 = vmul.f32 0.5, %v4858_v63  ;;  %3530 = vmatprep.mubr.msk.f32.mxu1 %vm4041_vm0, %v6193_v36  ;;  %3874 = vrcp.f32 %v1222_v26  ;;  %v1409_v16 = vadd.f32 -0.28449672, %v1384_v29  ;;  %v1223_v62 = vadd.f32 1.0, %v1198_v59 }
 0x1f2   : > { %v1707_v24 = vsel %vm1657_vm10, %v1682_v53, %v1632_v7  ;;  %v1483_v0 = vmul.f32 %v4876_v4, %v1458_v41  ;;  %v1310_v37 = vadd.f32 -1.4531521, %v1285_v61  ;;  %v1286_v1 = vmul.f32 1.0614054, %v4920_v17 }
 0x1f3   : > { %v1732_v48 = vadd.f32 1.0, %v1707_v24  ;;  %v5074_v33 = vmul.f32 1.442695, %v1547_v14  ;;  %v1434_v63 = vmul.f32 %v4885_v10, %v1409_v16  ;;  %v1523_v58 = vsub.f32 0.0, %v5057_v15  ;;  %v5078_v39 = vpop.eup %3864 }
 0x1f4   : > { %v1608_v22 = vmul.f32 %v4881_v9, %v1483_v0  ;;  %v1335_v34 = vmul.f32 %v4894_v2, %v1310_v37  ;;  %v1311_v44 = vadd.f32 -1.4531521, %v1286_v1  ;;  %v1287_v23 = vmul.f32 1.0614054, %v4933_v47 }
 0x1f5   : > { %v1757_v4 = vmul.f32 %v1732_v48, %v4776_v38  ;;  %v1459_v27 = vadd.f32 0.2548296, %v1434_v63  ;;  %3876 = vrcp.f32 %v1223_v62  ;;  %v1288_v26 = vmul.f32 1.0614054, %v4944_v45 }
 0x1f6   : > { %v1633_v54 = vsub.f32 1.0, %v1608_v22  ;;  %v1360_v20 = vadd.f32 1.4214138, %v1335_v34  ;;  %v1336_v7 = vmul.f32 %v4920_v17, %v1311_v44  ;;  %v1312_v5 = vadd.f32 -1.4531521, %v1287_v23 }
 0x1f7   : > { %3531 = vmatmul.mubr.f32.gmra.mxu1 %v1757_v4  ;;  %v1484_v9 = vmul.f32 %v4885_v10, %v1459_v27  ;;  %v1313_v14 = vadd.f32 -1.4531521, %v1288_v26  ;;  %v1289_v29 = vmul.f32 1.0614054, %v4954_v8  ;;  %v1290_v59 = vmul.f32 1.0614054, %v4976_v57 }
 0x1f8   : > { %3533 = vmatprep.mubr.msk.f32.mxu1 %vm4041_vm0, %v6193_v36  ;;  %v1683_v38 = vsub.f32 0.0, %v1633_v54  ;;  %v1385_v53 = vmul.f32 %v4894_v2, %v1360_v20  ;;  %v1361_v41 = vadd.f32 1.4214138, %v1336_v7  ;;  %v1337_v61 = vmul.f32 %v4933_v47, %v1312_v5 }
 0x1f9   : > { %v1609_v16 = vmul.f32 %v4888_v13, %v1484_v9  ;;  %v1338_v62 = vmul.f32 %v4944_v45, %v1313_v14  ;;  %v1314_v24 = vadd.f32 -1.4531521, %v1289_v29  ;;  %v1315_v10 = vadd.f32 -1.4531521, %v1290_v59 }
 0x1fa   : > { %v5096_v0 = vpop.eup %3866  ;;  %v1708_v37 = vsel %vm1658_vm11, %v1683_v38, %v1633_v54  ;;  %v1410_v1 = vadd.f32 -0.28449672, %v1385_v53  ;;  %v1386_v48 = vmul.f32 %v4920_v17, %v1361_v41  ;;  %v1362_v63 = vadd.f32 1.4214138, %v1337_v61 }
 0x1fb   : > { %v5101_v22 = vpop.eup %3868  ;;  %v1733_v34 = vadd.f32 1.0, %v1708_v37  ;;  %v1634_v44 = vsub.f32 1.0, %v1609_v16  ;;  %v1363_v23 = vadd.f32 1.4214138, %v1338_v62  ;;  %v1339_v13 = vmul.f32 %v4954_v8, %v1314_v24 }
 0x1fc   : > { %v5104_v4 = vpop.eup %3870  ;;  %v1435_v27 = vmul.f32 %v4894_v2, %v1410_v1  ;;  %v1411_v26 = vadd.f32 -0.28449672, %v1386_v48  ;;  %v1387_v20 = vmul.f32 %v4933_v47, %v1362_v63  ;;  %v1340_v28 = vmul.f32 %v4976_v57, %v1315_v10  ;;  %v6197_v48 = vld [vmem:[#allocation2_spill] sm:$0xff] }
 0x1fd   : > { %v5109_v54 = vpop.eup %3872  ;;  %v1758_v7 = vmul.f32 %v1733_v34, %v4783_v50  ;;  %v1684_v5 = vsub.f32 0.0, %v1634_v44  ;;  %v1388_v9 = vmul.f32 %v4944_v45, %v1363_v23  ;;  %v1364_v14 = vadd.f32 1.4214138, %v1339_v13  ;;  %v6198_v13 = vld [vmem:[#allocation3_spill] sm:$0xff] }
 0x1fe   : > { %v5113_v29 = vpop.eup %3874  ;;  %v1460_v59 = vadd.f32 0.2548296, %v1435_v27  ;;  %v1436_v38 = vmul.f32 %v4920_v17, %v1411_v26  ;;  %v1412_v53 = vadd.f32 -0.28449672, %v1387_v20  ;;  %v1365_v41 = vadd.f32 1.4214138, %v1340_v28 }
 0x1ff   : > { %3534 = vmatmul.mubr.f32.gmra.mxu1 %v1758_v7  ;;  %v1709_v61 = vsel %vm1659_vm12, %v1684_v5, %v1634_v44  ;;  %v1413_v16 = vadd.f32 -0.28449672, %v1388_v9  ;;  %v1389_v50 = vmul.f32 %v4954_v8, %v1364_v14  ;;  %v1291_v62 = vmul.f32 1.0614054, %v5005_v40  ;;  %v6199_v26 = vld [vmem:[#allocation17_spill] sm:$0xff]  ;;  %v6200_v7 = vld [vmem:[#allocation4_spill] sm:$0xff] }
 0x200   : > { %3536 = vmatprep.mubr.msk.f32.mxu1 %vm4041_vm0, %v6193_v36  ;;  %v1734_v24 = vadd.f32 1.0, %v1709_v61  ;;  %v1485_v10 = vmul.f32 %v4894_v2, %v1460_v59  ;;  %v1461_v37 = vadd.f32 0.2548296, %v1436_v38  ;;  %v1437_v1 = vmul.f32 %v4933_v47, %v1412_v53  ;;  %v6201_v38 = vld [vmem:[#allocation5_spill] sm:$0xff] }
 0x201   : > { %vm1661_vm14 = vcmp.lt.f32.partialorder %v6197_v48, 0.0  ;;  %v1438_v63 = vmul.f32 %v4944_v45, %v1413_v16  ;;  %v1414_v30 = vadd.f32 -0.28449672, %v1389_v50  ;;  %v1390_v34 = vmul.f32 %v4976_v57, %v1365_v41  ;;  %v6202_v41 = vld [vmem:[#allocation20_spill] sm:$0xff] }
 0x202   : > { %v1316_v44 = vadd.f32 -1.4531521, %v1291_v62  ;;  %v5128_v23 = vpop.eup %3876  ;;  %v1759_v27 = vmul.f32 %v1734_v24, %v6198_v13  ;;  %v1610_v20 = vmul.f32 %v6199_v26, %v1485_v10  ;;  %v1486_v28 = vmul.f32 %v4920_v17, %v1461_v37  ;;  %v6203_v37 = vld [vmem:[#allocation7_spill] sm:$0xff] }
 0x203   : > { %v1462_v2 = vadd.f32 0.2548296, %v1437_v1  ;;  %vm1662_vm15 = vcmp.lt.f32.partialorder %v6200_v7, 0.0  ;;  %v1463_v5 = vadd.f32 0.2548296, %v1438_v63  ;;  %v1439_v9 = vmul.f32 %v4954_v8, %v1414_v30  ;;  %v6204_v30 = vld [vmem:[#allocation22_spill] sm:$0xff] }
 0x204   : > { %v1415_v14 = vadd.f32 -0.28449672, %v1390_v34  ;;  %v1341_v59 = vmul.f32 %v5005_v40, %v1316_v44  ;;  %vm1663_vm2 = vcmp.lt.f32.partialorder %v6201_v38, 0.0  ;;  %3537 = vmatmul.mubr.f32.gmra.mxu1 %v1759_v27  ;;  %v1635_v53 = vsub.f32 1.0, %v1610_v20 }
 0x205   : > { %v1611_v61 = vmul.f32 %v6202_v41, %v1486_v28  ;;  %v1487_v16 = vmul.f32 %v4933_v47, %v1462_v2  ;;  %v1292_v50 = vmul.f32 1.0614054, %v5026_v51  ;;  %3539 = vmatprep.mubr.msk.f32.mxu1 %vm4041_vm0, %v6193_v36  ;;  %v1488_v17 = vmul.f32 %v4944_v45, %v1463_v5 }
 0x206   : > { %v1464_v62 = vadd.f32 0.2548296, %v1439_v9  ;;  %v1440_v24 = vmul.f32 %v4976_v57, %v1415_v14  ;;  %v1366_v10 = vadd.f32 1.4214138, %v1341_v59  ;;  %vm1664_vm3 = vcmp.lt.f32.partialorder %v6203_v37, 0.0 }
 0x207   : > { %v1685_v1 = vsub.f32 0.0, %v1635_v53  ;;  %v1636_v63 = vsub.f32 1.0, %v1611_v61  ;;  %v1612_v34 = vmul.f32 %v6204_v30, %v1487_v16  ;;  %v1317_v44 = vadd.f32 -1.4531521, %v1292_v50  ;;  %v6205_v16 = vld [vmem:[#allocation6_spill] sm:$0xff] }
 0x208   : > { %v1613_v47 = vmul.f32 %v4948_v52, %v1488_v17  ;;  %v1489_v13 = vmul.f32 %v4954_v8, %v1464_v62  ;;  %v1465_v27 = vadd.f32 0.2548296, %v1440_v24  ;;  %v1391_v26 = vmul.f32 %v5005_v40, %v1366_v10  ;;  %v6206_v62 = vld [vmem:[#allocation10_spill] sm:$0xff]  ;;  %v6207_v10 = vld [vmem:[#allocation8_spill] sm:$0xff] }
 0x209   : > { %v1710_v45 = vsel %vm1660_vm13, %v1685_v1, %v1635_v53  ;;  %v1686_v20 = vsub.f32 0.0, %v1636_v63  ;;  %v1637_v28 = vsub.f32 1.0, %v1612_v34  ;;  %v1342_v2 = vmul.f32 %v5026_v51, %v1317_v44 }
 0x20a   : > { %v1735_v5 = vadd.f32 1.0, %v1710_v45  ;;  %v1638_v9 = vsub.f32 1.0, %v1613_v47  ;;  %v1614_v14 = vmul.f32 %v4965_v11, %v1489_v13  ;;  %v1490_v59 = vmul.f32 %v4976_v57, %v1465_v27  ;;  %v6208_v13 = vld [vmem:[#allocation12_spill] sm:$0xff] }
 0x20b   : > { %v1711_v52 = vsel %vm1661_vm14, %v1686_v20, %v1636_v63  ;;  %v1687_v8 = vsub.f32 0.0, %v1637_v28  ;;  %v1416_v41 = vadd.f32 -0.28449672, %v1391_v26  ;;  %v1367_v61 = vadd.f32 1.4214138, %v1342_v2  ;;  %v6209_v20 = vld [vmem:[#allocation9_spill] sm:$0xff] }
 0x20c   : > { %v1760_v50 = vmul.f32 %v1735_v5, %v6205_v16  ;;  %v1736_v49 = vadd.f32 1.0, %v1711_v52  ;;  %v1688_v53 = vsub.f32 0.0, %v1638_v9  ;;  %v1639_v17 = vsub.f32 1.0, %v1614_v14 }
 0x20d   : > { %vm1665_vm4 = vcmp.lt.f32.partialorder %v6206_v62, 0.0  ;;  %v1712_v24 = vsel %vm1662_vm15, %v1687_v8, %v1637_v28  ;;  %v1615_v11 = vmul.f32 %v4997_v3, %v1490_v59  ;;  %v1441_v57 = vmul.f32 %v5005_v40, %v1416_v41  ;;  %v6210_v41 = vld [vmem:[#allocation11_spill] sm:$0xff] }
 0x20e   : > { %v1392_v48 = vmul.f32 %v5026_v51, %v1367_v61  ;;  %3540 = vmatmul.mubr.f32.gmra.mxu1 %v1760_v50  ;;  %v1761_v1 = vmul.f32 %v1736_v49, %v6207_v10  ;;  %v1737_v63 = vadd.f32 1.0, %v1712_v24  ;;  %v1713_v30 = vsel %vm1663_vm2, %v1688_v53, %v1638_v9  ;;  %v6211_v49 = vld [vmem:[#allocation16_spill] sm:$0xff] }
 0x20f   : > { %v1689_v34 = vsub.f32 0.0, %v1639_v17  ;;  %v1548_v44 = vmul.f32 %v1523_v58, %v5057_v15  ;;  %3542 = vmatprep.mubr.msk.f32.mxu1 %vm4041_vm0, %v6193_v36  ;;  %v1640_v3 = vsub.f32 1.0, %v1615_v11  ;;  %v1466_v7 = vadd.f32 0.2548296, %v1441_v57  ;;  %v6212_v11 = vld [vmem:[#allocation14_spill] sm:$0xff] }
 0x210   : > { %v1417_v47 = vadd.f32 -0.28449672, %v1392_v48  ;;  %vm1666_vm5 = vcmp.lt.f32.partialorder %v6208_v13, 0.0  ;;  %v1738_v27 = vadd.f32 1.0, %v1713_v30  ;;  %v1293_v38 = vmul.f32 1.0614054, %v5039_v12 }
 0x211   : > { %v1714_v26 = vsel %vm1664_vm3, %v1689_v34, %v1639_v17  ;;  %v1294_v45 = vmul.f32 1.0614054, %v5054_v56  ;;  %v1762_v28 = vmul.f32 %v1737_v63, %v6209_v20  ;;  %v1690_v15 = vsub.f32 0.0, %v1640_v3 }
 0x212   : > { %v1739_v2 = vadd.f32 1.0, %v1714_v26  ;;  %v1491_v58 = vmul.f32 %v5005_v40, %v1466_v7  ;;  %3543 = vmatmul.mubr.f32.gmra.mxu1 %v1761_v1  ;;  %v1442_v5 = vmul.f32 %v5026_v51, %v1417_v47  ;;  %v1318_v9 = vadd.f32 -1.4531521, %v1293_v38 }
 0x213   : > { %v1319_v14 = vadd.f32 -1.4531521, %v1294_v45  ;;  %v1295_v59 = vmul.f32 1.0614054, %v5096_v0  ;;  %3878 = vpow2.f32 %v5074_v33  ;;  %v1597_v37 = vmul.f32 1.442695, %v1548_v44  ;;  %3545 = vmatprep.mubr.msk.f32.mxu1 %vm4041_vm0, %v6193_v36 }
 0x214   : > { %v1616_v52 = vmul.f32 %v5013_v32, %v1491_v58  ;;  %v1296_v8 = vmul.f32 1.0614054, %v5104_v4  ;;  %v1763_v61 = vmul.f32 %v1738_v27, %v6210_v41  ;;  %v1467_v40 = vadd.f32 0.2548296, %v1442_v5 }
 0x215   : > { %v1343_v16 = vmul.f32 %v5039_v12, %v1318_v9  ;;  %v1344_v50 = vmul.f32 %v5054_v56, %v1319_v14  ;;  %v1764_v53 = vmul.f32 %v1739_v2, %v6211_v49  ;;  %v1320_v24 = vadd.f32 -1.4531521, %v1295_v59 }
 0x216   : > { %v1641_v17 = vsub.f32 1.0, %v1616_v52  ;;  %v1321_v33 = vadd.f32 -1.4531521, %v1296_v8  ;;  %vm1667_vm6 = vcmp.lt.f32.partialorder %v6212_v11, 0.0  ;;  %3546 = vmatmul.mubr.f32.gmra.mxu1 %v1762_v28  ;;  %v1715_v32 = vsel %vm1665_vm4, %v1690_v15, %v1640_v3 }
 0x217   : > { %v1492_v57 = vmul.f32 %v5026_v51, %v1467_v40  ;;  %v1368_v48 = vadd.f32 1.4214138, %v1343_v16  ;;  %v1369_v10 = vadd.f32 1.4214138, %v1344_v50  ;;  %3548 = vmatprep.mubr.msk.f32.mxu1 %vm4041_vm0, %v6193_v36  ;;  %v1345_v63 = vmul.f32 %v5096_v0, %v1320_v24 }
 0x218   : > { %v1691_v1 = vsub.f32 0.0, %v1641_v17  ;;  %v1346_v30 = vmul.f32 %v5104_v4, %v1321_v33  ;;  %v1297_v34 = vmul.f32 1.0614054, %v5113_v29  ;;  %v1298_v51 = vmul.f32 1.0614054, %v5128_v23 }
 0x219   : > { %v1617_v44 = vmul.f32 %v5031_v25, %v1492_v57  ;;  %v1393_v7 = vmul.f32 %v5039_v12, %v1368_v48  ;;  %v1394_v62 = vmul.f32 %v5054_v56, %v1369_v10  ;;  %v1370_v47 = vadd.f32 1.4214138, %v1345_v63 }
 0x21a   : > { %v1716_v3 = vsel %vm1666_vm5, %v1691_v1, %v1641_v17  ;;  %v1371_v27 = vadd.f32 1.4214138, %v1346_v30  ;;  %v1322_v26 = vadd.f32 -1.4531521, %v1297_v34  ;;  %3549 = vmatmul.mubr.f32.gmra.mxu1 %v1763_v61  ;;  %v1740_v38 = vadd.f32 1.0, %v1715_v32  ;;  %v6213_v34 = vld [vmem:[#allocation13_spill] sm:$0xff] }
 0x21b   : > { %v1642_v45 = vsub.f32 1.0, %v1617_v44  ;;  %v1418_v20 = vadd.f32 -0.28449672, %v1393_v7  ;;  %v1419_v28 = vadd.f32 -0.28449672, %v1394_v62  ;;  %3551 = vmatprep.mubr.msk.f32.mxu1 %vm4041_vm0, %v6193_v36  ;;  %v1395_v25 = vmul.f32 %v5096_v0, %v1370_v47 }
 0x21c   : > { %v1396_v2 = vmul.f32 %v5104_v4, %v1371_v27  ;;  %v1347_v15 = vmul.f32 %v5113_v29, %v1322_v26  ;;  %v1323_v58 = vadd.f32 -1.4531521, %v1298_v51  ;;  %v1741_v13 = vadd.f32 1.0, %v1716_v3  ;;  %v6214_v3 = vld [vmem:[#allocation18_spill] sm:$0xff] }
 0x21d   : > { %v1692_v5 = vsub.f32 0.0, %v1642_v45  ;;  %v1443_v9 = vmul.f32 %v5039_v12, %v1418_v20  ;;  %v1444_v14 = vmul.f32 %v5054_v56, %v1419_v28  ;;  %v1420_v59 = vadd.f32 -0.28449672, %v1395_v25 }
 0x21e   : > { %v1421_v52 = vadd.f32 -0.28449672, %v1396_v2  ;;  %v1372_v8 = vadd.f32 1.4214138, %v1347_v15  ;;  %v1348_v41 = vmul.f32 %v5128_v23, %v1323_v58  ;;  %3880 = vpow2.f32 %v1597_v37  ;;  %3552 = vmatmul.mubr.f32.gmra.mxu1 %v1764_v53 }
 0x21f   : > { %v1765_v61 = vmul.f32 %v1740_v38, %v5000_v6  ;;  %v1468_v40 = vadd.f32 0.2548296, %v1443_v9  ;;  %v1469_v16 = vadd.f32 0.2548296, %v1444_v14  ;;  %3554 = vmatprep.mubr.msk.f32.mxu1 %vm4041_vm0, %v6193_v36  ;;  %v1717_v50 = vsel %vm1667_vm6, %v1692_v5, %v1642_v45  ;;  %v6215_v38 = vld [vmem:[#allocation21_spill] sm:$0xff] }
 0x220   : > { %v1445_v49 = vmul.f32 %v5096_v0, %v1420_v59  ;;  %v1446_v17 = vmul.f32 %v5104_v4, %v1421_v52  ;;  %v1397_v24 = vmul.f32 %v5113_v29, %v1372_v8  ;;  %v3879_v33 = vpop.eup %3878  ;;  %v1373_v6 = vadd.f32 1.4214138, %v1348_v41  ;;  %v6217_v41 = vld [vmem:[#allocation19_spill] sm:$0xff] }
 0x221   : > { %v1493_v37 = vmul.f32 %v5039_v12, %v1468_v40  ;;  %v1494_v53 = vmul.f32 %v5054_v56, %v1469_v16  ;;  %v1766_v32 = vmul.f32 %v1741_v13, %v5066_v35  ;;  %v1742_v11 = vadd.f32 1.0, %v1717_v50 }
 0x222   : > { %v1470_v57 = vadd.f32 0.2548296, %v1445_v49  ;;  %v1471_v48 = vadd.f32 0.2548296, %v1446_v17  ;;  %v1422_v10 = vadd.f32 -0.28449672, %v1397_v24  ;;  %3555 = vmatmul.mubr.f32.gmra.mxu1 %v1765_v61  ;;  %v1398_v30 = vmul.f32 %v5128_v23, %v1373_v6 }
 0x223   : > { %v1618_v1 = vmul.f32 %v5043_v46, %v1493_v37  ;;  %v1619_v63 = vmul.f32 %v5078_v39, %v1494_v53  ;;  %3557 = vmatprep.mubr.msk.f32.mxu1 %vm4041_vm0, %v6193_v36  ;;  %v1117_v44 = vmul.f32 0.5, %v6213_v34  ;;  %vm1668_vm7 = vcmp.lt.f32.partialorder %v6214_v3, 0.0 }
 0x224   : > { %v1495_v12 = vmul.f32 %v5096_v0, %v1470_v57  ;;  %v1496_v56 = vmul.f32 %v5104_v4, %v1471_v48  ;;  %v1447_v35 = vmul.f32 %v5113_v29, %v1422_v10  ;;  %v1423_v51 = vadd.f32 -0.28449672, %v1398_v30 }
 0x225   : > { %v1643_v7 = vsub.f32 1.0, %v1618_v1  ;;  %v1644_v62 = vsub.f32 1.0, %v1619_v63  ;;  %v1767_v27 = vmul.f32 %v1742_v11, %v1117_v44  ;;  %vm1669_vm8 = vcmp.lt.f32.partialorder %v6215_v38, 0.0 }
 0x226   : > { %v1620_v46 = vmul.f32 %v5101_v22, %v1495_v12  ;;  %v1621_v39 = vmul.f32 %v5109_v54, %v1496_v56  ;;  %v1472_v47 = vadd.f32 0.2548296, %v1447_v35  ;;  %3558 = vmatmul.mubr.f32.gmra.mxu1 %v1766_v32  ;;  %v1448_v4 = vmul.f32 %v5128_v23, %v1423_v51  ;;  %v6216_v54 = vld [vmem:[#allocation15_spill] sm:$0xff] }
 0x227   : > { %v1693_v26 = vsub.f32 0.0, %v1643_v7  ;;  %v1694_v0 = vsub.f32 0.0, %v1644_v62  ;;  %3560 = vmatprep.mubr.msk.f32.mxu1 %vm4041_vm0, %v6193_v36  ;;  %v1118_v15 = vmul.f32 0.5, %v6216_v54  ;;  %vm1670_vm9 = vcmp.lt.f32.partialorder %v4973_v18, 0.0 }
 0x228   : > { %v1645_v45 = vsub.f32 1.0, %v1620_v46  ;;  %v1646_v20 = vsub.f32 1.0, %v1621_v39  ;;  %v1497_v28 = vmul.f32 %v5113_v29, %v1472_v47  ;;  %v1473_v2 = vadd.f32 0.2548296, %v1448_v4 }
 0x229   : > { %v1718_v25 = vsel %vm1668_vm7, %v1693_v26, %v1643_v7  ;;  %v1719_v22 = vsel %vm1669_vm8, %v1694_v0, %v1644_v62  ;;  %v1119_v61 = vmul.f32 0.5, %v6217_v41  ;;  %vm1671_vm10 = vcmp.lt.f32.partialorder %v4994_v60, 0.0 }
 0x22a   : > { %v1743_v58 = vadd.f32 1.0, %v1718_v25  ;;  %v1695_v13 = vsub.f32 0.0, %v1645_v45  ;;  %3561 = vmatmul.mubr.f32.gmra.mxu1 %v1767_v27  ;;  %v1744_v5 = vadd.f32 1.0, %v1719_v22  ;;  %v1622_v9 = vmul.f32 %v3879_v33, %v1497_v28 }
 0x22b   : > { %v1498_v14 = vmul.f32 %v5128_v23, %v1473_v2  ;;  %v3881_v59 = vpop.eup %3880  ;;  %3563 = vmatprep.mubr.msk.f32.mxu1 %vm4041_vm0, %v6193_v36  ;;  %v1696_v8 = vsub.f32 0.0, %v1646_v20  ;;  %v1120_v24 = vmul.f32 0.5, %v4960_v42  ;;  %vm1672_vm11 = vcmp.lt.f32.partialorder %v5023_v21, 0.0 }
 0x22c   : > { %v1768_v52 = vmul.f32 %v1743_v58, %v1118_v15  ;;  %v1720_v29 = vsel %vm1670_vm9, %v1695_v13, %v1645_v45  ;;  %v1647_v40 = vsub.f32 1.0, %v1622_v9  ;;  %v1769_v18 = vmul.f32 %v1744_v5, %v1119_v61 }
 0x22d   : > { %v1623_v16 = vmul.f32 %v3881_v59, %v1498_v14  ;;  %v1745_v50 = vadd.f32 1.0, %v1720_v29  ;;  %v1721_v23 = vsel %vm1671_vm10, %v1696_v8, %v1646_v20  ;;  %v1121_v6 = vmul.f32 0.5, %v4985_v43 }
 0x22e   : > { %3564 = vmatmul.mubr.f32.gmra.mxu1 %v1768_v52  ;;  %v1697_v49 = vsub.f32 0.0, %v1647_v40  ;;  %v1746_v37 = vadd.f32 1.0, %v1721_v23  ;;  %vm1673_vm12 = vcmp.lt.f32.partialorder %v5051_v55, 0.0  ;;  %v1122_v21 = vmul.f32 0.5, %v5011_v31  ;;  %v5268_v31 = vld [vmem:[%s6145_s6] ss:$0 sm:$0xff] }
 0x22f   : > { %3566 = vmatprep.mubr.msk.f32.mxu1 %vm4041_vm0, %v6193_v36  ;;  %v1648_v17 = vsub.f32 1.0, %v1623_v16  ;;  %v1770_v33 = vmul.f32 %v1745_v50, %v1120_v24  ;;  %v1123_v11 = vmul.f32 0.5, %v5036_v19 }
 0x230   : > { %v1722_v60 = vsel %vm1672_vm11, %v1697_v49, %v1647_v40  ;;  %v1771_v32 = vmul.f32 %v1746_v37, %v1121_v6 }
 0x231   : > { %v1698_v53 = vsub.f32 0.0, %v1648_v17  ;;  %v1747_v57 = vadd.f32 1.0, %v1722_v60 }
 0x232   : > { %3567 = vmatmul.mubr.f32.gmra.mxu1 %v1769_v18 }
 0x233   : > { %3569 = vmatprep.mubr.msk.f32.mxu1 %vm4041_vm0, %v6193_v36  ;;  %v1723_v42 = vsel %vm1673_vm12, %v1698_v53, %v1648_v17  ;;  %v1772_v48 = vmul.f32 %v1747_v57, %v1122_v21 }
 0x234   : > { %v1748_v10 = vadd.f32 1.0, %v1723_v42 }
 0x236   : > { %3570 = vmatmul.mubr.f32.gmra.mxu1 %v1770_v33  ;;  %v1773_v43 = vmul.f32 %v1748_v10, %v1123_v11 }
 0x237   : > { %3572 = vmatprep.mubr.msk.f32.mxu1 %vm4041_vm0, %v6193_v36 }
 0x23a   : > { %3573 = vmatmul.mubr.f32.gmra.mxu1 %v1771_v32 }
 0x23b   : > { %3575 = vmatprep.mubr.msk.f32.mxu1 %vm4041_vm0, %v6193_v36 }
 0x23e   : > { %3576 = vmatmul.mubr.f32.gmra.mxu1 %v1772_v48 }
 0x23f   : > { %3578 = vmatprep.mubr.msk.f32.mxu1 %vm4041_vm0, %v6193_v36 }
 0x242   : > { %3579 = vmatmul.mubr.f32.gmra.mxu1 %v1773_v43 }
 0x243   : > { %3648 = vmatprep.mubr.msk.f32.mxu1 %vm4041_vm0, %v6193_v36 }
 0x271   : > { %v1863_v55 = vpop.f32.mrf.mxu1 }
 0x272   : > { %v5271_v1 = vadd.f32 %v5268_v31, %v1863_v55 }
 0x273   : > { %v3508_v63 = vpop.f32.mrf.mxu1 }
 0x274   : > { %1989 = vadd.xlane.f32.xlu0 %v5271_v1  ;;  %v2065_v19 = vmul.f32 %v5271_v1, %v5271_v1 }
 0x275   : > { %v1868_v30 = vpop.f32.mrf.mxu1 }
 0x276   : > { %2090 = vadd.xlane.f32.xlu1 %v2065_v19  ;;  %v5277_v12 = vadd.f32 %v5268_v31, %v1868_v30 }
 0x277   : > { %v3511_v56 = vpop.f32.mrf.mxu1 }
 0x278   : > { %v2066_v35 = vmul.f32 %v5277_v12, %v5277_v12 }
 0x27a   : > { %1991 = vadd.xlane.f32.xlu1 %v5277_v12  ;;  %2092 = vadd.xlane.f32.xlu0 %v2066_v35 }
 0x28b   : > { %v1873_v34 = vpop.f32.mrf.mxu1 }
 0x28c   : > { %v5283_v44 = vadd.f32 %v5268_v31, %v1873_v34 }
 0x28d   : > { %v3514_v7 = vpop.f32.mrf.mxu1 }
 0x28e   : > { %1993 = vadd.xlane.f32.xlu0 %v5283_v44  ;;  %v2067_v62 = vmul.f32 %v5283_v44, %v5283_v44 }
 0x292   : > { %2094 = vadd.xlane.f32.xlu0 %v2067_v62 }
 0x295   : > { %v1878_v51 = vpop.f32.mrf.mxu1 }
 0x296   : > { %v5289_v3 = vadd.f32 %v5268_v31, %v1878_v51 }
 0x297   : > { %v3517_v46 = vpop.f32.mrf.mxu1 }
 0x298   : > { %1995 = vadd.xlane.f32.xlu1 %v5289_v3  ;;  %v2068_v39 = vmul.f32 %v5289_v3, %v5289_v3  ;;  %v2426_v46 = vld [vmem:[%s6149_s10 + $0x78] sm:$0xff] }
 0x299   : > { %3582 = vmatpush3.msra.mxu0 %v2426_v46  ;;  %v2510_v46 = vld [vmem:[%s6150_s11 + $0x68] sm:$0xff] }
 0x29a   : > { %2096 = vadd.xlane.f32.xlu0 %v2068_v39  ;;  %3583 = vmatprep.subr.mxu0 %v6193_v36 }
 0x29f   : > { %v1883_v47 = vpop.f32.mrf.mxu1 }
 0x2a0   : > { %v5295_v27 = vadd.f32 %v5268_v31, %v1883_v47 }
 0x2a1   : > { %v3520_v26 = vpop.f32.mrf.mxu1 }
 0x2a2   : > { %1997 = vadd.xlane.f32.xlu1 %v5295_v27  ;;  %v2069_v0 = vmul.f32 %v5295_v27, %v5295_v27 }
 0x2a4   : > { %2098 = vadd.xlane.f32.xlu0 %v2069_v0 }
 0x2a6   : > { %v1888_v4 = vpop.f32.mrf.mxu1 }
 0x2a7   : > { %v5301_v38 = vadd.f32 %v5268_v31, %v1888_v4 }
 0x2a8   : > { %v3523_v45 = vpop.f32.mrf.mxu1 }
 0x2a9   : > { %1999 = vadd.xlane.f32.xlu1 %v5301_v38  ;;  %v2070_v20 = vmul.f32 %v5301_v38, %v5301_v38 }
 0x2ab   : > { %v1893_v28 = vpop.f32.mrf.mxu1  ;;  %2100 = vadd.xlane.f32.xlu0 %v2070_v20 }
 0x2ac   : > { %v5307_v25 = vadd.f32 %v5268_v31, %v1893_v28 }
 0x2ad   : > { %v3526_v22 = vpop.f32.mrf.mxu1 }
 0x2ae   : > { %2001 = vadd.xlane.f32.xlu1 %v5307_v25  ;;  %v2071_v2 = vmul.f32 %v5307_v25, %v5307_v25 }
 0x2b0   : > { %2102 = vadd.xlane.f32.xlu0 %v2071_v2  ;;  %v1898_v54 = vpop.f32.mrf.mxu1 }
 0x2b1   : > { %v5313_v15 = vadd.f32 %v5268_v31, %v1898_v54 }
 0x2b2   : > { %v3529_v58 = vpop.f32.mrf.mxu1 }
 0x2b3   : > { %2003 = vadd.xlane.f32.xlu1 %v5313_v15  ;;  %v2072_v13 = vmul.f32 %v5313_v15, %v5313_v15 }
 0x2b5   : > { %2104 = vadd.xlane.f32.xlu0 %v2072_v13 }
 0x2b7   : > { %v1903_v5 = vpop.f32.mrf.mxu1 }
 0x2b8   : > { %v5319_v9 = vadd.f32 %v5268_v31, %v1903_v5 }
 0x2b9   : > { %v3532_v14 = vpop.f32.mrf.mxu1 }
 0x2ba   : > { %2005 = vadd.xlane.f32.xlu1 %v5319_v9  ;;  %v2073_v59 = vmul.f32 %v5319_v9, %v5319_v9  ;;  %v2425_v14 = vld [vmem:[%s6149_s10 + $0x70] sm:$0xff] }
 0x2bb   : > { %3584 = vmatpush3.msra.mxu0 %v2425_v14  ;;  %v2505_v14 = vld [vmem:[%s6150_s11 + $0x40] sm:$0xff] }
 0x2bc   : > { %2106 = vadd.xlane.f32.xlu0 %v2073_v59  ;;  %3585 = vmatprep.subr.mxu0 %v6193_v36 }
 0x2bf   : > { %v1908_v52 = vpop.f32.mrf.mxu1 }
 0x2c0   : > { %v5325_v29 = vadd.f32 %v5268_v31, %v1908_v52 }
 0x2c1   : > { %v3535_v8 = vpop.f32.mrf.mxu1 }
 0x2c2   : > { %2007 = vadd.xlane.f32.xlu1 %v5325_v29  ;;  %v2074_v41 = vmul.f32 %v5325_v29, %v5325_v29 }
 0x2c4   : > { %v1913_v61 = vpop.f32.mrf.mxu1  ;;  %2108 = vadd.xlane.f32.xlu0 %v2074_v41 }
 0x2c5   : > { %v5331_v40 = vadd.f32 %v5268_v31, %v1913_v61 }
 0x2c6   : > { %v3538_v16 = vpop.f32.mrf.mxu1 }
 0x2c7   : > { %2009 = vadd.xlane.f32.xlu1 %v5331_v40  ;;  %v2075_v18 = vmul.f32 %v5331_v40, %v5331_v40  ;;  %v2424_v16 = vld [vmem:[%s6149_s10 + $0x68] sm:$0xff] }
 0x2c8   : > { %3586 = vmatpush3.msra.mxu0 %v2424_v16  ;;  %v2414_v16 = vld [vmem:[%s6149_s10 + $0x18] sm:$0xff] }
 0x2c9   : > { %2110 = vadd.xlane.f32.xlu0 %v2075_v18  ;;  %3587 = vmatprep.subr.mxu0 %v6193_v36 }
 0x2ce   : > { %v1918_v50 = vpop.f32.mrf.mxu1 }
 0x2cf   : > { %v5337_v23 = vadd.f32 %v5268_v31, %v1918_v50 }
 0x2d0   : > { %v3541_v49 = vpop.f32.mrf.mxu1 }
 0x2d1   : > { %2011 = vadd.xlane.f32.xlu1 %v5337_v23  ;;  %v2076_v17 = vmul.f32 %v5337_v23, %v5337_v23 }
 0x2d2   : > { %v1923_v24 = vpop.f32.mrf.mxu1 }
 0x2d3   : > { %v5343_v33 = vadd.f32 %v5268_v31, %v1923_v24  ;;  %2112 = vadd.xlane.f32.xlu0 %v2076_v17 }
 0x2d4   : > { %v3544_v37 = vpop.f32.mrf.mxu1 }
 0x2d5   : > { %2013 = vadd.xlane.f32.xlu1 %v5343_v33  ;;  %v2077_v60 = vmul.f32 %v5343_v33, %v5343_v33 }
 0x2d6   : > { %v1928_v53 = vpop.f32.mrf.mxu1 }
 0x2d7   : > { %v5349_v6 = vadd.f32 %v5268_v31, %v1928_v53  ;;  %2114 = vadd.xlane.f32.xlu0 %v2077_v60 }
 0x2d8   : > { %v3547_v32 = vpop.f32.mrf.mxu1 }
 0x2d9   : > { %2015 = vadd.xlane.f32.xlu1 %v5349_v6  ;;  %v2078_v57 = vmul.f32 %v5349_v6, %v5349_v6  ;;  %v2423_v32 = vld [vmem:[%s6149_s10 + $0x60] sm:$0xff] }
 0x2da   : > { %v1933_v42 = vpop.f32.mrf.mxu1  ;;  %3588 = vmatpush3.msra.mxu0 %v2423_v32 }
 0x2db   : > { %v5355_v21 = vadd.f32 %v5268_v31, %v1933_v42  ;;  %2116 = vadd.xlane.f32.xlu0 %v2078_v57  ;;  %3589 = vmatprep.subr.mxu0 %v6193_v36 }
 0x2dc   : > { %v3550_v48 = vpop.f32.mrf.mxu1 }
 0x2dd   : > { %2017 = vadd.xlane.f32.xlu1 %v5355_v21  ;;  %v2079_v10 = vmul.f32 %v5355_v21, %v5355_v21 }
 0x2de   : > { %v1938_v11 = vpop.f32.mrf.mxu1 }
 0x2df   : > { %v5361_v43 = vadd.f32 %v5268_v31, %v1938_v11  ;;  %2118 = vadd.xlane.f32.xlu0 %v2079_v10  ;;  %v2421_v10 = vld [vmem:[%s6149_s10 + $0x50] sm:$0xff] }
 0x2e0   : > { %v3553_v55 = vpop.f32.mrf.mxu1 }
 0x2e1   : > { %2019 = vadd.xlane.f32.xlu1 %v5361_v43  ;;  %v2080_v63 = vmul.f32 %v5361_v43, %v5361_v43  ;;  %v2420_v55 = vld [vmem:[%s6149_s10 + $0x48] sm:$0xff] }
 0x2e2   : > { %v1943_v19 = vpop.f32.mrf.mxu1 }
 0x2e3   : > { %v5367_v30 = vadd.f32 %v5268_v31, %v1943_v19  ;;  %2120 = vadd.xlane.f32.xlu0 %v2080_v63  ;;  %v2419_v19 = vld [vmem:[%s6149_s10 + $0x40] sm:$0xff] }
 0x2e4   : > { %v3556_v56 = vpop.f32.mrf.mxu1 }
 0x2e5   : > { %2021 = vadd.xlane.f32.xlu1 %v5367_v30  ;;  %v2081_v35 = vmul.f32 %v5367_v30, %v5367_v30  ;;  %v2512_v56 = vld [vmem:[%s6150_s11 + $0x78] sm:$0xff] }
 0x2e6   : > { %v1948_v34 = vpop.f32.mrf.mxu1  ;;  %3617 = vmatpush3.msra.mxu1 %v2512_v56 }
 0x2e7   : > { %v5373_v7 = vadd.f32 %v5268_v31, %v1948_v34  ;;  %2122 = vadd.xlane.f32.xlu0 %v2081_v35  ;;  %3618 = vmatprep.subr.mxu1 %v6193_v36 }
 0x2e8   : > { %v3559_v62 = vpop.f32.mrf.mxu1 }
 0x2e9   : > { %2023 = vadd.xlane.f32.xlu1 %v5373_v7  ;;  %v2082_v51 = vmul.f32 %v5373_v7, %v5373_v7  ;;  %v2511_v62 = vld [vmem:[%s6150_s11 + $0x70] sm:$0xff] }
 0x2ea   : > { %v1953_v39 = vpop.f32.mrf.mxu1  ;;  %3619 = vmatpush3.msra.mxu1 %v2511_v62 }
 0x2eb   : > { %v5382_v47 = vadd.f32 %v5268_v31, %v1953_v39  ;;  %2124 = vadd.xlane.f32.xlu0 %v2082_v51  ;;  %v2418_v51 = vld [vmem:[%s6149_s10 + $0x38] sm:$0xff]  ;;  %3620 = vmatprep.subr.mxu1 %v6193_v36  ;;  %v2509_v39 = vld [vmem:[%s6150_s11 + $0x60] sm:$0xff] }
 0x2ec   : > { %v3562_v26 = vpop.f32.mrf.mxu1  ;;  %3621 = vmatpush3.msra.mxu1 %v2510_v46 }
 0x2ed   : > { %2025 = vadd.xlane.f32.xlu1 %v5382_v47  ;;  %v2083_v0 = vmul.f32 %v5382_v47, %v5382_v47  ;;  %3622 = vmatprep.subr.mxu1 %v6193_v36 }
 0x2ee   : > { %v1958_v4 = vpop.f32.mrf.mxu1  ;;  %3623 = vmatpush3.msra.mxu1 %v2509_v39 }
 0x2ef   : > { %v5389_v45 = vadd.f32 %v5268_v31, %v1958_v4  ;;  %2126 = vadd.xlane.f32.xlu0 %v2083_v0  ;;  %3624 = vmatprep.subr.mxu1 %v6193_v36  ;;  %v2508_v4 = vld [vmem:[%s6150_s11 + $0x58] sm:$0xff] }
 0x2f0   : > { %v3565_v20 = vpop.f32.mrf.mxu1  ;;  %3625 = vmatpush3.msra.mxu1 %v2508_v4 }
 0x2f1   : > { %2027 = vadd.xlane.f32.xlu1 %v5389_v45  ;;  %v2084_v28 = vmul.f32 %v5389_v45, %v5389_v45  ;;  %3626 = vmatprep.subr.mxu1 %v6193_v36  ;;  %v2507_v20 = vld [vmem:[%s6150_s11 + $0x50] sm:$0xff] }
 0x2f2   : > { %v1963_v22 = vpop.f32.mrf.mxu1  ;;  %3627 = vmatpush3.msra.mxu1 %v2507_v20 }
 0x2f3   : > { %v5395_v2 = vadd.f32 %v5268_v31, %v1963_v22  ;;  %2128 = vadd.xlane.f32.xlu0 %v2084_v28  ;;  %3628 = vmatprep.subr.mxu1 %v6193_v36  ;;  %v2506_v22 = vld [vmem:[%s6150_s11 + $0x48] sm:$0xff] }
 0x2f4   : > { %v3568_v54 = vpop.f32.mrf.mxu1  ;;  %3629 = vmatpush3.msra.mxu1 %v2506_v22 }
 0x2f5   : > { %2029 = vadd.xlane.f32.xlu1 %v5395_v2  ;;  %v2085_v58 = vmul.f32 %v5395_v2, %v5395_v2  ;;  %3630 = vmatprep.subr.mxu1 %v6193_v36 }
 0x2f6   : > { %v1968_v13 = vpop.f32.mrf.mxu1  ;;  %3631 = vmatpush3.msra.mxu1 %v2505_v14 }
 0x2f7   : > { %v5401_v5 = vadd.f32 %v5268_v31, %v1968_v13  ;;  %2130 = vadd.xlane.f32.xlu0 %v2085_v58  ;;  %v2417_v58 = vld [vmem:[%s6149_s10 + $0x30] sm:$0xff]  ;;  %v2416_v13 = vld [vmem:[%s6149_s10 + $0x28] sm:$0xff]  ;;  %3632 = vmatprep.subr.mxu1 %v6193_v36 }
 0x2f8   : > { %v3571_v59 = vpop.f32.mrf.mxu1 }
 0x2f9   : > { %2031 = vadd.xlane.f32.xlu1 %v5401_v5  ;;  %v2086_v52 = vmul.f32 %v5401_v5, %v5401_v5  ;;  %v2415_v59 = vld [vmem:[%s6149_s10 + $0x20] sm:$0xff] }
 0x2fa   : > { %v1973_v8 = vpop.f32.mrf.mxu1 }
 0x2fb   : > { %v5411_v41 = vadd.f32 %v5268_v31, %v1973_v8  ;;  %2132 = vadd.xlane.f32.xlu0 %v2086_v52  ;;  %v2504_v52 = vld [vmem:[%s6150_s11 + $0x38] sm:$0xff]  ;;  %v2503_v8 = vld [vmem:[%s6150_s11 + $0x30] sm:$0xff] }
 0x2fc   : > { %v3574_v61 = vpop.f32.mrf.mxu1  ;;  %3633 = vmatpush3.msra.mxu1 %v2504_v52 }
 0x2fd   : > { %2033 = vadd.xlane.f32.xlu1 %v5411_v41  ;;  %v2087_v18 = vmul.f32 %v5411_v41, %v5411_v41  ;;  %v5446_v11 = vpop.xlane.xlu0 %1989  ;;  %3634 = vmatprep.subr.mxu1 %v6193_v36 }
 0x2fe   : > { %v1978_v50 = vpop.f32.mrf.mxu1  ;;  %3635 = vmatpush3.msra.mxu1 %v2503_v8 }
 0x2ff   : > { %v5421_v49 = vadd.f32 %v5268_v31, %v1978_v50  ;;  %2134 = vadd.xlane.f32.xlu0 %v2087_v18  ;;  %v5461_v35 = vpop.xlane.xlu1 %2090  ;;  %v2502_v18 = vld [vmem:[%s6150_s11 + $0x28] sm:$0xff]  ;;  %3636 = vmatprep.subr.mxu1 %v6193_v36 }
 0x300   : > { %v3577_v17 = vpop.f32.mrf.mxu1  ;;  %3637 = vmatpush3.msra.mxu1 %v2502_v18  ;;  %v2141_v20 = vmul.f32 0.0078125, %v5461_v35 }
 0x301   : > { %2035 = vadd.xlane.f32.xlu1 %v5421_v49  ;;  %v2088_v24 = vmul.f32 %v5421_v49, %v5421_v49  ;;  %v2413_v17 = vld [vmem:[%s6149_s10 + $0x10] sm:$0xff]  ;;  %3638 = vmatprep.subr.mxu1 %v6193_v36 }
 0x302   : > { %v1983_v37 = vpop.f32.mrf.mxu1 }
 0x303   : > { %v5427_v60 = vadd.f32 %v5268_v31, %v1983_v37  ;;  %2136 = vadd.xlane.f32.xlu0 %v2088_v24  ;;  %v2422_v31 = vld [vmem:[%s6149_s10 + $0x58] sm:$0xff]  ;;  %v5452_v63 = vpop.xlane.xlu0 %2092  ;;  %v5481_v26 = vpop.xlane.xlu1 %1991  ;;  %v2501_v24 = vld [vmem:[%s6150_s11 + $0x20] sm:$0xff]  ;;  %v2412_v37 = vld [vmem:[%s6149_s10 + $0x8] sm:$0xff] }
 0x304   : > { %v3580_v53 = vpop.f32.mrf.mxu1  ;;  %3590 = vmatpush3.msra.mxu0 %v2422_v31  ;;  %3639 = vmatpush3.msra.mxu1 %v2501_v24  ;;  %v5574_v46 = vmul.f32 0.0078125, %v5481_v26  ;;  %v2142_v14 = vmul.f32 0.0078125, %v5452_v63 }
 0x305   : > { %v2037_v57 = vsel %vm543_vm1, %v5427_v60, 0.0  ;;  %v2089_v42 = vmul.f32 %v5427_v60, %v5427_v60  ;;  %3591 = vmatprep.subr.mxu0 %v6193_v36  ;;  %v2500_v53 = vld [vmem:[%s6150_s11 + $0x18] sm:$0xff]  ;;  %3640 = vmatprep.subr.mxu1 %v6193_v36 }
 0x306   : > { %2038 = vadd.xlane.f32.xlu1 %v2037_v57  ;;  %3592 = vmatpush3.msra.mxu0 %v2421_v10  ;;  %v2411_v57 = vld [vmem:[%s6149_s10] sm:$0xff]  ;;  %v2167_v22 = vmul.f32 %v5574_v46, %v5574_v46 }
 0x307   : > { %v2138_v48 = vsel %vm543_vm1, %v2089_v42, 0.0  ;;  %3593 = vmatprep.subr.mxu0 %v6193_v36  ;;  %v2499_v42 = vld [vmem:[%s6150_s11 + $0x10] sm:$0xff]  ;;  %3641 = vmatpush3.msra.mxu1 %v2500_v53  ;;  %v2497_v10 = vld [vmem:[%s6150_s11] sm:$0xff] }
 0x308   : > { %3594 = vmatpush3.msra.mxu0 %v2420_v55  ;;  %3642 = vmatprep.subr.mxu1 %v6193_v36  ;;  %v2192_v26 = vsub.f32 %v2142_v14, %v2167_v22 }
 0x309   : > { %3595 = vmatprep.subr.mxu0 %v6193_v36  ;;  %3643 = vmatpush3.msra.mxu1 %v2499_v42 }
 0x30a   : > { %2139 = vadd.xlane.f32.xlu1 %v2138_v48  ;;  %3596 = vmatpush3.msra.mxu0 %v2419_v19  ;;  %v2498_v48 = vld [vmem:[%s6150_s11 + $0x8] sm:$0xff]  ;;  %v2242_v24 = vadd.f32 1e-05, %v2192_v26 }
 0x30b   : > { %3597 = vmatprep.subr.mxu0 %v6193_v36  ;;  %3644 = vmatprep.subr.mxu1 %v6193_v36 }
 0x30c   : > { %3598 = vmatpush3.msra.mxu0 %v2418_v51  ;;  %3645 = vmatpush3.msra.mxu1 %v2498_v48  ;;  %v5571_v51 = vmul.f32 0.0078125, %v5446_v11 }
 0x30d   : > { %3599 = vmatprep.subr.mxu0 %v6193_v36  ;;  %3646 = vmatprep.subr.mxu1 %v6193_v36 }
 0x30e   : > { %3600 = vmatpush3.msra.mxu0 %v2417_v58  ;;  %3647 = vmatpush3.msra.mxu1 %v2497_v10  ;;  %v2166_v4 = vmul.f32 %v5571_v51, %v5571_v51 }
 0x30f   : > { %3601 = vmatprep.subr.mxu0 %v6193_v36  ;;  %3686 = vmatprep.subr.mxu1 %v6193_v36 }
 0x310   : > { %3602 = vmatpush3.msra.mxu0 %v2416_v13 }
 0x311   : > { %3603 = vmatprep.subr.mxu0 %v6193_v36 }
 0x312   : > { %3604 = vmatpush3.msra.mxu0 %v2415_v59  ;;  %v2191_v59 = vsub.f32 %v2141_v20, %v2166_v4 }
 0x313   : > { %3605 = vmatprep.subr.mxu0 %v6193_v36 }
 0x314   : > { %3606 = vmatpush3.msra.mxu0 %v2414_v16  ;;  %v2241_v35 = vadd.f32 1e-05, %v2191_v59 }
 0x315   : > { %3607 = vmatprep.subr.mxu0 %v6193_v36 }
 0x316   : > { %3608 = vmatpush3.msra.mxu0 %v2413_v17  ;;  %3882 = vrsqrt.f32 %v2241_v35 }
 0x317   : > { %v5463_v34 = vpop.xlane.xlu0 %1993  ;;  %3609 = vmatprep.subr.mxu0 %v6193_v36  ;;  %3884 = vrsqrt.f32 %v2242_v24 }
 0x318   : > { %3610 = vmatpush3.msra.mxu0 %v2412_v37  ;;  %v5582_v58 = vmul.f32 0.0078125, %v5463_v34 }
 0x319   : > { %3611 = vmatprep.subr.mxu0 %v6193_v36 }
 0x31a   : > { %3612 = vmatpush3.msra.mxu0 %v2411_v57  ;;  %v2168_v52 = vmul.f32 %v5582_v58, %v5582_v58 }
 0x31b   : > { %v5483_v0 = vpop.xlane.xlu0 %2094  ;;  %3651 = vmatprep.subr.mxu0 %v6193_v36 }
 0x31c   : > { %v2143_v11 = vmul.f32 0.0078125, %v5483_v0 }
 0x31e   : > { %v2193_v16 = vsub.f32 %v2143_v11, %v2168_v52 }
 0x320   : > { %v2243_v37 = vadd.f32 1e-05, %v2193_v16 }
 0x321   : > { %v5493_v28 = vpop.xlane.xlu1 %1995 }
 0x322   : > { %v5589_v17 = vmul.f32 0.0078125, %v5493_v28  ;;  %3886 = vrsqrt.f32 %v2243_v37 }
 0x323   : > { %v5499_v54 = vpop.xlane.xlu0 %2096 }
 0x324   : > { %v2144_v34 = vmul.f32 0.0078125, %v5499_v54  ;;  %v2169_v63 = vmul.f32 %v5589_v17, %v5589_v17 }
 0x326   : > { %v2194_v42 = vsub.f32 %v2144_v34, %v2169_v63 }
 0x328   : > { %v2244_v20 = vadd.f32 1e-05, %v2194_v42 }
 0x32a   : > { %3888 = vrsqrt.f32 %v2244_v20 }
 0x32b   : > { %v5522_v61 = vpop.xlane.xlu1 %1997 }
 0x32c   : > { %v5595_v0 = vmul.f32 0.0078125, %v5522_v61 }
 0x32d   : > { %v5532_v50 = vpop.xlane.xlu0 %2098 }
 0x32e   : > { %v2145_v28 = vmul.f32 0.0078125, %v5532_v50  ;;  %v2170_v54 = vmul.f32 %v5595_v0, %v5595_v0 }
 0x330   : > { %v2195_v14 = vsub.f32 %v2145_v28, %v2170_v54  ;;  %v2216_v54 = vsub.f32 %v5271_v1, %v5571_v51 }
 0x332   : > { %v2000_v32 = vpop.xlane.xlu1 %1999  ;;  %v2245_v50 = vadd.f32 1e-05, %v2195_v14 }
 0x333   : > { %v5597_v48 = vmul.f32 0.0078125, %v2000_v32 }
 0x334   : > { %v2101_v31 = vpop.xlane.xlu0 %2100  ;;  %3890 = vrsqrt.f32 %v2245_v50 }
 0x335   : > { %v2146_v10 = vmul.f32 0.0078125, %v2101_v31  ;;  %v2171_v22 = vmul.f32 %v5597_v48, %v5597_v48 }
 0x337   : > { %v2002_v55 = vpop.xlane.xlu1 %2001  ;;  %v2196_v59 = vsub.f32 %v2146_v10, %v2171_v22 }
 0x338   : > { %v5604_v61 = vmul.f32 0.0078125, %v2002_v55  ;;  %v3883_v55 = vpop.eup %3882 }
 0x339   : > { %v2103_v19 = vpop.xlane.xlu0 %2102  ;;  %v2246_v24 = vadd.f32 1e-05, %v2196_v59 }
 0x33a   : > { %v2147_v32 = vmul.f32 0.0078125, %v2103_v19  ;;  %v2172_v16 = vmul.f32 %v5604_v61, %v5604_v61 }
 0x33b   : > { %3892 = vrsqrt.f32 %v2246_v24 }
 0x33c   : > { %v2004_v56 = vpop.xlane.xlu1 %2003  ;;  %v2197_v37 = vsub.f32 %v2147_v32, %v2172_v16  ;;  %v2291_v32 = vmul.f32 %v3883_v55, %v2216_v54  ;;  %v5644_v54 = vld [vmem:[%s6147_s8] ss:$0 sm:$0xff] }
 0x33d   : > { %v5606_v26 = vmul.f32 0.0078125, %v2004_v56  ;;  %v3885_v56 = vpop.eup %3884 }
 0x33e   : > { %v2105_v62 = vpop.xlane.xlu0 %2104  ;;  %v3887_v22 = vpop.eup %3886  ;;  %v2247_v14 = vadd.f32 1e-05, %v2197_v37 }
 0x33f   : > { %v2148_v31 = vmul.f32 0.0078125, %v2105_v62  ;;  %v2173_v34 = vmul.f32 %v5606_v26, %v5606_v26  ;;  %v2217_v62 = vsub.f32 %v5277_v12, %v5574_v46  ;;  %v5629_v12 = vld [vmem:[%s6146_s7] ss:$0 sm:$0xff] }
 0x340   : > { %3894 = vrsqrt.f32 %v2247_v14  ;;  %v2322_v37 = vmul.f32 %v5629_v12, %v2291_v32 }
 0x341   : > { %v2198_v19 = vsub.f32 %v2148_v31, %v2173_v34  ;;  %v2292_v16 = vmul.f32 %v3885_v56, %v2217_v62 }
 0x343   : > { %v2006_v39 = vpop.xlane.xlu1 %2005  ;;  %v2248_v51 = vadd.f32 1e-05, %v2198_v19  ;;  %v2323_v56 = vmul.f32 %v5629_v12, %v2292_v16 }
 0x344   : > { %v5612_v63 = vmul.f32 0.0078125, %v2006_v39 }
 0x345   : > { %v2107_v13 = vpop.xlane.xlu0 %2106  ;;  %3896 = vrsqrt.f32 %v2248_v51  ;;  %v5654_v51 = vadd.f32 %v5644_v54, %v2322_v37 }
 0x346   : > { %v2149_v10 = vmul.f32 0.0078125, %v2107_v13  ;;  %v2174_v50 = vmul.f32 %v5612_v63, %v5612_v63 }
 0x348   : > { %v2199_v31 = vsub.f32 %v2149_v10, %v2174_v50 }
 0x34a   : > { %v2249_v62 = vadd.f32 1e-05, %v2199_v31 }
 0x34b   : > { %v2008_v8 = vpop.xlane.xlu1 %2007 }
 0x34c   : > { %v5614_v28 = vmul.f32 0.0078125, %v2008_v8  ;;  %v2218_v8 = vsub.f32 %v5283_v44, %v5582_v58  ;;  %3898 = vrsqrt.f32 %v2249_v62 }
 0x34d   : > { %v2109_v18 = vpop.xlane.xlu0 %2108 }
 0x34e   : > { %v2150_v39 = vmul.f32 0.0078125, %v2109_v18  ;;  %v2175_v46 = vmul.f32 %v5614_v28, %v5614_v28 }
 0x350   : > { %v2010_v53 = vpop.xlane.xlu1 %2009  ;;  %v2200_v58 = vsub.f32 %v2150_v39, %v2175_v46  ;;  %v5657_v46 = vadd.f32 %v5644_v54, %v2323_v56 }
 0x351   : > { %v5620_v59 = vmul.f32 0.0078125, %v2010_v53  ;;  %v2293_v53 = vmul.f32 %v3887_v22, %v2218_v8  ;;  %v2219_v22 = vsub.f32 %v5289_v3, %v5589_v17 }
 0x352   : > { %v2111_v57 = vpop.xlane.xlu0 %2110  ;;  %v2250_v39 = vadd.f32 1e-05, %v2200_v58 }
 0x353   : > { %v2151_v18 = vmul.f32 0.0078125, %v2111_v57  ;;  %v2176_v44 = vmul.f32 %v5620_v59, %v5620_v59  ;;  %v3889_v57 = vpop.eup %3888  ;;  %v2324_v14 = vmul.f32 %v5629_v12, %v2293_v53 }
 0x354   : > { %v3891_v31 = vpop.eup %3890  ;;  %3900 = vrsqrt.f32 %v2250_v39 }
 0x355   : > { %v2201_v19 = vsub.f32 %v2151_v18, %v2176_v44  ;;  %v2220_v44 = vsub.f32 %v5295_v27, %v5595_v0 }
 0x357   : > { %v2251_v18 = vadd.f32 1e-05, %v2201_v19  ;;  %v2295_v62 = vmul.f32 %v3891_v31, %v2220_v44 }
 0x359   : > { %3902 = vrsqrt.f32 %v2251_v18  ;;  %v2326_v44 = vmul.f32 %v5629_v12, %v2295_v62 }
 0x35a   : > { %v2012_v4 = vpop.xlane.xlu1 %2011 }
 0x35b   : > { %v5633_v13 = vmul.f32 0.0078125, %v2012_v4 }
 0x35c   : > { %v2113_v11 = vpop.xlane.xlu0 %2112 }
 0x35d   : > { %v2152_v34 = vmul.f32 0.0078125, %v2113_v11  ;;  %v2177_v4 = vmul.f32 %v5633_v13, %v5633_v13 }
 0x35e   : > { %v2014_v52 = vpop.xlane.xlu1 %2013 }
 0x35f   : > { %v5646_v10 = vmul.f32 0.0078125, %v2014_v52  ;;  %v2202_v32 = vsub.f32 %v2152_v34, %v2177_v4  ;;  %v2294_v52 = vmul.f32 %v3889_v57, %v2219_v22  ;;  %v3893_v34 = vpop.eup %3892  ;;  %v2221_v57 = vsub.f32 %v5301_v38, %v5597_v48 }
 0x360   : > { %v2115_v35 = vpop.xlane.xlu0 %2114 }
 0x361   : > { %v2153_v8 = vmul.f32 0.0078125, %v2115_v35  ;;  %v2178_v3 = vmul.f32 %v5646_v10, %v5646_v10  ;;  %v5664_v35 = vadd.f32 %v5644_v54, %v2324_v14  ;;  %v2252_v58 = vadd.f32 1e-05, %v2202_v32  ;;  %v3895_v32 = vpop.eup %3894 }
 0x362   : > { %v2016_v42 = vpop.xlane.xlu1 %2015 }
 0x363   : > { %v5651_v16 = vmul.f32 0.0078125, %v2016_v42  ;;  %v2203_v56 = vsub.f32 %v2153_v8, %v2178_v3  ;;  %3904 = vrsqrt.f32 %v2252_v58 }
 0x364   : > { %v2117_v20 = vpop.xlane.xlu0 %2116 }
 0x365   : > { %v2154_v53 = vmul.f32 0.0078125, %v2117_v20  ;;  %v2179_v37 = vmul.f32 %v5651_v16, %v5651_v16  ;;  %v2325_v20 = vmul.f32 %v5629_v12, %v2294_v52  ;;  %v2253_v8 = vadd.f32 1e-05, %v2203_v56 }
 0x366   : > { %v2018_v1 = vpop.xlane.xlu1 %2017  ;;  %v2223_v56 = vsub.f32 %v5313_v15, %v5606_v26  ;;  %v5705_v15 = vadd.f32 %v5644_v54, %v2326_v44 }
 0x367   : > { %v5661_v17 = vmul.f32 0.0078125, %v2018_v1  ;;  %v2204_v0 = vsub.f32 %v2154_v53, %v2179_v37  ;;  %v3897_v53 = vpop.eup %3896  ;;  %3906 = vrsqrt.f32 %v2253_v8 }
 0x368   : > { %v2119_v24 = vpop.xlane.xlu0 %2118  ;;  %v2298_v62 = vmul.f32 %v3897_v53, %v2223_v56 }
 0x369   : > { %v2155_v19 = vmul.f32 0.0078125, %v2119_v24  ;;  %v2180_v27 = vmul.f32 %v5661_v17, %v5661_v17  ;;  %v2296_v24 = vmul.f32 %v3893_v34, %v2221_v57  ;;  %v2254_v58 = vadd.f32 1e-05, %v2204_v0 }
 0x36a   : > { %v2020_v55 = vpop.xlane.xlu1 %2019 }
 0x36b   : > { %v5670_v4 = vmul.f32 0.0078125, %v2020_v55  ;;  %v2378_v55 = vadd.f32 %v5657_v46, %v5654_v51  ;;  %v2205_v48 = vsub.f32 %v2155_v19, %v2180_v27  ;;  %3908 = vrsqrt.f32 %v2254_v58 }
 0x36c   : > { %v2121_v11 = vpop.xlane.xlu0 %2120  ;;  %v2329_v58 = vmul.f32 %v5629_v12, %v2298_v62 }
 0x36d   : > { %v2156_v14 = vmul.f32 0.0078125, %v2121_v11  ;;  %v2181_v38 = vmul.f32 %v5670_v4, %v5670_v4  ;;  %v2379_v31 = vadd.f32 %v2378_v55, %v5664_v35  ;;  %v2222_v11 = vsub.f32 %v5307_v25, %v5604_v61 }
 0x36e   : > { %v2022_v50 = vpop.xlane.xlu1 %2021  ;;  %v2327_v25 = vmul.f32 %v5629_v12, %v2296_v24  ;;  %v2255_v61 = vadd.f32 1e-05, %v2205_v48  ;;  %v3899_v24 = vpop.eup %3898 }
 0x36f   : > { %v5677_v22 = vmul.f32 0.0078125, %v2022_v50  ;;  %v5685_v50 = vadd.f32 %v5644_v54, %v2325_v20  ;;  %v2206_v37 = vsub.f32 %v2156_v14, %v2181_v38  ;;  %v2297_v19 = vmul.f32 %v3895_v32, %v2222_v11 }
 0x370   : > { %v2123_v42 = vpop.xlane.xlu0 %2122  ;;  %v5711_v11 = vadd.f32 %v5644_v54, %v2327_v25  ;;  %3910 = vrsqrt.f32 %v2255_v61  ;;  %v2226_v61 = vsub.f32 %v5331_v40, %v5620_v59  ;;  %v2227_v59 = vsub.f32 %v5337_v23, %v5633_v13 }
 0x371   : > { %v2157_v52 = vmul.f32 0.0078125, %v2123_v42  ;;  %v2182_v34 = vmul.f32 %v5677_v22, %v5677_v22  ;;  %v2380_v38 = vadd.f32 %v2379_v31, %v5685_v50  ;;  %v2256_v26 = vadd.f32 1e-05, %v2206_v37 }
 0x372   : > { %v2024_v1 = vpop.xlane.xlu1 %2023  ;;  %v2328_v32 = vmul.f32 %v5629_v12, %v2297_v19  ;;  %v2224_v31 = vsub.f32 %v5319_v9, %v5612_v63 }
 0x373   : > { %v5689_v3 = vmul.f32 0.0078125, %v2024_v1  ;;  %v2207_v1 = vsub.f32 %v2157_v52, %v2182_v34  ;;  %v2381_v19 = vadd.f32 %v2380_v38, %v5705_v15  ;;  %3912 = vrsqrt.f32 %v2256_v26 }
 0x374   : > { %v2125_v39 = vpop.xlane.xlu0 %2124  ;;  %v2299_v25 = vmul.f32 %v3899_v24, %v2224_v31  ;;  %v5724_v63 = vadd.f32 %v5644_v54, %v2328_v32 }
 0x375   : > { %v2158_v57 = vmul.f32 0.0078125, %v2125_v39  ;;  %v2183_v0 = vmul.f32 %v5689_v3, %v5689_v3  ;;  %v2257_v53 = vadd.f32 1e-05, %v2207_v1 }
 0x376   : > { %v2026_v18 = vpop.xlane.xlu1 %2025  ;;  %v2330_v40 = vmul.f32 %v5629_v12, %v2299_v25 }
 0x377   : > { %v5696_v20 = vmul.f32 0.0078125, %v2026_v18  ;;  %v2208_v48 = vsub.f32 %v2158_v57, %v2183_v0  ;;  %v3901_v18 = vpop.eup %3900  ;;  %v2225_v57 = vsub.f32 %v5325_v29, %v5614_v28  ;;  %3914 = vrsqrt.f32 %v2257_v53 }
 0x378   : > { %v2127_v42 = vpop.xlane.xlu0 %2126  ;;  %v3903_v56 = vpop.eup %3902  ;;  %v2382_v29 = vadd.f32 %v2381_v19, %v5711_v11  ;;  %v5732_v28 = vadd.f32 %v5644_v54, %v2329_v58  ;;  %v5746_v13 = vadd.f32 %v5644_v54, %v2330_v40 }
 0x379   : > { %v2159_v14 = vmul.f32 0.0078125, %v2127_v42  ;;  %v2184_v8 = vmul.f32 %v5696_v20, %v5696_v20  ;;  %v2258_v1 = vadd.f32 1e-05, %v2208_v48  ;;  %v3905_v62 = vpop.eup %3904  ;;  %v2300_v0 = vmul.f32 %v3901_v18, %v2225_v57 }
 0x37a   : > { %v2028_v27 = vpop.xlane.xlu1 %2027  ;;  %v2301_v32 = vmul.f32 %v3903_v56, %v2226_v61  ;;  %v2383_v53 = vadd.f32 %v2382_v29, %v5724_v63  ;;  %v2302_v58 = vmul.f32 %v3905_v62, %v2227_v59  ;;  %v2228_v56 = vsub.f32 %v5343_v33, %v5646_v10 }
 0x37b   : > { %v5701_v55 = vmul.f32 0.0078125, %v2028_v27  ;;  %v2209_v37 = vsub.f32 %v2159_v14, %v2184_v8  ;;  %3916 = vrsqrt.f32 %v2258_v1  ;;  %v2229_v62 = vsub.f32 %v5349_v6, %v5651_v16 }
 0x37c   : > { %v2129_v39 = vpop.xlane.xlu0 %2128  ;;  %v2384_v61 = vadd.f32 %v2383_v53, %v5732_v28  ;;  %v2332_v1 = vmul.f32 %v5629_v12, %v2301_v32  ;;  %v2333_v10 = vmul.f32 %v5629_v12, %v2302_v58  ;;  %v2230_v6 = vsub.f32 %v5355_v21, %v5661_v17 }
 0x37d   : > { %v2160_v52 = vmul.f32 0.0078125, %v2129_v39  ;;  %v2185_v34 = vmul.f32 %v5701_v55, %v5701_v55  ;;  %v2259_v26 = vadd.f32 1e-05, %v2209_v37  ;;  %v3907_v37 = vpop.eup %3906  ;;  %v2231_v53 = vsub.f32 %v5361_v43, %v5670_v4 }
 0x37e   : > { %v2030_v44 = vpop.xlane.xlu1 %2029  ;;  %v2385_v40 = vadd.f32 %v2384_v61, %v5746_v13 }
 0x37f   : > { %v5718_v42 = vmul.f32 0.0078125, %v2030_v44  ;;  %v2210_v27 = vsub.f32 %v2160_v52, %v2185_v34  ;;  %v2331_v44 = vmul.f32 %v5629_v12, %v2300_v0  ;;  %3918 = vrsqrt.f32 %v2259_v26 }
 0x380   : > { %v2131_v9 = vpop.xlane.xlu0 %2130  ;;  %v2303_v0 = vmul.f32 %v3907_v37, %v2228_v56  ;;  %v2232_v37 = vsub.f32 %v5367_v30, %v5677_v22  ;;  %v2233_v22 = vsub.f32 %v5373_v7, %v5689_v3 }
 0x381   : > { %v2186_v14 = vmul.f32 %v5718_v42, %v5718_v42  ;;  %v2161_v39 = vmul.f32 0.0078125, %v2131_v9  ;;  %v2260_v52 = vadd.f32 1e-05, %v2210_v27  ;;  %v3909_v9 = vpop.eup %3908  ;;  %v5757_v33 = vadd.f32 %v5644_v54, %v2331_v44 }
 0x382   : > { %v2032_v38 = vpop.xlane.xlu1 %2031  ;;  %v3911_v29 = vpop.eup %3910  ;;  %v2304_v16 = vmul.f32 %v3909_v9, %v2229_v62 }
 0x383   : > { %v5734_v24 = vmul.f32 0.0078125, %v2032_v38  ;;  %v2211_v8 = vsub.f32 %v2161_v39, %v2186_v14  ;;  %3920 = vrsqrt.f32 %v2260_v52  ;;  %v2305_v44 = vmul.f32 %v3911_v29, %v2230_v6 }
 0x384   : > { %v2133_v48 = vpop.xlane.xlu0 %2132  ;;  %v2386_v17 = vadd.f32 %v2385_v40, %v5757_v33  ;;  %v2335_v56 = vmul.f32 %v5629_v12, %v2304_v16  ;;  %v2234_v40 = vsub.f32 %v5382_v47, %v5696_v20 }
 0x385   : > { %v2187_v18 = vmul.f32 %v5734_v24, %v5734_v24  ;;  %v2162_v31 = vmul.f32 0.0078125, %v2133_v48  ;;  %v2261_v19 = vadd.f32 1e-05, %v2211_v8  ;;  %v3913_v8 = vpop.eup %3912  ;;  %v5766_v48 = vadd.f32 %v5644_v54, %v2332_v1 }
 0x386   : > { %v2034_v34 = vpop.xlane.xlu1 %2033  ;;  %v3915_v21 = vpop.eup %3914 }
 0x387   : > { %v5743_v57 = vmul.f32 0.0078125, %v2034_v34  ;;  %v2212_v23 = vsub.f32 %v2162_v31, %v2187_v18  ;;  %3922 = vrsqrt.f32 %v2261_v19  ;;  %v2334_v31 = vmul.f32 %v5629_v12, %v2303_v0 }
 0x388   : > { %v2135_v25 = vpop.xlane.xlu0 %2134  ;;  %v5775_v34 = vadd.f32 %v5644_v54, %v2333_v10  ;;  %v2387_v43 = vadd.f32 %v2386_v17, %v5766_v48  ;;  %v3917_v61 = vpop.eup %3916  ;;  %v2307_v62 = vmul.f32 %v3915_v21, %v2232_v37 }
 0x389   : > { %v2262_v27 = vadd.f32 1e-05, %v2212_v23  ;;  %v2188_v14 = vmul.f32 %v5743_v57, %v5743_v57  ;;  %v2163_v39 = vmul.f32 0.0078125, %v2135_v25  ;;  %v2306_v25 = vmul.f32 %v3913_v8, %v2231_v53 }
 0x38a   : > { %v2036_v38 = vpop.xlane.xlu1 %2035  ;;  %v5784_v1 = vadd.f32 %v5644_v54, %v2334_v31  ;;  %v2388_v30 = vadd.f32 %v2387_v43, %v5775_v34  ;;  %v2308_v6 = vmul.f32 %v3917_v61, %v2233_v22  ;;  %v2338_v3 = vmul.f32 %v5629_v12, %v2307_v62 }
 0x38b   : > { %v5760_v26 = vmul.f32 0.0078125, %v2036_v38  ;;  %v2213_v59 = vsub.f32 %v2163_v39, %v2188_v14  ;;  %3924 = vrsqrt.f32 %v2262_v27  ;;  %v2336_v27 = vmul.f32 %v5629_v12, %v2305_v44 }
 0x38c   : > { %v2137_v32 = vpop.xlane.xlu0 %2136  ;;  %v3919_v14 = vpop.eup %3918  ;;  %v5791_v38 = vadd.f32 %v5644_v54, %v2335_v56  ;;  %v2337_v39 = vmul.f32 %v5629_v12, %v2306_v25  ;;  %v2235_v8 = vsub.f32 %v5389_v45, %v5701_v55  ;;  %v2339_v20 = vmul.f32 %v5629_v12, %v2308_v6 }
 0x38d   : > { %v2189_v52 = vmul.f32 %v5760_v26, %v5760_v26  ;;  %v2164_v18 = vmul.f32 0.0078125, %v2137_v32  ;;  %v2263_v58 = vadd.f32 1e-05, %v2213_v59  ;;  %v2389_v59 = vadd.f32 %v2388_v30, %v5784_v1 }
 0x38e   : > { %v5800_v7 = vadd.f32 %v5644_v54, %v2336_v27  ;;  %v5807_v53 = vadd.f32 %v5644_v54, %v2337_v39  ;;  %v2236_v44 = vsub.f32 %v5395_v2, %v5718_v42  ;;  %v5814_v37 = vadd.f32 %v5644_v54, %v2338_v3 }
 0x38f   : > { %v2039_v19 = vpop.xlane.xlu1 %2038  ;;  %v2214_v23 = vsub.f32 %v2164_v18, %v2189_v52  ;;  %3926 = vrsqrt.f32 %v2263_v58  ;;  %v2309_v52 = vmul.f32 %v3919_v14, %v2234_v40  ;;  %v2390_v31 = vadd.f32 %v2389_v59, %v5791_v38 }
 0x390   : > { %v5780_v9 = vmul.f32 0.0078125, %v2039_v19  ;;  %v3921_v16 = vpop.eup %3920  ;;  %v2237_v55 = vsub.f32 %v5401_v5, %v5734_v24  ;;  %v5821_v25 = vadd.f32 %v5644_v54, %v2339_v20  ;;  %v2238_v42 = vsub.f32 %v5411_v41, %v5743_v57 }
 0x391   : > { %v2264_v4 = vadd.f32 1e-05, %v2214_v23  ;;  %v2310_v58 = vmul.f32 %v3921_v16, %v2235_v8  ;;  %v2391_v17 = vadd.f32 %v2390_v31, %v5800_v7  ;;  %v2340_v45 = vmul.f32 %v5629_v12, %v2309_v52 }
 0x392   : > { %v2190_v29 = vmul.f32 %v5780_v9, %v5780_v9  ;;  %v2239_v24 = vsub.f32 %v5421_v49, %v5760_v26 }
 0x393   : > { %3928 = vrsqrt.f32 %v2264_v4  ;;  %v2140_v0 = vpop.xlane.xlu1 %2139  ;;  %v2392_v23 = vadd.f32 %v2391_v17, %v5807_v53  ;;  %v2341_v2 = vmul.f32 %v5629_v12, %v2310_v58  ;;  %v5828_v61 = vadd.f32 %v5644_v54, %v2340_v45 }
 0x394   : > { %v2165_v10 = vmul.f32 0.0078125, %v2140_v0  ;;  %v3923_v18 = vpop.eup %3922 }
 0x395   : > { %v2311_v19 = vmul.f32 %v3923_v18, %v2236_v44  ;;  %v2393_v4 = vadd.f32 %v2392_v23, %v5814_v37  ;;  %v5835_v22 = vadd.f32 %v5644_v54, %v2341_v2  ;;  %v2682_v23 = vld [vmem:[%s6151_s12 + $0x68] sm:$0xff] }
 0x396   : > { %v2215_v32 = vsub.f32 %v2165_v10, %v2190_v29  ;;  %v2240_v10 = vsub.f32 %v5427_v60, %v5780_v9  ;;  %v2596_v2 = vld [vmem:[%s6148_s9 + $0x68] sm:$0xff] }
 0x397   : > { %v2342_v5 = vmul.f32 %v5629_v12, %v2311_v19  ;;  %v2394_v30 = vadd.f32 %v2393_v4, %v5821_v25  ;;  %v2597_v19 = vld [vmem:[%s6148_s9 + $0x70] sm:$0xff]  ;;  %v2595_v4 = vld [vmem:[%s6148_s9 + $0x60] sm:$0xff] }
 0x398   : > { %v2265_v47 = vadd.f32 1e-05, %v2215_v32  ;;  %v3925_v21 = vpop.eup %3924 }
 0x399   : > { %v2312_v43 = vmul.f32 %v3925_v21, %v2237_v55  ;;  %v2395_v0 = vadd.f32 %v2394_v30, %v5828_v61  ;;  %v5840_v14 = vadd.f32 %v5644_v54, %v2342_v5  ;;  %v2683_v55 = vld [vmem:[%s6151_s12 + $0x70] sm:$0xff]  ;;  %v2678_v5 = vld [vmem:[%s6151_s12 + $0x48] sm:$0xff] }
 0x39a   : > { %3930 = vrsqrt.f32 %v2265_v47  ;;  %v2675_v30 = vld [vmem:[%s6151_s12 + $0x30] sm:$0xff] }
 0x39b   : > { %v2343_v41 = vmul.f32 %v5629_v12, %v2312_v43  ;;  %v2396_v29 = vadd.f32 %v2395_v0, %v5835_v22  ;;  %v2679_v43 = vld [vmem:[%s6151_s12 + $0x50] sm:$0xff]  ;;  %v2673_v0 = vld [vmem:[%s6151_s12 + $0x20] sm:$0xff] }
 0x39c   : > { %v3927_v56 = vpop.eup %3926 }
 0x39d   : > { %v2313_v27 = vmul.f32 %v3927_v56, %v2238_v42  ;;  %v5845_v49 = vadd.f32 %v5644_v54, %v2343_v41  ;;  %v2397_v6 = vadd.f32 %v2396_v29, %v5840_v14  ;;  %v2681_v56 = vld [vmem:[%s6151_s12 + $0x60] sm:$0xff]  ;;  %v2680_v42 = vld [vmem:[%s6151_s12 + $0x58] sm:$0xff]  ;;  %v2593_v41 = vld [vmem:[%s6148_s9 + $0x50] sm:$0xff] }
 0x39e   : > { %v2672_v29 = vld [vmem:[%s6151_s12 + $0x18] sm:$0xff] }
 0x39f   : > { %v2344_v39 = vmul.f32 %v5629_v12, %v2313_v27  ;;  %v2398_v32 = vadd.f32 %v2397_v6, %v5845_v49  ;;  %v2594_v27 = vld [vmem:[%s6148_s9 + $0x58] sm:$0xff] }
 0x3a0   : > { %v3929_v62 = vpop.eup %3928  ;;  %v2590_v6 = vld [vmem:[%s6148_s9 + $0x38] sm:$0xff] }
 0x3a1   : > { %v2314_v57 = vmul.f32 %v3929_v62, %v2239_v24  ;;  %v5852_v16 = vadd.f32 %v5644_v54, %v2344_v39  ;;  %v2677_v24 = vld [vmem:[%s6151_s12 + $0x40] sm:$0xff]  ;;  %v2676_v62 = vld [vmem:[%s6151_s12 + $0x38] sm:$0xff]  ;;  %v2592_v39 = vld [vmem:[%s6148_s9 + $0x48] sm:$0xff] }
 0x3a3   : > { %v2345_v26 = vmul.f32 %v5629_v12, %v2314_v57  ;;  %v2399_v52 = vadd.f32 %v2398_v32, %v5852_v16  ;;  %v2674_v57 = vld [vmem:[%s6151_s12 + $0x28] sm:$0xff] }
 0x3a4   : > { %v2588_v32 = vld [vmem:[%s6148_s9 + $0x28] sm:$0xff] }
 0x3a5   : > { %v5855_v3 = vadd.f32 %v5644_v54, %v2345_v26  ;;  %v2671_v26 = vld [vmem:[%s6151_s12 + $0x10] sm:$0xff] }
 0x3a7   : > { %v3931_v40 = vpop.eup %3930  ;;  %v2400_v60 = vadd.f32 %v2399_v52, %v5855_v3  ;;  %v2586_v52 = vld [vmem:[%s6148_s9 + $0x18] sm:$0xff] }
 0x3a8   : > { %v2315_v59 = vmul.f32 %v3931_v40, %v2240_v10  ;;  %v2591_v10 = vld [vmem:[%s6148_s9 + $0x40] sm:$0xff]  ;;  %v2670_v40 = vld [vmem:[%s6151_s12 + $0x8] sm:$0xff] }
 0x3aa   : > { %v2346_v8 = vmul.f32 %v5629_v12, %v2315_v59  ;;  %v2598_v12 = vld [vmem:[%s6148_s9 + $0x78] sm:$0xff]  ;;  %v2589_v59 = vld [vmem:[%s6148_s9 + $0x30] sm:$0xff] }
 0x3ac   : > { %v5861_v18 = vadd.f32 %v5644_v54, %v2346_v8  ;;  %v2684_v54 = vld [vmem:[%s6151_s12 + $0x78] sm:$0xff]  ;;  %v2587_v8 = vld [vmem:[%s6148_s9 + $0x20] sm:$0xff] }
 0x3ae   : > { %v2401_v9 = vsel %vm543_vm1, %v5861_v18, 0.0 }
 0x3af   : > { %v2402_v31 = vadd.f32 %v2401_v9, %v2400_v60  ;;  %v2585_v60 = vld [vmem:[%s6148_s9 + $0x10] sm:$0xff]  ;;  %v2584_v9 = vld [vmem:[%s6148_s9 + $0x8] sm:$0xff] }
 0x3b1   : > { %v2403_v47 = vrot.slane %v2402_v31, 4 }
 0x3b3   : > { %v2404_v20 = vadd.f32 %v2403_v47, %v2402_v31  ;;  %v2583_v31 = vld [vmem:[%s6148_s9] sm:$0xff] }
 0x3b4   : > { %v2669_v47 = vld [vmem:[%s6151_s12] sm:$0xff] }
 0x3b5   : > { %v2405_v44 = vrot.slane %v2404_v20, 2 }
 0x3b7   : > { %v2406_v58 = vadd.f32 %v2405_v44, %v2404_v20 }
 0x3b9   : > { %v2407_v21 = vrot.slane %v2406_v58, 1 }
 0x3bb   : > { %v2408_v17 = vadd.f32 %v2407_v21, %v2406_v58 }
 0x3bd   : > { %v2410_v45 = vmul.f32 0.0051020407, %v2408_v17  ;;  %v2755_v17 = vlaneseq }
 0x3bf   : > { %3614 = vmatmul.mubr.f32.vlgmr.msra.gmra.mxu0 %v2410_v45  ;;  %3649 = vmatmul.mubr.f32.vlgmr.msra.gmra.mxu1 %v2410_v45  ;;  %v2756_v45 = vshrl.u32 %v2755_v17, 7 }
 0x3c0   : > { %3652 = vmatpush3.xpose.msra.mxu0 %v2598_v12  ;;  %3687 = vmatpush3.msra.mxu1 %v2684_v54 }
 0x3c1   : > { %3653 = vmatprep.subr.mxu0 %v6193_v36  ;;  %3688 = vmatprep.subr.mxu1 %v6193_v36  ;;  %v2757_v12 = vsub.s32 0, %v2756_v45 }
 0x3c2   : > { %3689 = vmatpush3.msra.mxu1 %v2683_v55  ;;  %3683 = vmatprep.mubr.msk.f32.mxu0 %vm4041_vm0, %v6193_v36 }
 0x3c3   : > { %3690 = vmatprep.subr.mxu1 %v6193_v36  ;;  %3718 = vmatprep.mubr.msk.f32.mxu1 %vm4041_vm0, %v6193_v36 }
 0x3c4   : > { %3654 = vmatpush3.xpose.msra.mxu0 %v2597_v19  ;;  %3691 = vmatpush3.msra.mxu1 %v2682_v23 }
 0x3c5   : > { %3655 = vmatprep.subr.mxu0 %v6193_v36  ;;  %3692 = vmatprep.subr.mxu1 %v6193_v36 }
 0x3c6   : > { %3693 = vmatpush3.msra.mxu1 %v2681_v56 }
 0x3c7   : > { %3694 = vmatprep.subr.mxu1 %v6193_v36 }
 0x3c8   : > { %3656 = vmatpush3.xpose.msra.mxu0 %v2596_v2  ;;  %3695 = vmatpush3.msra.mxu1 %v2680_v42 }
 0x3c9   : > { %3657 = vmatprep.subr.mxu0 %v6193_v36  ;;  %3696 = vmatprep.subr.mxu1 %v6193_v36 }
 0x3ca   : > { %3697 = vmatpush3.msra.mxu1 %v2679_v43 }
 0x3cb   : > { %3698 = vmatprep.subr.mxu1 %v6193_v36 }
 0x3cc   : > { %3658 = vmatpush3.xpose.msra.mxu0 %v2595_v4  ;;  %3699 = vmatpush3.msra.mxu1 %v2678_v5 }
 0x3cd   : > { %3659 = vmatprep.subr.mxu0 %v6193_v36  ;;  %3700 = vmatprep.subr.mxu1 %v6193_v36 }
 0x3ce   : > { %3701 = vmatpush3.msra.mxu1 %v2677_v24 }
 0x3cf   : > { %3702 = vmatprep.subr.mxu1 %v6193_v36 }
 0x3d0   : > { %3660 = vmatpush3.xpose.msra.mxu0 %v2594_v27  ;;  %3703 = vmatpush3.msra.mxu1 %v2676_v62 }
 0x3d1   : > { %3661 = vmatprep.subr.mxu0 %v6193_v36  ;;  %3704 = vmatprep.subr.mxu1 %v6193_v36 }
 0x3d2   : > { %3705 = vmatpush3.msra.mxu1 %v2675_v30 }
 0x3d3   : > { %3706 = vmatprep.subr.mxu1 %v6193_v36 }
 0x3d4   : > { %3662 = vmatpush3.xpose.msra.mxu0 %v2593_v41  ;;  %3707 = vmatpush3.msra.mxu1 %v2674_v57 }
 0x3d5   : > { %3663 = vmatprep.subr.mxu0 %v6193_v36  ;;  %3708 = vmatprep.subr.mxu1 %v6193_v36 }
 0x3d6   : > { %3709 = vmatpush3.msra.mxu1 %v2673_v0 }
 0x3d7   : > { %3710 = vmatprep.subr.mxu1 %v6193_v36 }
 0x3d8   : > { %3664 = vmatpush3.xpose.msra.mxu0 %v2592_v39  ;;  %3711 = vmatpush3.msra.mxu1 %v2672_v29 }
 0x3d9   : > { %3665 = vmatprep.subr.mxu0 %v6193_v36  ;;  %3712 = vmatprep.subr.mxu1 %v6193_v36 }
 0x3da   : > { %3713 = vmatpush3.msra.mxu1 %v2671_v26 }
 0x3db   : > { %3714 = vmatprep.subr.mxu1 %v6193_v36 }
 0x3dc   : > { %3666 = vmatpush3.xpose.msra.mxu0 %v2591_v10  ;;  %3715 = vmatpush3.msra.mxu1 %v2670_v40 }
 0x3dd   : > { %3667 = vmatprep.subr.mxu0 %v6193_v36  ;;  %3716 = vmatprep.subr.mxu1 %v6193_v36 }
 0x3de   : > { %3717 = vmatpush3.msra.mxu1 %v2669_v47 }
 0x3e0   : > { %3668 = vmatpush3.xpose.msra.mxu0 %v2590_v6 }
 0x3e1   : > { %3669 = vmatprep.subr.mxu0 %v6193_v36 }
 0x3e4   : > { %3670 = vmatpush3.xpose.msra.mxu0 %v2589_v59 }
 0x3e5   : > { %3671 = vmatprep.subr.mxu0 %v6193_v36 }
 0x3e8   : > { %3672 = vmatpush3.xpose.msra.mxu0 %v2588_v32 }
 0x3e9   : > { %3673 = vmatprep.subr.mxu0 %v6193_v36 }
 0x3ec   : > { %3674 = vmatpush3.xpose.msra.mxu0 %v2587_v8 }
 0x3ed   : > { %3675 = vmatprep.subr.mxu0 %v6193_v36 }
 0x3f0   : > { %3676 = vmatpush3.xpose.msra.mxu0 %v2586_v52 }
 0x3f1   : > { %3677 = vmatprep.subr.mxu0 %v6193_v36 }
 0x3f4   : > { %3678 = vmatpush3.xpose.msra.mxu0 %v2585_v60 }
 0x3f5   : > { %3679 = vmatprep.subr.mxu0 %v6193_v36 }
 0x3f8   : > { %3680 = vmatpush3.xpose.msra.mxu0 %v2584_v9 }
 0x3f9   : > { %3681 = vmatprep.subr.mxu0 %v6193_v36 }
 0x3fc   : > { %3682 = vmatpush3.xpose.msra.mxu0 %v2583_v31 }
 0x47f   : > { %v2493_v20 = vpop.f32.mrf.mxu0  ;;  %v2579_v44 = vpop.f32.mrf.mxu1 }
 0x480   : > { %3684 = vmatmul.mubr.f32.vlgmr.msra.gmra.mxu0 %v2493_v20  ;;  %3719 = vmatmul.mubr.f32.vlgmr.msra.gmra.mxu1 %v2579_v44 }
 0x481   : > { %v3615_v58 = vpop.f32.mrf.mxu0  ;;  %v3650_v21 = vpop.f32.mrf.mxu1 }
 0x540   : > { %v2665_v36 = vpop.f32.mrf.mxu0  ;;  %v2751_v54 = vpop.f32.mrf.mxu1 }
 0x541   : > { %v2758_v55 = vrot.slane %v2665_v36, %v2757_v12  ;;  %v5996_v19 = vrot.slane %v2751_v54, %v2757_v12 }
 0x542   : > { %v3685_v23 = vpop.f32.mrf.mxu0  ;;  %v3720_v56 = vpop.f32.mrf.mxu1 }
 0x543   : > { %v2760_v2 = vmul.f32 %v2758_v55, %v5657_v46  ;;  %v2759_v42 = vmul.f32 %v2758_v55, %v5654_v51  ;;  %v2762_v43 = vmul.f32 %v2758_v55, %v5685_v50  ;;  %v2761_v4 = vmul.f32 %v2758_v55, %v5664_v35 }
 0x544   : > { %v2764_v5 = vmul.f32 %v2758_v55, %v5711_v11  ;;  %v2763_v24 = vmul.f32 %v2758_v55, %v5705_v15  ;;  %v2766_v27 = vmul.f32 %v2758_v55, %v5732_v28  ;;  %v2765_v62 = vmul.f32 %v2758_v55, %v5724_v63 }
 0x545   : > { %2786 = vadd.xlane.f32.xlu1 %v2760_v2  ;;  %2784 = vadd.xlane.f32.xlu0 %v2759_v42  ;;  %v2768_v30 = vmul.f32 %v2758_v55, %v5757_v33  ;;  %v2767_v41 = vmul.f32 %v2758_v55, %v5746_v13  ;;  %v2770_v57 = vmul.f32 %v2758_v55, %v5775_v34 }
 0x546   : > { %v2769_v0 = vmul.f32 %v2758_v55, %v5766_v48  ;;  %v2772_v39 = vmul.f32 %v2758_v55, %v5791_v38  ;;  %v2771_v29 = vmul.f32 %v2758_v55, %v5784_v1  ;;  %v2774_v26 = vmul.f32 %v2758_v55, %v5807_v53 }
 0x547   : > { %v2773_v10 = vmul.f32 %v2758_v55, %v5800_v7  ;;  %v2776_v40 = vmul.f32 %v2758_v55, %v5821_v25  ;;  %v2775_v6 = vmul.f32 %v2758_v55, %v5814_v37  ;;  %v2778_v59 = vmul.f32 %v2758_v55, %v5835_v22 }
 0x548   : > { %v2777_v32 = vmul.f32 %v2758_v55, %v5828_v61  ;;  %v2780_v8 = vmul.f32 %v2758_v55, %v5845_v49  ;;  %v2779_v52 = vmul.f32 %v2758_v55, %v5840_v14  ;;  %v2782_v60 = vmul.f32 %v2758_v55, %v5855_v3 }
 0x549   : > { %2790 = vadd.xlane.f32.xlu1 %v2762_v43  ;;  %2788 = vadd.xlane.f32.xlu0 %v2761_v4  ;;  %v2781_v9 = vmul.f32 %v2758_v55, %v5852_v16  ;;  %v2783_v31 = vmul.f32 %v2758_v55, %v5861_v18 }
 0x54b   : > { %v2832_v47 = vsel %vm543_vm1, %v2783_v31, 0.0 }
 0x54d   : > { %2794 = vadd.xlane.f32.xlu1 %v2764_v5  ;;  %2792 = vadd.xlane.f32.xlu0 %v2763_v24 }
 0x551   : > { %2798 = vadd.xlane.f32.xlu1 %v2766_v27  ;;  %2796 = vadd.xlane.f32.xlu0 %v2765_v62 }
 0x555   : > { %2802 = vadd.xlane.f32.xlu1 %v2768_v30  ;;  %2800 = vadd.xlane.f32.xlu0 %v2767_v41 }
 0x559   : > { %2806 = vadd.xlane.f32.xlu1 %v2770_v57  ;;  %2804 = vadd.xlane.f32.xlu0 %v2769_v0 }
 0x55d   : > { %2810 = vadd.xlane.f32.xlu1 %v2772_v39  ;;  %2808 = vadd.xlane.f32.xlu0 %v2771_v29 }
 0x561   : > { %2814 = vadd.xlane.f32.xlu1 %v2774_v26  ;;  %2812 = vadd.xlane.f32.xlu0 %v2773_v10 }
 0x565   : > { %2818 = vadd.xlane.f32.xlu1 %v2776_v40  ;;  %2816 = vadd.xlane.f32.xlu0 %v2775_v6 }
 0x569   : > { %2822 = vadd.xlane.f32.xlu1 %v2778_v59  ;;  %2820 = vadd.xlane.f32.xlu0 %v2777_v32 }
 0x56d   : > { %2826 = vadd.xlane.f32.xlu1 %v2780_v8  ;;  %2824 = vadd.xlane.f32.xlu0 %v2779_v52 }
 0x571   : > { %2830 = vadd.xlane.f32.xlu1 %v2782_v60  ;;  %2828 = vadd.xlane.f32.xlu0 %v2781_v9 }
 0x575   : > { %2833 = vadd.xlane.f32.xlu0 %v2832_v47 }
 0x5ce   : > { %v2787_v20 = vpop.xlane.xlu1 %2786  ;;  %v2785_v44 = vpop.xlane.xlu0 %2784 }
 0x5cf   : > { %v3190_v58 = vmul.f32 -0.088388346, %v2787_v20  ;;  %v3189_v21 = vmul.f32 -0.088388346, %v2785_v44 }
 0x5d1   : > { %v2887_v17 = vmul.f32 1.442695, %v3190_v58  ;;  %v2885_v45 = vmul.f32 1.442695, %v3189_v21 }
 0x5d2   : > { %v2791_v12 = vpop.xlane.xlu1 %2790  ;;  %v2789_v36 = vpop.xlane.xlu0 %2788 }
 0x5d3   : > { %3932 = vpow2.f32 %v2887_v17  ;;  %v3192_v54 = vmul.f32 -0.088388346, %v2791_v12  ;;  %v3191_v23 = vmul.f32 -0.088388346, %v2789_v36 }
 0x5d4   : > { %3934 = vpow2.f32 %v2885_v45 }
 0x5d5   : > { %v2891_v56 = vmul.f32 1.442695, %v3192_v54  ;;  %v2889_v2 = vmul.f32 1.442695, %v3191_v23 }
 0x5d6   : > { %v2795_v55 = vpop.xlane.xlu1 %2794  ;;  %v2793_v42 = vpop.xlane.xlu0 %2792 }
 0x5d7   : > { %3936 = vpow2.f32 %v2891_v56  ;;  %v3194_v43 = vmul.f32 -0.088388346, %v2795_v55  ;;  %v3193_v4 = vmul.f32 -0.088388346, %v2793_v42 }
 0x5d8   : > { %3938 = vpow2.f32 %v2889_v2 }
 0x5d9   : > { %v2895_v5 = vmul.f32 1.442695, %v3194_v43  ;;  %v2893_v24 = vmul.f32 1.442695, %v3193_v4 }
 0x5da   : > { %v2799_v27 = vpop.xlane.xlu1 %2798  ;;  %v2797_v62 = vpop.xlane.xlu0 %2796 }
 0x5db   : > { %3940 = vpow2.f32 %v2895_v5  ;;  %v3196_v30 = vmul.f32 -0.088388346, %v2799_v27  ;;  %v3195_v41 = vmul.f32 -0.088388346, %v2797_v62 }
 0x5dc   : > { %3942 = vpow2.f32 %v2893_v24 }
 0x5dd   : > { %v2899_v57 = vmul.f32 1.442695, %v3196_v30  ;;  %v2897_v0 = vmul.f32 1.442695, %v3195_v41 }
 0x5de   : > { %v2803_v39 = vpop.xlane.xlu1 %2802  ;;  %v2801_v29 = vpop.xlane.xlu0 %2800 }
 0x5df   : > { %3944 = vpow2.f32 %v2899_v57  ;;  %v3198_v26 = vmul.f32 -0.088388346, %v2803_v39  ;;  %v3197_v10 = vmul.f32 -0.088388346, %v2801_v29 }
 0x5e0   : > { %v3933_v40 = vpop.eup %3932  ;;  %3946 = vpow2.f32 %v2897_v0 }
 0x5e1   : > { %v3935_v6 = vpop.eup %3934  ;;  %v2936_v59 = vadd.f32 1.0, %v3933_v40  ;;  %v2903_v32 = vmul.f32 1.442695, %v3198_v26  ;;  %v2901_v52 = vmul.f32 1.442695, %v3197_v10 }
 0x5e2   : > { %v2935_v8 = vadd.f32 1.0, %v3935_v6  ;;  %v2807_v60 = vpop.xlane.xlu1 %2806  ;;  %v2805_v9 = vpop.xlane.xlu0 %2804 }
 0x5e3   : > { %3948 = vrcp.f32 %v2936_v59  ;;  %v3200_v31 = vmul.f32 -0.088388346, %v2807_v60  ;;  %v3199_v47 = vmul.f32 -0.088388346, %v2805_v9 }
 0x5e4   : > { %v3937_v20 = vpop.eup %3936  ;;  %3950 = vrcp.f32 %v2935_v8 }
 0x5e5   : > { %v3939_v44 = vpop.eup %3938  ;;  %v2938_v58 = vadd.f32 1.0, %v3937_v20  ;;  %3952 = vpow2.f32 %v2903_v32  ;;  %v2907_v21 = vmul.f32 1.442695, %v3200_v31  ;;  %v2905_v45 = vmul.f32 1.442695, %v3199_v47 }
 0x5e6   : > { %v2937_v17 = vadd.f32 1.0, %v3939_v44  ;;  %3954 = vpow2.f32 %v2901_v52  ;;  %v2811_v12 = vpop.xlane.xlu1 %2810  ;;  %v2809_v36 = vpop.xlane.xlu0 %2808  ;;  %v6027_v32 = vld [vmem:[%s6152_s13] ss:$0 sm:$0xff] }
 0x5e7   : > { %3956 = vrcp.f32 %v2938_v58  ;;  %v3202_v54 = vmul.f32 -0.088388346, %v2811_v12  ;;  %v3201_v23 = vmul.f32 -0.088388346, %v2809_v36 }
 0x5e8   : > { %v3941_v56 = vpop.eup %3940  ;;  %3958 = vrcp.f32 %v2937_v17 }
 0x5e9   : > { %v3943_v2 = vpop.eup %3942  ;;  %v2940_v55 = vadd.f32 1.0, %v3941_v56  ;;  %3960 = vpow2.f32 %v2907_v21  ;;  %v2911_v42 = vmul.f32 1.442695, %v3202_v54  ;;  %v2909_v4 = vmul.f32 1.442695, %v3201_v23 }
 0x5ea   : > { %v2939_v43 = vadd.f32 1.0, %v3943_v2  ;;  %3962 = vpow2.f32 %v2905_v45  ;;  %v2815_v5 = vpop.xlane.xlu1 %2814  ;;  %v2813_v24 = vpop.xlane.xlu0 %2812 }
 0x5eb   : > { %3964 = vrcp.f32 %v2940_v55  ;;  %v3204_v27 = vmul.f32 -0.088388346, %v2815_v5  ;;  %v3203_v62 = vmul.f32 -0.088388346, %v2813_v24 }
 0x5ec   : > { %v3945_v30 = vpop.eup %3944  ;;  %3966 = vrcp.f32 %v2939_v43 }
 0x5ed   : > { %v3947_v41 = vpop.eup %3946  ;;  %v2942_v57 = vadd.f32 1.0, %v3945_v30  ;;  %3968 = vpow2.f32 %v2911_v42  ;;  %v2915_v0 = vmul.f32 1.442695, %v3204_v27  ;;  %v2913_v29 = vmul.f32 1.442695, %v3203_v62 }
 0x5ee   : > { %v2941_v39 = vadd.f32 1.0, %v3947_v41  ;;  %3970 = vpow2.f32 %v2909_v4  ;;  %v2819_v26 = vpop.xlane.xlu1 %2818  ;;  %v2817_v10 = vpop.xlane.xlu0 %2816 }
 0x5ef   : > { %3972 = vrcp.f32 %v2942_v57  ;;  %v3206_v40 = vmul.f32 -0.088388346, %v2819_v26  ;;  %v3205_v6 = vmul.f32 -0.088388346, %v2817_v10 }
 0x5f0   : > { %v3949_v59 = vpop.eup %3948  ;;  %3974 = vrcp.f32 %v2941_v39 }
 0x5f1   : > { %v3951_v8 = vpop.eup %3950  ;;  %v3015_v52 = vmul.f32 %v3949_v59, %v5996_v19  ;;  %3976 = vpow2.f32 %v2915_v0  ;;  %v2919_v60 = vmul.f32 1.442695, %v3206_v40  ;;  %v2917_v9 = vmul.f32 1.442695, %v3205_v6 }
 0x5f2   : > { %v3953_v31 = vpop.eup %3952  ;;  %v3014_v47 = vmul.f32 %v3951_v8, %v5996_v19  ;;  %3978 = vpow2.f32 %v2913_v29  ;;  %v2823_v20 = vpop.xlane.xlu1 %2822 }
 0x5f3   : > { %v2821_v44 = vpop.xlane.xlu0 %2820  ;;  %v3955_v58 = vpop.eup %3954  ;;  %v3047_v21 = vadd.f32 %v6027_v32, %v3015_v52  ;;  %v2944_v17 = vadd.f32 1.0, %v3953_v31  ;;  %3980 = vpow2.f32 %v2919_v60  ;;  %v3208_v45 = vmul.f32 -0.088388346, %v2823_v20 }
 0x5f4   : > { %v3957_v12 = vpop.eup %3956  ;;  %v3046_v36 = vadd.f32 %v6027_v32, %v3014_v47  ;;  %v2943_v54 = vadd.f32 1.0, %v3955_v58  ;;  %3982 = vpow2.f32 %v2917_v9  ;;  %v3207_v23 = vmul.f32 -0.088388346, %v2821_v44 }
 0x5f5   : > { %v3959_v56 = vpop.eup %3958  ;;  %v3072_v2 = vadd.f32 %v3047_v21, %v5657_v46  ;;  %v3017_v55 = vmul.f32 %v3957_v12, %v5996_v19  ;;  %3984 = vrcp.f32 %v2944_v17  ;;  %v2923_v42 = vmul.f32 1.442695, %v3208_v45 }
 0x5f6   : > { %v3961_v43 = vpop.eup %3960  ;;  %v3071_v4 = vadd.f32 %v3046_v36, %v5654_v51  ;;  %v3016_v5 = vmul.f32 %v3959_v56, %v5996_v19  ;;  %3986 = vrcp.f32 %v2943_v54  ;;  %v2921_v24 = vmul.f32 1.442695, %v3207_v23  ;;  %v2827_v27 = vpop.xlane.xlu1 %2826 }
 0x5f7   : > { %v2825_v62 = vpop.xlane.xlu0 %2824  ;;  %v3963_v30 = vpop.eup %3962  ;;  %3097 = vst [vmem:[%s6037_s21 + $0x8] sm:$0xff] %v3072_v2  ;;  %v3049_v41 = vadd.f32 %v6027_v32, %v3017_v55  ;;  %v2946_v57 = vadd.f32 1.0, %v3961_v43  ;;  %3988 = vpow2.f32 %v2923_v42  ;;  %v3210_v46 = vmul.f32 -0.088388346, %v2827_v27 }
 0x5f8   : > { %v3965_v0 = vpop.eup %3964  ;;  %3096 = vst [vmem:[%s6037_s21] sm:$0xff] %v3071_v4  ;;  %v3048_v39 = vadd.f32 %v6027_v32, %v3016_v5  ;;  %v2945_v29 = vadd.f32 1.0, %v3963_v30  ;;  %3990 = vpow2.f32 %v2921_v24  ;;  %v3209_v51 = vmul.f32 -0.088388346, %v2825_v62 }
 0x5f9   : > { %v3967_v26 = vpop.eup %3966  ;;  %v3074_v10 = vadd.f32 %v3049_v41, %v5685_v50  ;;  %v3019_v40 = vmul.f32 %v3965_v0, %v5996_v19  ;;  %3992 = vrcp.f32 %v2946_v57  ;;  %v2927_v6 = vmul.f32 1.442695, %v3210_v46 }
 0x5fa   : > { %v3969_v59 = vpop.eup %3968  ;;  %v3073_v8 = vadd.f32 %v3048_v39, %v5664_v35  ;;  %v3018_v52 = vmul.f32 %v3967_v26, %v5996_v19  ;;  %3994 = vrcp.f32 %v2945_v29  ;;  %v2925_v60 = vmul.f32 1.442695, %v3209_v51  ;;  %v2831_v9 = vpop.xlane.xlu1 %2830 }
 0x5fb   : > { %v2829_v31 = vpop.xlane.xlu0 %2828  ;;  %v3971_v47 = vpop.eup %3970  ;;  %3099 = vst [vmem:[%s6037_s21 + $0x18] sm:$0xff] %v3074_v10  ;;  %v3051_v20 = vadd.f32 %v6027_v32, %v3019_v40  ;;  %v2948_v44 = vadd.f32 1.0, %v3969_v59  ;;  %3996 = vpow2.f32 %v2927_v6  ;;  %v3212_v50 = vmul.f32 -0.088388346, %v2831_v9 }
 0x5fc   : > { %v3973_v58 = vpop.eup %3972  ;;  %3098 = vst [vmem:[%s6037_s21 + $0x10] sm:$0xff] %v3073_v8  ;;  %v3050_v21 = vadd.f32 %v6027_v32, %v3018_v52  ;;  %v2947_v17 = vadd.f32 1.0, %v3971_v47  ;;  %3998 = vpow2.f32 %v2925_v60  ;;  %v3211_v35 = vmul.f32 -0.088388346, %v2829_v31 }
 0x5fd   : > { %v3975_v45 = vpop.eup %3974  ;;  %v3076_v12 = vadd.f32 %v3051_v20, %v5711_v11  ;;  %v3021_v36 = vmul.f32 %v3973_v58, %v5996_v19  ;;  %4000 = vrcp.f32 %v2948_v44  ;;  %v2931_v54 = vmul.f32 1.442695, %v3212_v50 }
 0x5fe   : > { %v3977_v23 = vpop.eup %3976  ;;  %v3075_v56 = vadd.f32 %v3050_v21, %v5705_v15  ;;  %v3020_v2 = vmul.f32 %v3975_v45, %v5996_v19  ;;  %4002 = vrcp.f32 %v2947_v17  ;;  %v2929_v55 = vmul.f32 1.442695, %v3211_v35 }
 0x5ff   : > { %v2834_v42 = vpop.xlane.xlu0 %2833  ;;  %v3979_v43 = vpop.eup %3978  ;;  %3101 = vst [vmem:[%s6037_s21 + $0x28] sm:$0xff] %v3076_v12  ;;  %v3053_v4 = vadd.f32 %v6027_v32, %v3021_v36  ;;  %v2950_v5 = vadd.f32 1.0, %v3977_v23  ;;  %4004 = vpow2.f32 %v2931_v54 }
 0x600   : > { %v3213_v11 = vmul.f32 -0.088388346, %v2834_v42  ;;  %v3981_v24 = vpop.eup %3980  ;;  %3100 = vst [vmem:[%s6037_s21 + $0x20] sm:$0xff] %v3075_v56  ;;  %v3052_v27 = vadd.f32 %v6027_v32, %v3020_v2  ;;  %v2949_v62 = vadd.f32 1.0, %v3979_v43  ;;  %4006 = vpow2.f32 %v2929_v55 }
 0x601   : > { %v3983_v15 = vpop.eup %3982  ;;  %v3078_v30 = vadd.f32 %v3053_v4, %v5732_v28  ;;  %4008 = vrcp.f32 %v2950_v5  ;;  %v2952_v41 = vadd.f32 1.0, %v3981_v24 }
 0x602   : > { %v2933_v57 = vmul.f32 1.442695, %v3213_v11  ;;  %v3985_v46 = vpop.eup %3984  ;;  %v3077_v0 = vadd.f32 %v3052_v27, %v5724_v63  ;;  %4010 = vrcp.f32 %v2949_v62  ;;  %v2951_v39 = vadd.f32 1.0, %v3983_v15 }
 0x603   : > { %v3987_v29 = vpop.eup %3986  ;;  %3103 = vst [vmem:[%s6037_s21 + $0x38] sm:$0xff] %v3078_v30  ;;  %v3023_v51 = vmul.f32 %v3985_v46, %v5996_v19  ;;  %4012 = vrcp.f32 %v2952_v41 }
 0x604   : > { %v3989_v26 = vpop.eup %3988  ;;  %3102 = vst [vmem:[%s6037_s21 + $0x30] sm:$0xff] %v3077_v0  ;;  %v3022_v10 = vmul.f32 %v3987_v29, %v5996_v19  ;;  %4014 = vrcp.f32 %v2951_v39 }
 0x605   : > { %v3991_v40 = vpop.eup %3990  ;;  %v3055_v28 = vadd.f32 %v6027_v32, %v3023_v51  ;;  %v2954_v6 = vadd.f32 1.0, %v3989_v26  ;;  %4016 = vpow2.f32 %v2933_v57 }
 0x606   : > { %v3993_v59 = vpop.eup %3992  ;;  %v3054_v63 = vadd.f32 %v6027_v32, %v3022_v10  ;;  %v2953_v8 = vadd.f32 1.0, %v3991_v40 }
 0x607   : > { %v3995_v52 = vpop.eup %3994  ;;  %v3080_v60 = vadd.f32 %v3055_v28, %v5757_v33  ;;  %v3025_v9 = vmul.f32 %v3993_v59, %v5996_v19  ;;  %4018 = vrcp.f32 %v2954_v6 }
 0x608   : > { %v3997_v31 = vpop.eup %3996  ;;  %v3079_v47 = vadd.f32 %v3054_v63, %v5746_v13  ;;  %v3024_v20 = vmul.f32 %v3995_v52, %v5996_v19  ;;  %4020 = vrcp.f32 %v2953_v8 }
 0x609   : > { %v3999_v44 = vpop.eup %3998  ;;  %3105 = vst [vmem:[%s6037_s21 + $0x48] sm:$0xff] %v3080_v60  ;;  %v3057_v50 = vadd.f32 %v6027_v32, %v3025_v9  ;;  %v2956_v58 = vadd.f32 1.0, %v3997_v31 }
 0x60a   : > { %v4001_v21 = vpop.eup %4000  ;;  %3104 = vst [vmem:[%s6037_s21 + $0x40] sm:$0xff] %v3079_v47  ;;  %v3056_v33 = vadd.f32 %v6027_v32, %v3024_v20  ;;  %v2955_v17 = vadd.f32 1.0, %v3999_v44 }
 0x60b   : > { %v4003_v35 = vpop.eup %4002  ;;  %v3082_v45 = vadd.f32 %v3057_v50, %v5775_v34  ;;  %v3027_v13 = vmul.f32 %v4001_v21, %v5996_v19  ;;  %4022 = vrcp.f32 %v2956_v58 }
 0x60c   : > { %v4005_v12 = vpop.eup %4004  ;;  %v3081_v36 = vadd.f32 %v3056_v33, %v5766_v48  ;;  %v3026_v54 = vmul.f32 %v4003_v35, %v5996_v19  ;;  %4024 = vrcp.f32 %v2955_v17 }
 0x60d   : > { %v4007_v23 = vpop.eup %4006  ;;  %3107 = vst [vmem:[%s6037_s21 + $0x58] sm:$0xff] %v3082_v45  ;;  %v3059_v56 = vadd.f32 %v6027_v32, %v3027_v13  ;;  %v2958_v2 = vadd.f32 1.0, %v4005_v12 }
 0x60e   : > { %v4009_v55 = vpop.eup %4008  ;;  %3106 = vst [vmem:[%s6037_s21 + $0x50] sm:$0xff] %v3081_v36  ;;  %v3058_v34 = vadd.f32 %v6027_v32, %v3026_v54  ;;  %v2957_v42 = vadd.f32 1.0, %v4007_v23 }
 0x60f   : > { %v4011_v43 = vpop.eup %4010  ;;  %v3084_v4 = vadd.f32 %v3059_v56, %v5791_v38  ;;  %v3029_v48 = vmul.f32 %v4009_v55, %v5996_v19  ;;  %4026 = vrcp.f32 %v2958_v2 }
 0x610   : > { %v4013_v5 = vpop.eup %4012  ;;  %v3083_v11 = vadd.f32 %v3058_v34, %v5784_v1  ;;  %v3028_v24 = vmul.f32 %v4011_v43, %v5996_v19  ;;  %4028 = vrcp.f32 %v2957_v42 }
 0x611   : > { %v4015_v27 = vpop.eup %4014  ;;  %3109 = vst [vmem:[%s6037_s21 + $0x68] sm:$0xff] %v3084_v4  ;;  %v3061_v62 = vadd.f32 %v6027_v32, %v3029_v48  ;;  %v3031_v15 = vmul.f32 %v4013_v5, %v5996_v19 }
 0x612   : > { %v4017_v30 = vpop.eup %4016  ;;  %3108 = vst [vmem:[%s6037_s21 + $0x60] sm:$0xff] %v3083_v11  ;;  %v3060_v38 = vadd.f32 %v6027_v32, %v3028_v24  ;;  %v3030_v41 = vmul.f32 %v4015_v27, %v5996_v19 }
 0x613   : > { %v3086_v1 = vadd.f32 %v3061_v62, %v5807_v53  ;;  %v3063_v57 = vadd.f32 %v6027_v32, %v3031_v15  ;;  %v2959_v46 = vadd.f32 1.0, %v4017_v30 }
 0x614   : > { %v4019_v0 = vpop.eup %4018  ;;  %v3085_v39 = vadd.f32 %v3060_v38, %v5800_v7  ;;  %v3062_v29 = vadd.f32 %v6027_v32, %v3030_v41 }
 0x615   : > { %v4021_v51 = vpop.eup %4020  ;;  %3111 = vst [vmem:[%s6037_s21 + $0x78] sm:$0xff] %v3086_v1  ;;  %v3088_v26 = vadd.f32 %v3063_v57, %v5821_v25  ;;  %v3033_v10 = vmul.f32 %v4019_v0, %v5996_v19  ;;  %4030 = vrcp.f32 %v2959_v46 }
 0x616   : > { %3110 = vst [vmem:[%s6037_s21 + $0x70] sm:$0xff] %v3085_v39  ;;  %v3087_v53 = vadd.f32 %v3062_v29, %v5814_v37  ;;  %v3032_v40 = vmul.f32 %v4021_v51, %v5996_v19 }
 0x617   : > { %3113 = vst [vmem:[%s6037_s21 + $0x88] sm:$0xff] %v3088_v26  ;;  %v3065_v28 = vadd.f32 %v6027_v32, %v3033_v10 }
 0x618   : > { %v4023_v7 = vpop.eup %4022  ;;  %3112 = vst [vmem:[%s6037_s21 + $0x80] sm:$0xff] %v3087_v53  ;;  %v3064_v6 = vadd.f32 %v6027_v32, %v3032_v40 }
 0x619   : > { %v4025_v59 = vpop.eup %4024  ;;  %v3090_v25 = vadd.f32 %v3065_v28, %v5835_v22  ;;  %v3035_v63 = vmul.f32 %v4023_v7, %v5996_v19 }
 0x61a   : > { %v3089_v8 = vadd.f32 %v3064_v6, %v5828_v61  ;;  %v3034_v37 = vmul.f32 %v4025_v59, %v5996_v19 }
 0x61b   : > { %3115 = vst [vmem:[%s6037_s21 + $0x98] sm:$0xff] %v3090_v25  ;;  %v3067_v52 = vadd.f32 %v6027_v32, %v3035_v63 }
 0x61c   : > { %v4027_v60 = vpop.eup %4026  ;;  %3114 = vst [vmem:[%s6037_s21 + $0x90] sm:$0xff] %v3089_v8  ;;  %v3066_v9 = vadd.f32 %v6027_v32, %v3034_v37 }
 0x61d   : > { %v4029_v31 = vpop.eup %4028  ;;  %v3092_v47 = vadd.f32 %v3067_v52, %v5845_v49  ;;  %v3037_v22 = vmul.f32 %v4027_v60, %v5996_v19 }
 0x61e   : > { %v3091_v20 = vadd.f32 %v3066_v9, %v5840_v14  ;;  %v3036_v61 = vmul.f32 %v4029_v31, %v5996_v19 }
 0x61f   : > { %3117 = vst [vmem:[%s6037_s21 + $0xa8] sm:$0xff] %v3092_v47  ;;  %v3069_v44 = vadd.f32 %v6027_v32, %v3037_v22 }
 0x620   : > { %3116 = vst [vmem:[%s6037_s21 + $0xa0] sm:$0xff] %v3091_v20  ;;  %v3068_v50 = vadd.f32 %v6027_v32, %v3036_v61 }
 0x621   : > { %v3094_v58 = vadd.f32 %v3069_v44, %v5855_v3 }
 0x622   : > { %v4031_v21 = vpop.eup %4030  ;;  %v3093_v33 = vadd.f32 %v3068_v50, %v5852_v16 }
 0x623   : > { %3119 = vst [vmem:[%s6037_s21 + $0xb8] sm:$0xff] %v3094_v58  ;;  %v3038_v49 = vmul.f32 %v4031_v21, %v5996_v19 }
 0x624   : > { %3118 = vst [vmem:[%s6037_s21 + $0xb0] sm:$0xff] %v3093_v33 }
 0x625   : > { %v3070_v17 = vadd.f32 %v6027_v32, %v3038_v49 }
 0x627   : > { %v3095_v14 = vadd.f32 %v3070_v17, %v5861_v18 }
 0x629   : > { %3120 = vst [vmem:[%s6037_s21 + $0xc0] sm:$0xf] %v3095_v14 }
 0x62a PF: > { %s24_s29 = sadd.s32 1, %s4038_s29  }
 0x62b   : > { %p21_p4 = scmp.ge.s32.totalorder %s24_s29, 4  }
 0x62d   :  { %23 = sbr.rel (!%p21_p4) target bundleno = 1 (0x1), region = 106 }

</bundles_post_ra>
